<compile_context>
chip_gen: v7x
topology: tpu7x:2x2x1
jax: 0.10.0
libtpu: 0.0.40
codegen_flags: <defaults>
</compile_context>

<pallas_src>
import functools

import jax
import jax.numpy as jnp
from jax import lax
from jax.experimental import pallas as pl
from jax.experimental.pallas import tpu as pltpu

KSIZE = 7
PAD = 3           # padding = 3 for kernel_size = 7 (matches the PyTorch module)
N_ACC = 4         # independent partial accumulators (break the FMA dep chain)


def _spatial_attention_kernel(w_ref, x_ref, o_ref, stack_ref, *, W, lane_chunk):
    # w_ref    : SMEM (2*K*K,) f32    -- conv1 weights, flattened [c, i, j]
    # x_ref    : VMEM (C, H, Lb)      -- Lb = tile_n * W (samples packed on lanes)
    # o_ref    : VMEM (H, Lb)
    # stack_ref: VMEM (14*Hp, Lb) f32 -- 14 row-padded, lane-shifted+masked maps
    C, H, Lb = x_ref.shape
    Hp = stack_ref.shape[0] // (2 * KSIZE)
    Lc = lane_chunk

    # Slab base rows; the dj == 0 slabs double as the row-padded avg/max maps.
    base = [[(c * KSIZE + j) * Hp for j in range(KSIZE)] for c in range(2)]
    pad_slab = [base[c][PAD] for c in range(2)]

    # Zero only the halo rows of the dj == 0 slabs (every step, so correctness
    # never depends on program_id == 0 under "parallel" megacore sharding);
    # the interior rows are overwritten in phase A and the other 12 slabs are
    # fully rewritten in phase B.
    for c in range(2):
        b0 = pad_slab[c]
        stack_ref[b0:b0 + PAD, :] = jnp.zeros((PAD, Lb), jnp.float32)
        stack_ref[b0 + PAD + H:b0 + Hp, :] = jnp.zeros(
            (Hp - PAD - H, Lb), jnp.float32)

    # ---- Phase A: fused one-pass channel mean + max (lane-chunked) ---------
    # TODO(synk): for very large C on v7x add a trailing C-tiled "arbitrary"
    # reduction grid axis (running sum / running max in scratch, conv + sigmoid
    # finalized under pl.when(last)); whole-C blocks are assumed here.
    inv_c = jnp.float32(1.0 / C)
    for k0 in range(0, Lb, Lc):
        s = x_ref[0, :, k0:k0 + Lc].astype(jnp.float32)
        m = s
        for c in range(1, C):
            xc = x_ref[c, :, k0:k0 + Lc].astype(jnp.float32)
            s = s + xc
            m = jnp.maximum(m, xc)
        stack_ref[pad_slab[0] + PAD:pad_slab[0] + PAD + H, k0:k0 + Lc] = s * inv_c
        stack_ref[pad_slab[1] + PAD:pad_slab[1] + PAD + H, k0:k0 + Lc] = m

    # ---- Phase B: the 12 lane-shifted + masked map variants (full width) ---
    # lane_col = column of each lane within its packed sample; the per-dj
    # masks emulate the conv zero-padding along W and stop cross-sample
    # leakage.  Masks are hoisted out of the channel loop (computed once per
    # dj, reused for both the avg and the max map).
    lane_col = lax.broadcasted_iota(jnp.int32, (1, Lb), 1) % W
    for j in range(KSIZE):
        dj = j - PAD
        if dj == 0:
            continue
        src = lane_col + dj
        valid = jnp.logical_and(src >= 0, src < W)             # (1, Lb)
        for c in range(2):
            pm = stack_ref[pad_slab[c]:pad_slab[c] + Hp, :]
            rolled = pltpu.roll(pm, shift=(-dj) % Lb, axis=1)   # XLU slot
            stack_ref[base[c][j]:base[c][j] + Hp, :] = jnp.where(valid, rolled, 0.0)

    # ---- Phase C: 98-tap conv with register-resident accumulators ----------
    taps = [w_ref[idx] for idx in range(2 * KSIZE * KSIZE)]
    for k0 in range(0, Lb, Lc):
        accs = [jnp.zeros((H, Lc), jnp.float32) for _ in range(N_ACC)]
        t = 0
        for c in range(2):
            for j in range(KSIZE):
                b0 = base[c][j]
                for i in range(KSIZE):
                    tap = taps[c * KSIZE * KSIZE + i * KSIZE + j]
                    piece = stack_ref[b0 + i:b0 + i + H, k0:k0 + Lc]
                    accs[t % N_ACC] = accs[t % N_ACC] + tap * piece
                    t += 1
        acc = (accs[0] + accs[1]) + (accs[2] + accs[3])
        o_ref[:, k0:k0 + Lc] = jax.nn.sigmoid(acc).astype(o_ref.dtype)  # EUP

    # TODO(synk): evaluate the banded-matrix MXU reformulation of phase C
    # (stack_ref is already laid out as the (14*Hp, Lb) contraction operand);
    # kept on the VPU here to guarantee exact-f32 conv accuracy.


def _vmem_capacity_bytes():
    """Physical per-core VMEM (64 MiB on v7x, 128 MiB on v5e/v6e)."""
    try:
        cap = int(pltpu.get_tpu_info().vmem_capacity_bytes)
        if cap > 0:
            return cap
    except Exception:
        pass
    return 64 * 1024 * 1024          # conservative fallback (v7x per-TC VMEM)


def _pick_tile_n(N, C, H, W, Hp, itemsize, budget_bytes):
    """Largest batch tile whose packed lane width obeys the BlockSpec lane
    rule, fits the per-generation VMEM budget (double-buffered in/out blocks
    plus the stacked-maps scratch), and - when N allows - leaves >= 2
    (preferably an even number of) grid steps so v7x's two TensorCores both
    get work and the block DMA pipelines."""
    def vmem_use(t):
        Lb = t * W
        return (2 * C * H * Lb * itemsize        # input block, double-buffered
                + 2 * H * Lb * itemsize          # output block, double-buffered
                + 2 * KSIZE * Hp * Lb * 4)       # stacked-maps scratch (f32)

    candidates = [t for t in range(1, N + 1)
                  if N % t == 0 and ((t * W) % 128 == 0 or t == N)]
    fitting = [t for t in candidates if vmem_use(t) <= budget_bytes] or [candidates[0]]
    multi = [t for t in fitting if N // t >= 2] or fitting
    even = [t for t in multi if (N // t) % 2 == 0] or multi
    return max(even)


def _pick_lane_chunk(Lb, H, max_vregs=48):
    """Largest lane chunk (multiple of 128 dividing Lb) such that the N_ACC
    partial accumulators plus the current tap slice stay register resident."""
    rows = -(-H // 8)                            # sublane row-tiles of (H, 128)
    vregs_per_128 = (N_ACC + 1) * rows
    max_mult = max(1, max_vregs // vregs_per_128)
    best = None
    m = 1
    while 128 * m <= Lb and m <= max_mult:
        if Lb % (128 * m) == 0:
            best = 128 * m
        m += 1
    return best if best is not None else Lb


def spatial_attention(x, w, *, tile_n=None):
    """x: (N, C, H, W), w: (1, 2, K, K) -> (N, 1, H, W).

    Matches the PyTorch SpatialAttention forward:
      sigmoid(conv7x7(concat([mean_C(x), max_C(x)]), padding=3, bias=False)).
    """
    N, C, H, W = x.shape
    assert w.shape == (1, 2, KSIZE, KSIZE), w.shape
    itemsize = jnp.dtype(x.dtype).itemsize
    Hp = -(-(H + 2 * PAD) // 8) * 8          # sublane-aligned padded slab height

    vmem_cap = _vmem_capacity_bytes()
    block_budget = min(vmem_cap // 3, 24 << 20)
    vmem_limit = max(32 << 20, min((vmem_cap * 3) // 4, 96 << 20))

    if tile_n is None:
        tile_n = _pick_tile_n(N, C, H, W, Hp, itemsize, block_budget)
    assert N % tile_n == 0
    Lb = tile_n * W
    lane_chunk = _pick_lane_chunk(Lb, H)

    # Lane-dense packing: (N, C, H, W) -> (C, H, N*W); consecutive samples sit
    # side by side on the lane axis.  Pure layout plumbing outside the kernel.
    xt = jnp.transpose(x, (1, 2, 0, 3)).reshape(C, H, N * W)
    w_flat = w.reshape(-1).astype(jnp.float32)

    y = pl.pallas_call(
        functools.partial(_spatial_attention_kernel, W=W, lane_chunk=lane_chunk),
        out_shape=jax.ShapeDtypeStruct((H, N * W), x.dtype),
        grid_spec=pltpu.PrefetchScalarGridSpec(
            num_scalar_prefetch=0,
            grid=(N // tile_n,),
            in_specs=[
                pl.BlockSpec(memory_space=pltpu.MemorySpace.SMEM),   # weights
                pl.BlockSpec((C, H, Lb), lambda n: (0, 0, n)),       # x tile
            ],
            out_specs=pl.BlockSpec((H, Lb), lambda n: (0, n)),
            scratch_shapes=[
                pltpu.VMEM((2 * KSIZE * Hp, Lb), jnp.float32),       # stacked maps
            ],
        ),
        compiler_params=pltpu.CompilerParams(
            dimension_semantics=("parallel",),
            vmem_limit_bytes=int(vmem_limit),
        ),
    )(w_flat, xt)

    # (H, N*W) -> (N, 1, H, W)
    return jnp.transpose(y.reshape(H, N, W), (1, 0, 2))[:, None, :, :]


def spatial_attention_ref(x, w):
    """Pure-JAX reference matching the PyTorch forward."""
    avg = jnp.mean(x, axis=1, keepdims=True)
    mx = jnp.max(x, axis=1, keepdims=True)
    xc = jnp.concatenate([avg, mx], axis=1)          # (N, 2, H, W)
    y = jax.lax.conv_general_dilated(
        xc, w, window_strides=(1, 1),
        padding=[(PAD, PAD), (PAD, PAD)],
        dimension_numbers=("NCHW", "OIHW", "NCHW"),
    )
    return jax.nn.sigmoid(y)


if __name__ == "__main__":
    key = jax.random.PRNGKey(0)
    kx, kw = jax.random.split(key)

    N, C, H, W = 2, 4, 16, 16
    x = jax.random.normal(kx, (N, C, H, W), dtype=jnp.float32)
    # deterministic conv1 weights: Conv2d(2, 1, 7, bias=False) -> (1, 2, 7, 7)
    fan_in = 2 * KSIZE * KSIZE
    bound = (1.0 / fan_in) ** 0.5
    w = jax.random.uniform(kw, (1, 2, KSIZE, KSIZE),
                           dtype=jnp.float32, minval=-bound, maxval=bound)

    out = jax.block_until_ready(spatial_attention(x, w))
    ref = jax.block_until_ready(spatial_attention_ref(x, w))

    assert out.shape == (N, 1, H, W), out.shape
    assert jnp.allclose(out, ref, atol=1e-4, rtol=1e-4), (
        float(jnp.max(jnp.abs(out - ref))))
    print("KERNEL_OK")
</pallas_src>

<mosaic_0001>
module attributes {stable_mosaic.version = 11 : i64} {
  func.func @_spatial_attention_kernel(%arg0: i32, %arg1: memref<98xf32, #tpu.memory_space<smem>>, %arg2: memref<4x16x32xf32, #tpu.memory_space<vmem>>, %arg3: memref<16x32xf32, #tpu.memory_space<vmem>>, %arg4: memref<336x32xf32, #tpu.memory_space<vmem>>) attributes {dimension_semantics = [#tpu.dimension_semantics<parallel>], iteration_bounds = array<i64: 1>, scalar_prefetch = 0 : i64, scratch_operands = 1 : i64, tpu.core_type = #tpu.core_type<tc>, window_params = [{transform_indices = @transform_0, window_bounds = array<i64: 98>}, {transform_indices = @transform_1, window_bounds = array<i64: 4, 16, 32>}, {transform_indices = @transform_2, window_bounds = array<i64: 16, 32>}]} {
    %cst = arith.constant 0.000000e+00 : f32
    %0 = vector.broadcast %cst : f32 to vector<3x32xf32>
    %c72 = arith.constant 72 : index
    %c0 = arith.constant 0 : index
    %1 = vector.load %arg4[%c72, %c0] : memref<336x32xf32, #tpu.memory_space<vmem>>, vector<3x32xf32>
    tpu.vector_store %arg4[%c72, %c0], %0 {strides = array<i32>} : memref<336x32xf32, #tpu.memory_space<vmem>>, vector<3x32xf32>,
    %cst_0 = arith.constant 0.000000e+00 : f32
    %2 = vector.broadcast %cst_0 : f32 to vector<5x32xf32>
    %c91 = arith.constant 91 : index
    %c0_1 = arith.constant 0 : index
    %3 = vector.load %arg4[%c91, %c0_1] : memref<336x32xf32, #tpu.memory_space<vmem>>, vector<5x32xf32>
    tpu.vector_store %arg4[%c91, %c0_1], %2 {strides = array<i32>} : memref<336x32xf32, #tpu.memory_space<vmem>>, vector<5x32xf32>,
    %cst_2 = arith.constant 0.000000e+00 : f32
    %4 = vector.broadcast %cst_2 : f32 to vector<3x32xf32>
    %c240 = arith.constant 240 : index
    %c0_3 = arith.constant 0 : index
    %5 = vector.load %arg4[%c240, %c0_3] : memref<336x32xf32, #tpu.memory_space<vmem>>, vector<3x32xf32>
    tpu.vector_store %arg4[%c240, %c0_3], %4 {strides = array<i32>} : memref<336x32xf32, #tpu.memory_space<vmem>>, vector<3x32xf32>,
    %cst_4 = arith.constant 0.000000e+00 : f32
    %6 = vector.broadcast %cst_4 : f32 to vector<5x32xf32>
    %c259 = arith.constant 259 : index
    %c0_5 = arith.constant 0 : index
    %7 = vector.load %arg4[%c259, %c0_5] : memref<336x32xf32, #tpu.memory_space<vmem>>, vector<5x32xf32>
    tpu.vector_store %arg4[%c259, %c0_5], %6 {strides = array<i32>} : memref<336x32xf32, #tpu.memory_space<vmem>>, vector<5x32xf32>,
    %c0_6 = arith.constant 0 : index
    %c0_7 = arith.constant 0 : index
    %c0_8 = arith.constant 0 : index
    %8 = vector.load %arg2[%c0_6, %c0_7, %c0_8] : memref<4x16x32xf32, #tpu.memory_space<vmem>>, vector<1x16x32xf32>
    %9 = vector.shape_cast %8 : vector<1x16x32xf32> to vector<16x32xf32>
    %c1 = arith.constant 1 : index
    %c0_9 = arith.constant 0 : index
    %c0_10 = arith.constant 0 : index
    %10 = vector.load %arg2[%c1, %c0_9, %c0_10] : memref<4x16x32xf32, #tpu.memory_space<vmem>>, vector<1x16x32xf32>
    %11 = vector.shape_cast %10 : vector<1x16x32xf32> to vector<16x32xf32>
    %12 = arith.addf %9, %11 : vector<16x32xf32>
    %13 = arith.maximumf %9, %11 : vector<16x32xf32>
    %c2 = arith.constant 2 : index
    %c0_11 = arith.constant 0 : index
    %c0_12 = arith.constant 0 : index
    %14 = vector.load %arg2[%c2, %c0_11, %c0_12] : memref<4x16x32xf32, #tpu.memory_space<vmem>>, vector<1x16x32xf32>
    %15 = vector.shape_cast %14 : vector<1x16x32xf32> to vector<16x32xf32>
    %16 = arith.addf %12, %15 : vector<16x32xf32>
    %17 = arith.maximumf %13, %15 : vector<16x32xf32>
    %c3 = arith.constant 3 : index
    %c0_13 = arith.constant 0 : index
    %c0_14 = arith.constant 0 : index
    %18 = vector.load %arg2[%c3, %c0_13, %c0_14] : memref<4x16x32xf32, #tpu.memory_space<vmem>>, vector<1x16x32xf32>
    %19 = vector.shape_cast %18 : vector<1x16x32xf32> to vector<16x32xf32>
    %20 = arith.addf %16, %19 : vector<16x32xf32>
    %21 = arith.maximumf %17, %19 : vector<16x32xf32>
    %cst_15 = arith.constant 2.500000e-01 : f32
    %22 = vector.broadcast %cst_15 : f32 to vector<16x32xf32>
    %23 = arith.mulf %20, %22 : vector<16x32xf32>
    %c75 = arith.constant 75 : index
    %c0_16 = arith.constant 0 : index
    %24 = vector.load %arg4[%c75, %c0_16] : memref<336x32xf32, #tpu.memory_space<vmem>>, vector<16x32xf32>
    tpu.vector_store %arg4[%c75, %c0_16], %23 {strides = array<i32>} : memref<336x32xf32, #tpu.memory_space<vmem>>, vector<16x32xf32>,
    %c243 = arith.constant 243 : index
    %c0_17 = arith.constant 0 : index
    %25 = vector.load %arg4[%c243, %c0_17] : memref<336x32xf32, #tpu.memory_space<vmem>>, vector<16x32xf32>
    tpu.vector_store %arg4[%c243, %c0_17], %21 {strides = array<i32>} : memref<336x32xf32, #tpu.memory_space<vmem>>, vector<16x32xf32>,
    %26 = tpu.iota {dimensions = array<i32: 1>} : vector<1x32xi32>
    %c16_i32 = arith.constant 16 : i32
    %c0_i32 = arith.constant 0 : i32
    %27 = arith.cmpi eq, %c16_i32, %c0_i32 : i32
    %c1_i32 = arith.constant 1 : i32
    %28 = arith.select %27, %c1_i32, %c16_i32 : i32
    %29 = vector.broadcast %28 : i32 to vector<1x32xi32>
    %30 = arith.remsi %26, %29 : vector<1x32xi32>
    %c0_i32_18 = arith.constant 0 : i32
    %31 = vector.broadcast %c0_i32_18 : i32 to vector<1x32xi32>
    %32 = arith.cmpi ne, %30, %31 : vector<1x32xi32>
    %c0_i32_19 = arith.constant 0 : i32
    %33 = vector.broadcast %c0_i32_19 : i32 to vector<1x32xi32>
    %34 = arith.cmpi slt, %30, %33 : vector<1x32xi32>
    %c0_i32_20 = arith.constant 0 : i32
    %35 = arith.cmpi slt, %28, %c0_i32_20 : i32
    %36 = vector.broadcast %35 : i1 to vector<1x32xi1>
    %37 = vector.broadcast %36 : vector<1x32xi1> to vector<1x32xi1>
    %38 = arith.xori %34, %37 : vector<1x32xi1>
    %39 = arith.andi %38, %32 : vector<1x32xi1>
    %40 = vector.broadcast %28 : i32 to vector<1x32xi32>
    %41 = arith.addi %30, %40 : vector<1x32xi32>
    %42 = arith.select %39, %41, %30 : vector<1x32xi1>, vector<1x32xi32>
    %c-3_i32 = arith.constant -3 : i32
    %43 = vector.broadcast %c-3_i32 : i32 to vector<1x32xi32>
    %44 = arith.addi %42, %43 : vector<1x32xi32>
    %c0_i32_21 = arith.constant 0 : i32
    %45 = vector.broadcast %c0_i32_21 : i32 to vector<1x32xi32>
    %46 = arith.cmpi sge, %44, %45 : vector<1x32xi32>
    %c16_i32_22 = arith.constant 16 : i32
    %47 = vector.broadcast %c16_i32_22 : i32 to vector<1x32xi32>
    %48 = arith.cmpi slt, %44, %47 : vector<1x32xi32>
    %49 = arith.andi %46, %48 : vector<1x32xi1>
    %c72_23 = arith.constant 72 : index
    %c0_24 = arith.constant 0 : index
    %50 = vector.load %arg4[%c72_23, %c0_24] : memref<336x32xf32, #tpu.memory_space<vmem>>, vector<24x32xf32>
    %c3_i32 = arith.constant 3 : i32
    %51 = tpu.dynamic_rotate %50 by %c3_i32 dim 1 : vector<24x32xf32>, i32 -> vector<24x32xf32>
    %cst_25 = arith.constant 0.000000e+00 : f32
    %52 = vector.shape_cast %49 : vector<1x32xi1> to vector<1x32xi1>
    %53 = vector.broadcast %52 : vector<1x32xi1> to vector<24x32xi1>
    %54 = vector.broadcast %cst_25 : f32 to vector<24x32xf32>
    %55 = arith.select %53, %51, %54 : vector<24x32xi1>, vector<24x32xf32>
    %c0_26 = arith.constant 0 : index
    %c0_27 = arith.constant 0 : index
    %56 = vector.load %arg4[%c0_26, %c0_27] : memref<336x32xf32, #tpu.memory_space<vmem>>, vector<24x32xf32>
    tpu.vector_store %arg4[%c0_26, %c0_27], %55 {strides = array<i32>} : memref<336x32xf32, #tpu.memory_space<vmem>>, vector<24x32xf32>,
    %c240_28 = arith.constant 240 : index
    %c0_29 = arith.constant 0 : index
    %57 = vector.load %arg4[%c240_28, %c0_29] : memref<336x32xf32, #tpu.memory_space<vmem>>, vector<24x32xf32>
    %c3_i32_30 = arith.constant 3 : i32
    %58 = tpu.dynamic_rotate %57 by %c3_i32_30 dim 1 : vector<24x32xf32>, i32 -> vector<24x32xf32>
    %cst_31 = arith.constant 0.000000e+00 : f32
    %59 = vector.shape_cast %49 : vector<1x32xi1> to vector<1x32xi1>
    %60 = vector.broadcast %59 : vector<1x32xi1> to vector<24x32xi1>
    %61 = vector.broadcast %cst_31 : f32 to vector<24x32xf32>
    %62 = arith.select %60, %58, %61 : vector<24x32xi1>, vector<24x32xf32>
    %c168 = arith.constant 168 : index
    %c0_32 = arith.constant 0 : index
    %63 = vector.load %arg4[%c168, %c0_32] : memref<336x32xf32, #tpu.memory_space<vmem>>, vector<24x32xf32>
    tpu.vector_store %arg4[%c168, %c0_32], %62 {strides = array<i32>} : memref<336x32xf32, #tpu.memory_space<vmem>>, vector<24x32xf32>,
    %c-2_i32 = arith.constant -2 : i32
    %64 = vector.broadcast %c-2_i32 : i32 to vector<1x32xi32>
    %65 = arith.addi %42, %64 : vector<1x32xi32>
    %c0_i32_33 = arith.constant 0 : i32
    %66 = vector.broadcast %c0_i32_33 : i32 to vector<1x32xi32>
    %67 = arith.cmpi sge, %65, %66 : vector<1x32xi32>
    %c16_i32_34 = arith.constant 16 : i32
    %68 = vector.broadcast %c16_i32_34 : i32 to vector<1x32xi32>
    %69 = arith.cmpi slt, %65, %68 : vector<1x32xi32>
    %70 = arith.andi %67, %69 : vector<1x32xi1>
    %c72_35 = arith.constant 72 : index
    %c0_36 = arith.constant 0 : index
    %71 = vector.load %arg4[%c72_35, %c0_36] : memref<336x32xf32, #tpu.memory_space<vmem>>, vector<24x32xf32>
    %c2_i32 = arith.constant 2 : i32
    %72 = tpu.dynamic_rotate %71 by %c2_i32 dim 1 : vector<24x32xf32>, i32 -> vector<24x32xf32>
    %cst_37 = arith.constant 0.000000e+00 : f32
    %73 = vector.shape_cast %70 : vector<1x32xi1> to vector<1x32xi1>
    %74 = vector.broadcast %73 : vector<1x32xi1> to vector<24x32xi1>
    %75 = vector.broadcast %cst_37 : f32 to vector<24x32xf32>
    %76 = arith.select %74, %72, %75 : vector<24x32xi1>, vector<24x32xf32>
    %c24 = arith.constant 24 : index
    %c0_38 = arith.constant 0 : index
    %77 = vector.load %arg4[%c24, %c0_38] : memref<336x32xf32, #tpu.memory_space<vmem>>, vector<24x32xf32>
    tpu.vector_store %arg4[%c24, %c0_38], %76 {strides = array<i32>} : memref<336x32xf32, #tpu.memory_space<vmem>>, vector<24x32xf32>,
    %c240_39 = arith.constant 240 : index
    %c0_40 = arith.constant 0 : index
    %78 = vector.load %arg4[%c240_39, %c0_40] : memref<336x32xf32, #tpu.memory_space<vmem>>, vector<24x32xf32>
    %c2_i32_41 = arith.constant 2 : i32
    %79 = tpu.dynamic_rotate %78 by %c2_i32_41 dim 1 : vector<24x32xf32>, i32 -> vector<24x32xf32>
    %cst_42 = arith.constant 0.000000e+00 : f32
    %80 = vector.shape_cast %70 : vector<1x32xi1> to vector<1x32xi1>
    %81 = vector.broadcast %80 : vector<1x32xi1> to vector<24x32xi1>
    %82 = vector.broadcast %cst_42 : f32 to vector<24x32xf32>
    %83 = arith.select %81, %79, %82 : vector<24x32xi1>, vector<24x32xf32>
    %c192 = arith.constant 192 : index
    %c0_43 = arith.constant 0 : index
    %84 = vector.load %arg4[%c192, %c0_43] : memref<336x32xf32, #tpu.memory_space<vmem>>, vector<24x32xf32>
    tpu.vector_store %arg4[%c192, %c0_43], %83 {strides = array<i32>} : memref<336x32xf32, #tpu.memory_space<vmem>>, vector<24x32xf32>,
    %c-1_i32 = arith.constant -1 : i32
    %85 = vector.broadcast %c-1_i32 : i32 to vector<1x32xi32>
    %86 = arith.addi %42, %85 : vector<1x32xi32>
    %c0_i32_44 = arith.constant 0 : i32
    %87 = vector.broadcast %c0_i32_44 : i32 to vector<1x32xi32>
    %88 = arith.cmpi sge, %86, %87 : vector<1x32xi32>
    %c16_i32_45 = arith.constant 16 : i32
    %89 = vector.broadcast %c16_i32_45 : i32 to vector<1x32xi32>
    %90 = arith.cmpi slt, %86, %89 : vector<1x32xi32>
    %91 = arith.andi %88, %90 : vector<1x32xi1>
    %c72_46 = arith.constant 72 : index
    %c0_47 = arith.constant 0 : index
    %92 = vector.load %arg4[%c72_46, %c0_47] : memref<336x32xf32, #tpu.memory_space<vmem>>, vector<24x32xf32>
    %c1_i32_48 = arith.constant 1 : i32
    %93 = tpu.dynamic_rotate %92 by %c1_i32_48 dim 1 : vector<24x32xf32>, i32 -> vector<24x32xf32>
    %cst_49 = arith.constant 0.000000e+00 : f32
    %94 = vector.shape_cast %91 : vector<1x32xi1> to vector<1x32xi1>
    %95 = vector.broadcast %94 : vector<1x32xi1> to vector<24x32xi1>
    %96 = vector.broadcast %cst_49 : f32 to vector<24x32xf32>
    %97 = arith.select %95, %93, %96 : vector<24x32xi1>, vector<24x32xf32>
    %c48 = arith.constant 48 : index
    %c0_50 = arith.constant 0 : index
    %98 = vector.load %arg4[%c48, %c0_50] : memref<336x32xf32, #tpu.memory_space<vmem>>, vector<24x32xf32>
    tpu.vector_store %arg4[%c48, %c0_50], %97 {strides = array<i32>} : memref<336x32xf32, #tpu.memory_space<vmem>>, vector<24x32xf32>,
    %c240_51 = arith.constant 240 : index
    %c0_52 = arith.constant 0 : index
    %99 = vector.load %arg4[%c240_51, %c0_52] : memref<336x32xf32, #tpu.memory_space<vmem>>, vector<24x32xf32>
    %c1_i32_53 = arith.constant 1 : i32
    %100 = tpu.dynamic_rotate %99 by %c1_i32_53 dim 1 : vector<24x32xf32>, i32 -> vector<24x32xf32>
    %cst_54 = arith.constant 0.000000e+00 : f32
    %101 = vector.shape_cast %91 : vector<1x32xi1> to vector<1x32xi1>
    %102 = vector.broadcast %101 : vector<1x32xi1> to vector<24x32xi1>
    %103 = vector.broadcast %cst_54 : f32 to vector<24x32xf32>
    %104 = arith.select %102, %100, %103 : vector<24x32xi1>, vector<24x32xf32>
    %c216 = arith.constant 216 : index
    %c0_55 = arith.constant 0 : index
    %105 = vector.load %arg4[%c216, %c0_55] : memref<336x32xf32, #tpu.memory_space<vmem>>, vector<24x32xf32>
    tpu.vector_store %arg4[%c216, %c0_55], %104 {strides = array<i32>} : memref<336x32xf32, #tpu.memory_space<vmem>>, vector<24x32xf32>,
    %c1_i32_56 = arith.constant 1 : i32
    %106 = vector.broadcast %c1_i32_56 : i32 to vector<1x32xi32>
    %107 = arith.addi %42, %106 : vector<1x32xi32>
    %c0_i32_57 = arith.constant 0 : i32
    %108 = vector.broadcast %c0_i32_57 : i32 to vector<1x32xi32>
    %109 = arith.cmpi sge, %107, %108 : vector<1x32xi32>
    %c16_i32_58 = arith.constant 16 : i32
    %110 = vector.broadcast %c16_i32_58 : i32 to vector<1x32xi32>
    %111 = arith.cmpi slt, %107, %110 : vector<1x32xi32>
    %112 = arith.andi %109, %111 : vector<1x32xi1>
    %c72_59 = arith.constant 72 : index
    %c0_60 = arith.constant 0 : index
    %113 = vector.load %arg4[%c72_59, %c0_60] : memref<336x32xf32, #tpu.memory_space<vmem>>, vector<24x32xf32>
    %c31_i32 = arith.constant 31 : i32
    %114 = tpu.dynamic_rotate %113 by %c31_i32 dim 1 : vector<24x32xf32>, i32 -> vector<24x32xf32>
    %cst_61 = arith.constant 0.000000e+00 : f32
    %115 = vector.shape_cast %112 : vector<1x32xi1> to vector<1x32xi1>
    %116 = vector.broadcast %115 : vector<1x32xi1> to vector<24x32xi1>
    %117 = vector.broadcast %cst_61 : f32 to vector<24x32xf32>
    %118 = arith.select %116, %114, %117 : vector<24x32xi1>, vector<24x32xf32>
    %c96 = arith.constant 96 : index
    %c0_62 = arith.constant 0 : index
    %119 = vector.load %arg4[%c96, %c0_62] : memref<336x32xf32, #tpu.memory_space<vmem>>, vector<24x32xf32>
    tpu.vector_store %arg4[%c96, %c0_62], %118 {strides = array<i32>} : memref<336x32xf32, #tpu.memory_space<vmem>>, vector<24x32xf32>,
    %c240_63 = arith.constant 240 : index
    %c0_64 = arith.constant 0 : index
    %120 = vector.load %arg4[%c240_63, %c0_64] : memref<336x32xf32, #tpu.memory_space<vmem>>, vector<24x32xf32>
    %c31_i32_65 = arith.constant 31 : i32
    %121 = tpu.dynamic_rotate %120 by %c31_i32_65 dim 1 : vector<24x32xf32>, i32 -> vector<24x32xf32>
    %cst_66 = arith.constant 0.000000e+00 : f32
    %122 = vector.shape_cast %112 : vector<1x32xi1> to vector<1x32xi1>
    %123 = vector.broadcast %122 : vector<1x32xi1> to vector<24x32xi1>
    %124 = vector.broadcast %cst_66 : f32 to vector<24x32xf32>
    %125 = arith.select %123, %121, %124 : vector<24x32xi1>, vector<24x32xf32>
    %c264 = arith.constant 264 : index
    %c0_67 = arith.constant 0 : index
    %126 = vector.load %arg4[%c264, %c0_67] : memref<336x32xf32, #tpu.memory_space<vmem>>, vector<24x32xf32>
    tpu.vector_store %arg4[%c264, %c0_67], %125 {strides = array<i32>} : memref<336x32xf32, #tpu.memory_space<vmem>>, vector<24x32xf32>,
    %c2_i32_68 = arith.constant 2 : i32
    %127 = vector.broadcast %c2_i32_68 : i32 to vector<1x32xi32>
    %128 = arith.addi %42, %127 : vector<1x32xi32>
    %c0_i32_69 = arith.constant 0 : i32
    %129 = vector.broadcast %c0_i32_69 : i32 to vector<1x32xi32>
    %130 = arith.cmpi sge, %128, %129 : vector<1x32xi32>
    %c16_i32_70 = arith.constant 16 : i32
    %131 = vector.broadcast %c16_i32_70 : i32 to vector<1x32xi32>
    %132 = arith.cmpi slt, %128, %131 : vector<1x32xi32>
    %133 = arith.andi %130, %132 : vector<1x32xi1>
    %c72_71 = arith.constant 72 : index
    %c0_72 = arith.constant 0 : index
    %134 = vector.load %arg4[%c72_71, %c0_72] : memref<336x32xf32, #tpu.memory_space<vmem>>, vector<24x32xf32>
    %c30_i32 = arith.constant 30 : i32
    %135 = tpu.dynamic_rotate %134 by %c30_i32 dim 1 : vector<24x32xf32>, i32 -> vector<24x32xf32>
    %cst_73 = arith.constant 0.000000e+00 : f32
    %136 = vector.shape_cast %133 : vector<1x32xi1> to vector<1x32xi1>
    %137 = vector.broadcast %136 : vector<1x32xi1> to vector<24x32xi1>
    %138 = vector.broadcast %cst_73 : f32 to vector<24x32xf32>
    %139 = arith.select %137, %135, %138 : vector<24x32xi1>, vector<24x32xf32>
    %c120 = arith.constant 120 : index
    %c0_74 = arith.constant 0 : index
    %140 = vector.load %arg4[%c120, %c0_74] : memref<336x32xf32, #tpu.memory_space<vmem>>, vector<24x32xf32>
    tpu.vector_store %arg4[%c120, %c0_74], %139 {strides = array<i32>} : memref<336x32xf32, #tpu.memory_space<vmem>>, vector<24x32xf32>,
    %c240_75 = arith.constant 240 : index
    %c0_76 = arith.constant 0 : index
    %141 = vector.load %arg4[%c240_75, %c0_76] : memref<336x32xf32, #tpu.memory_space<vmem>>, vector<24x32xf32>
    %c30_i32_77 = arith.constant 30 : i32
    %142 = tpu.dynamic_rotate %141 by %c30_i32_77 dim 1 : vector<24x32xf32>, i32 -> vector<24x32xf32>
    %cst_78 = arith.constant 0.000000e+00 : f32
    %143 = vector.shape_cast %133 : vector<1x32xi1> to vector<1x32xi1>
    %144 = vector.broadcast %143 : vector<1x32xi1> to vector<24x32xi1>
    %145 = vector.broadcast %cst_78 : f32 to vector<24x32xf32>
    %146 = arith.select %144, %142, %145 : vector<24x32xi1>, vector<24x32xf32>
    %c288 = arith.constant 288 : index
    %c0_79 = arith.constant 0 : index
    %147 = vector.load %arg4[%c288, %c0_79] : memref<336x32xf32, #tpu.memory_space<vmem>>, vector<24x32xf32>
    tpu.vector_store %arg4[%c288, %c0_79], %146 {strides = array<i32>} : memref<336x32xf32, #tpu.memory_space<vmem>>, vector<24x32xf32>,
    %c3_i32_80 = arith.constant 3 : i32
    %148 = vector.broadcast %c3_i32_80 : i32 to vector<1x32xi32>
    %149 = arith.addi %42, %148 : vector<1x32xi32>
    %c0_i32_81 = arith.constant 0 : i32
    %150 = vector.broadcast %c0_i32_81 : i32 to vector<1x32xi32>
    %151 = arith.cmpi sge, %149, %150 : vector<1x32xi32>
    %c16_i32_82 = arith.constant 16 : i32
    %152 = vector.broadcast %c16_i32_82 : i32 to vector<1x32xi32>
    %153 = arith.cmpi slt, %149, %152 : vector<1x32xi32>
    %154 = arith.andi %151, %153 : vector<1x32xi1>
    %c72_83 = arith.constant 72 : index
    %c0_84 = arith.constant 0 : index
    %155 = vector.load %arg4[%c72_83, %c0_84] : memref<336x32xf32, #tpu.memory_space<vmem>>, vector<24x32xf32>
    %c29_i32 = arith.constant 29 : i32
    %156 = tpu.dynamic_rotate %155 by %c29_i32 dim 1 : vector<24x32xf32>, i32 -> vector<24x32xf32>
    %cst_85 = arith.constant 0.000000e+00 : f32
    %157 = vector.shape_cast %154 : vector<1x32xi1> to vector<1x32xi1>
    %158 = vector.broadcast %157 : vector<1x32xi1> to vector<24x32xi1>
    %159 = vector.broadcast %cst_85 : f32 to vector<24x32xf32>
    %160 = arith.select %158, %156, %159 : vector<24x32xi1>, vector<24x32xf32>
    %c144 = arith.constant 144 : index
    %c0_86 = arith.constant 0 : index
    %161 = vector.load %arg4[%c144, %c0_86] : memref<336x32xf32, #tpu.memory_space<vmem>>, vector<24x32xf32>
    tpu.vector_store %arg4[%c144, %c0_86], %160 {strides = array<i32>} : memref<336x32xf32, #tpu.memory_space<vmem>>, vector<24x32xf32>,
    %c240_87 = arith.constant 240 : index
    %c0_88 = arith.constant 0 : index
    %162 = vector.load %arg4[%c240_87, %c0_88] : memref<336x32xf32, #tpu.memory_space<vmem>>, vector<24x32xf32>
    %c29_i32_89 = arith.constant 29 : i32
    %163 = tpu.dynamic_rotate %162 by %c29_i32_89 dim 1 : vector<24x32xf32>, i32 -> vector<24x32xf32>
    %cst_90 = arith.constant 0.000000e+00 : f32
    %164 = vector.shape_cast %154 : vector<1x32xi1> to vector<1x32xi1>
    %165 = vector.broadcast %164 : vector<1x32xi1> to vector<24x32xi1>
    %166 = vector.broadcast %cst_90 : f32 to vector<24x32xf32>
    %167 = arith.select %165, %163, %166 : vector<24x32xi1>, vector<24x32xf32>
    %c312 = arith.constant 312 : index
    %c0_91 = arith.constant 0 : index
    %168 = vector.load %arg4[%c312, %c0_91] : memref<336x32xf32, #tpu.memory_space<vmem>>, vector<24x32xf32>
    tpu.vector_store %arg4[%c312, %c0_91], %167 {strides = array<i32>} : memref<336x32xf32, #tpu.memory_space<vmem>>, vector<24x32xf32>,
    %c0_92 = arith.constant 0 : index
    %169 = memref.load %arg1[%c0_92] : memref<98xf32, #tpu.memory_space<smem>>
    %c1_93 = arith.constant 1 : index
    %170 = memref.load %arg1[%c1_93] : memref<98xf32, #tpu.memory_space<smem>>
    %c2_94 = arith.constant 2 : index
    %171 = memref.load %arg1[%c2_94] : memref<98xf32, #tpu.memory_space<smem>>
    %c3_95 = arith.constant 3 : index
    %172 = memref.load %arg1[%c3_95] : memref<98xf32, #tpu.memory_space<smem>>
    %c4 = arith.constant 4 : index
    %173 = memref.load %arg1[%c4] : memref<98xf32, #tpu.memory_space<smem>>
    %c5 = arith.constant 5 : index
    %174 = memref.load %arg1[%c5] : memref<98xf32, #tpu.memory_space<smem>>
    %c6 = arith.constant 6 : index
    %175 = memref.load %arg1[%c6] : memref<98xf32, #tpu.memory_space<smem>>
    %c7 = arith.constant 7 : index
    %176 = memref.load %arg1[%c7] : memref<98xf32, #tpu.memory_space<smem>>
    %c8 = arith.constant 8 : index
    %177 = memref.load %arg1[%c8] : memref<98xf32, #tpu.memory_space<smem>>
    %c9 = arith.constant 9 : index
    %178 = memref.load %arg1[%c9] : memref<98xf32, #tpu.memory_space<smem>>
    %c10 = arith.constant 10 : index
    %179 = memref.load %arg1[%c10] : memref<98xf32, #tpu.memory_space<smem>>
    %c11 = arith.constant 11 : index
    %180 = memref.load %arg1[%c11] : memref<98xf32, #tpu.memory_space<smem>>
    %c12 = arith.constant 12 : index
    %181 = memref.load %arg1[%c12] : memref<98xf32, #tpu.memory_space<smem>>
    %c13 = arith.constant 13 : index
    %182 = memref.load %arg1[%c13] : memref<98xf32, #tpu.memory_space<smem>>
    %c14 = arith.constant 14 : index
    %183 = memref.load %arg1[%c14] : memref<98xf32, #tpu.memory_space<smem>>
    %c15 = arith.constant 15 : index
    %184 = memref.load %arg1[%c15] : memref<98xf32, #tpu.memory_space<smem>>
    %c16 = arith.constant 16 : index
    %185 = memref.load %arg1[%c16] : memref<98xf32, #tpu.memory_space<smem>>
    %c17 = arith.constant 17 : index
    %186 = memref.load %arg1[%c17] : memref<98xf32, #tpu.memory_space<smem>>
    %c18 = arith.constant 18 : index
    %187 = memref.load %arg1[%c18] : memref<98xf32, #tpu.memory_space<smem>>
    %c19 = arith.constant 19 : index
    %188 = memref.load %arg1[%c19] : memref<98xf32, #tpu.memory_space<smem>>
    %c20 = arith.constant 20 : index
    %189 = memref.load %arg1[%c20] : memref<98xf32, #tpu.memory_space<smem>>
    %c21 = arith.constant 21 : index
    %190 = memref.load %arg1[%c21] : memref<98xf32, #tpu.memory_space<smem>>
    %c22 = arith.constant 22 : index
    %191 = memref.load %arg1[%c22] : memref<98xf32, #tpu.memory_space<smem>>
    %c23 = arith.constant 23 : index
    %192 = memref.load %arg1[%c23] : memref<98xf32, #tpu.memory_space<smem>>
    %c24_96 = arith.constant 24 : index
    %193 = memref.load %arg1[%c24_96] : memref<98xf32, #tpu.memory_space<smem>>
    %c25 = arith.constant 25 : index
    %194 = memref.load %arg1[%c25] : memref<98xf32, #tpu.memory_space<smem>>
    %c26 = arith.constant 26 : index
    %195 = memref.load %arg1[%c26] : memref<98xf32, #tpu.memory_space<smem>>
    %c27 = arith.constant 27 : index
    %196 = memref.load %arg1[%c27] : memref<98xf32, #tpu.memory_space<smem>>
    %c28 = arith.constant 28 : index
    %197 = memref.load %arg1[%c28] : memref<98xf32, #tpu.memory_space<smem>>
    %c29 = arith.constant 29 : index
    %198 = memref.load %arg1[%c29] : memref<98xf32, #tpu.memory_space<smem>>
    %c30 = arith.constant 30 : index
    %199 = memref.load %arg1[%c30] : memref<98xf32, #tpu.memory_space<smem>>
    %c31 = arith.constant 31 : index
    %200 = memref.load %arg1[%c31] : memref<98xf32, #tpu.memory_space<smem>>
    %c32 = arith.constant 32 : index
    %201 = memref.load %arg1[%c32] : memref<98xf32, #tpu.memory_space<smem>>
    %c33 = arith.constant 33 : index
    %202 = memref.load %arg1[%c33] : memref<98xf32, #tpu.memory_space<smem>>
    %c34 = arith.constant 34 : index
    %203 = memref.load %arg1[%c34] : memref<98xf32, #tpu.memory_space<smem>>
    %c35 = arith.constant 35 : index
    %204 = memref.load %arg1[%c35] : memref<98xf32, #tpu.memory_space<smem>>
    %c36 = arith.constant 36 : index
    %205 = memref.load %arg1[%c36] : memref<98xf32, #tpu.memory_space<smem>>
    %c37 = arith.constant 37 : index
    %206 = memref.load %arg1[%c37] : memref<98xf32, #tpu.memory_space<smem>>
    %c38 = arith.constant 38 : index
    %207 = memref.load %arg1[%c38] : memref<98xf32, #tpu.memory_space<smem>>
    %c39 = arith.constant 39 : index
    %208 = memref.load %arg1[%c39] : memref<98xf32, #tpu.memory_space<smem>>
    %c40 = arith.constant 40 : index
    %209 = memref.load %arg1[%c40] : memref<98xf32, #tpu.memory_space<smem>>
    %c41 = arith.constant 41 : index
    %210 = memref.load %arg1[%c41] : memref<98xf32, #tpu.memory_space<smem>>
    %c42 = arith.constant 42 : index
    %211 = memref.load %arg1[%c42] : memref<98xf32, #tpu.memory_space<smem>>
    %c43 = arith.constant 43 : index
    %212 = memref.load %arg1[%c43] : memref<98xf32, #tpu.memory_space<smem>>
    %c44 = arith.constant 44 : index
    %213 = memref.load %arg1[%c44] : memref<98xf32, #tpu.memory_space<smem>>
    %c45 = arith.constant 45 : index
    %214 = memref.load %arg1[%c45] : memref<98xf32, #tpu.memory_space<smem>>
    %c46 = arith.constant 46 : index
    %215 = memref.load %arg1[%c46] : memref<98xf32, #tpu.memory_space<smem>>
    %c47 = arith.constant 47 : index
    %216 = memref.load %arg1[%c47] : memref<98xf32, #tpu.memory_space<smem>>
    %c48_97 = arith.constant 48 : index
    %217 = memref.load %arg1[%c48_97] : memref<98xf32, #tpu.memory_space<smem>>
    %c49 = arith.constant 49 : index
    %218 = memref.load %arg1[%c49] : memref<98xf32, #tpu.memory_space<smem>>
    %c50 = arith.constant 50 : index
    %219 = memref.load %arg1[%c50] : memref<98xf32, #tpu.memory_space<smem>>
    %c51 = arith.constant 51 : index
    %220 = memref.load %arg1[%c51] : memref<98xf32, #tpu.memory_space<smem>>
    %c52 = arith.constant 52 : index
    %221 = memref.load %arg1[%c52] : memref<98xf32, #tpu.memory_space<smem>>
    %c53 = arith.constant 53 : index
    %222 = memref.load %arg1[%c53] : memref<98xf32, #tpu.memory_space<smem>>
    %c54 = arith.constant 54 : index
    %223 = memref.load %arg1[%c54] : memref<98xf32, #tpu.memory_space<smem>>
    %c55 = arith.constant 55 : index
    %224 = memref.load %arg1[%c55] : memref<98xf32, #tpu.memory_space<smem>>
    %c56 = arith.constant 56 : index
    %225 = memref.load %arg1[%c56] : memref<98xf32, #tpu.memory_space<smem>>
    %c57 = arith.constant 57 : index
    %226 = memref.load %arg1[%c57] : memref<98xf32, #tpu.memory_space<smem>>
    %c58 = arith.constant 58 : index
    %227 = memref.load %arg1[%c58] : memref<98xf32, #tpu.memory_space<smem>>
    %c59 = arith.constant 59 : index
    %228 = memref.load %arg1[%c59] : memref<98xf32, #tpu.memory_space<smem>>
    %c60 = arith.constant 60 : index
    %229 = memref.load %arg1[%c60] : memref<98xf32, #tpu.memory_space<smem>>
    %c61 = arith.constant 61 : index
    %230 = memref.load %arg1[%c61] : memref<98xf32, #tpu.memory_space<smem>>
    %c62 = arith.constant 62 : index
    %231 = memref.load %arg1[%c62] : memref<98xf32, #tpu.memory_space<smem>>
    %c63 = arith.constant 63 : index
    %232 = memref.load %arg1[%c63] : memref<98xf32, #tpu.memory_space<smem>>
    %c64 = arith.constant 64 : index
    %233 = memref.load %arg1[%c64] : memref<98xf32, #tpu.memory_space<smem>>
    %c65 = arith.constant 65 : index
    %234 = memref.load %arg1[%c65] : memref<98xf32, #tpu.memory_space<smem>>
    %c66 = arith.constant 66 : index
    %235 = memref.load %arg1[%c66] : memref<98xf32, #tpu.memory_space<smem>>
    %c67 = arith.constant 67 : index
    %236 = memref.load %arg1[%c67] : memref<98xf32, #tpu.memory_space<smem>>
    %c68 = arith.constant 68 : index
    %237 = memref.load %arg1[%c68] : memref<98xf32, #tpu.memory_space<smem>>
    %c69 = arith.constant 69 : index
    %238 = memref.load %arg1[%c69] : memref<98xf32, #tpu.memory_space<smem>>
    %c70 = arith.constant 70 : index
    %239 = memref.load %arg1[%c70] : memref<98xf32, #tpu.memory_space<smem>>
    %c71 = arith.constant 71 : index
    %240 = memref.load %arg1[%c71] : memref<98xf32, #tpu.memory_space<smem>>
    %c72_98 = arith.constant 72 : index
    %241 = memref.load %arg1[%c72_98] : memref<98xf32, #tpu.memory_space<smem>>
    %c73 = arith.constant 73 : index
    %242 = memref.load %arg1[%c73] : memref<98xf32, #tpu.memory_space<smem>>
    %c74 = arith.constant 74 : index
    %243 = memref.load %arg1[%c74] : memref<98xf32, #tpu.memory_space<smem>>
    %c75_99 = arith.constant 75 : index
    %244 = memref.load %arg1[%c75_99] : memref<98xf32, #tpu.memory_space<smem>>
    %c76 = arith.constant 76 : index
    %245 = memref.load %arg1[%c76] : memref<98xf32, #tpu.memory_space<smem>>
    %c77 = arith.constant 77 : index
    %246 = memref.load %arg1[%c77] : memref<98xf32, #tpu.memory_space<smem>>
    %c78 = arith.constant 78 : index
    %247 = memref.load %arg1[%c78] : memref<98xf32, #tpu.memory_space<smem>>
    %c79 = arith.constant 79 : index
    %248 = memref.load %arg1[%c79] : memref<98xf32, #tpu.memory_space<smem>>
    %c80 = arith.constant 80 : index
    %249 = memref.load %arg1[%c80] : memref<98xf32, #tpu.memory_space<smem>>
    %c81 = arith.constant 81 : index
    %250 = memref.load %arg1[%c81] : memref<98xf32, #tpu.memory_space<smem>>
    %c82 = arith.constant 82 : index
    %251 = memref.load %arg1[%c82] : memref<98xf32, #tpu.memory_space<smem>>
    %c83 = arith.constant 83 : index
    %252 = memref.load %arg1[%c83] : memref<98xf32, #tpu.memory_space<smem>>
    %c84 = arith.constant 84 : index
    %253 = memref.load %arg1[%c84] : memref<98xf32, #tpu.memory_space<smem>>
    %c85 = arith.constant 85 : index
    %254 = memref.load %arg1[%c85] : memref<98xf32, #tpu.memory_space<smem>>
    %c86 = arith.constant 86 : index
    %255 = memref.load %arg1[%c86] : memref<98xf32, #tpu.memory_space<smem>>
    %c87 = arith.constant 87 : index
    %256 = memref.load %arg1[%c87] : memref<98xf32, #tpu.memory_space<smem>>
    %c88 = arith.constant 88 : index
    %257 = memref.load %arg1[%c88] : memref<98xf32, #tpu.memory_space<smem>>
    %c89 = arith.constant 89 : index
    %258 = memref.load %arg1[%c89] : memref<98xf32, #tpu.memory_space<smem>>
    %c90 = arith.constant 90 : index
    %259 = memref.load %arg1[%c90] : memref<98xf32, #tpu.memory_space<smem>>
    %c91_100 = arith.constant 91 : index
    %260 = memref.load %arg1[%c91_100] : memref<98xf32, #tpu.memory_space<smem>>
    %c92 = arith.constant 92 : index
    %261 = memref.load %arg1[%c92] : memref<98xf32, #tpu.memory_space<smem>>
    %c93 = arith.constant 93 : index
    %262 = memref.load %arg1[%c93] : memref<98xf32, #tpu.memory_space<smem>>
    %c94 = arith.constant 94 : index
    %263 = memref.load %arg1[%c94] : memref<98xf32, #tpu.memory_space<smem>>
    %c95 = arith.constant 95 : index
    %264 = memref.load %arg1[%c95] : memref<98xf32, #tpu.memory_space<smem>>
    %c96_101 = arith.constant 96 : index
    %265 = memref.load %arg1[%c96_101] : memref<98xf32, #tpu.memory_space<smem>>
    %c97 = arith.constant 97 : index
    %266 = memref.load %arg1[%c97] : memref<98xf32, #tpu.memory_space<smem>>
    %cst_102 = arith.constant 0.000000e+00 : f32
    %267 = vector.broadcast %cst_102 : f32 to vector<16x32xf32>
    %cst_103 = arith.constant 0.000000e+00 : f32
    %268 = vector.broadcast %cst_103 : f32 to vector<16x32xf32>
    %cst_104 = arith.constant 0.000000e+00 : f32
    %269 = vector.broadcast %cst_104 : f32 to vector<16x32xf32>
    %cst_105 = arith.constant 0.000000e+00 : f32
    %270 = vector.broadcast %cst_105 : f32 to vector<16x32xf32>
    %c0_106 = arith.constant 0 : index
    %c0_107 = arith.constant 0 : index
    %271 = vector.load %arg4[%c0_106, %c0_107] : memref<336x32xf32, #tpu.memory_space<vmem>>, vector<16x32xf32>
    %272 = vector.broadcast %169 : f32 to vector<16x32xf32>
    %273 = arith.mulf %272, %271 : vector<16x32xf32>
    %274 = arith.addf %267, %273 : vector<16x32xf32>
    %c1_108 = arith.constant 1 : index
    %c0_109 = arith.constant 0 : index
    %275 = vector.load %arg4[%c1_108, %c0_109] : memref<336x32xf32, #tpu.memory_space<vmem>>, vector<16x32xf32>
    %276 = vector.broadcast %176 : f32 to vector<16x32xf32>
    %277 = arith.mulf %276, %275 : vector<16x32xf32>
    %278 = arith.addf %268, %277 : vector<16x32xf32>
    %c2_110 = arith.constant 2 : index
    %c0_111 = arith.constant 0 : index
    %279 = vector.load %arg4[%c2_110, %c0_111] : memref<336x32xf32, #tpu.memory_space<vmem>>, vector<16x32xf32>
    %280 = vector.broadcast %183 : f32 to vector<16x32xf32>
    %281 = arith.mulf %280, %279 : vector<16x32xf32>
    %282 = arith.addf %269, %281 : vector<16x32xf32>
    %c3_112 = arith.constant 3 : index
    %c0_113 = arith.constant 0 : index
    %283 = vector.load %arg4[%c3_112, %c0_113] : memref<336x32xf32, #tpu.memory_space<vmem>>, vector<16x32xf32>
    %284 = vector.broadcast %190 : f32 to vector<16x32xf32>
    %285 = arith.mulf %284, %283 : vector<16x32xf32>
    %286 = arith.addf %270, %285 : vector<16x32xf32>
    %c4_114 = arith.constant 4 : index
    %c0_115 = arith.constant 0 : index
    %287 = vector.load %arg4[%c4_114, %c0_115] : memref<336x32xf32, #tpu.memory_space<vmem>>, vector<16x32xf32>
    %288 = vector.broadcast %197 : f32 to vector<16x32xf32>
    %289 = arith.mulf %288, %287 : vector<16x32xf32>
    %290 = arith.addf %274, %289 : vector<16x32xf32>
    %c5_116 = arith.constant 5 : index
    %c0_117 = arith.constant 0 : index
    %291 = vector.load %arg4[%c5_116, %c0_117] : memref<336x32xf32, #tpu.memory_space<vmem>>, vector<16x32xf32>
    %292 = vector.broadcast %204 : f32 to vector<16x32xf32>
    %293 = arith.mulf %292, %291 : vector<16x32xf32>
    %294 = arith.addf %278, %293 : vector<16x32xf32>
    %c6_118 = arith.constant 6 : index
    %c0_119 = arith.constant 0 : index
    %295 = vector.load %arg4[%c6_118, %c0_119] : memref<336x32xf32, #tpu.memory_space<vmem>>, vector<16x32xf32>
    %296 = vector.broadcast %211 : f32 to vector<16x32xf32>
    %297 = arith.mulf %296, %295 : vector<16x32xf32>
    %298 = arith.addf %282, %297 : vector<16x32xf32>
    %c24_120 = arith.constant 24 : index
    %c0_121 = arith.constant 0 : index
    %299 = vector.load %arg4[%c24_120, %c0_121] : memref<336x32xf32, #tpu.memory_space<vmem>>, vector<16x32xf32>
    %300 = vector.broadcast %170 : f32 to vector<16x32xf32>
    %301 = arith.mulf %300, %299 : vector<16x32xf32>
    %302 = arith.addf %286, %301 : vector<16x32xf32>
    %c25_122 = arith.constant 25 : index
    %c0_123 = arith.constant 0 : index
    %303 = vector.load %arg4[%c25_122, %c0_123] : memref<336x32xf32, #tpu.memory_space<vmem>>, vector<16x32xf32>
    %304 = vector.broadcast %177 : f32 to vector<16x32xf32>
    %305 = arith.mulf %304, %303 : vector<16x32xf32>
    %306 = arith.addf %290, %305 : vector<16x32xf32>
    %c26_124 = arith.constant 26 : index
    %c0_125 = arith.constant 0 : index
    %307 = vector.load %arg4[%c26_124, %c0_125] : memref<336x32xf32, #tpu.memory_space<vmem>>, vector<16x32xf32>
    %308 = vector.broadcast %184 : f32 to vector<16x32xf32>
    %309 = arith.mulf %308, %307 : vector<16x32xf32>
    %310 = arith.addf %294, %309 : vector<16x32xf32>
    %c27_126 = arith.constant 27 : index
    %c0_127 = arith.constant 0 : index
    %311 = vector.load %arg4[%c27_126, %c0_127] : memref<336x32xf32, #tpu.memory_space<vmem>>, vector<16x32xf32>
    %312 = vector.broadcast %191 : f32 to vector<16x32xf32>
    %313 = arith.mulf %312, %311 : vector<16x32xf32>
    %314 = arith.addf %298, %313 : vector<16x32xf32>
    %c28_128 = arith.constant 28 : index
    %c0_129 = arith.constant 0 : index
    %315 = vector.load %arg4[%c28_128, %c0_129] : memref<336x32xf32, #tpu.memory_space<vmem>>, vector<16x32xf32>
    %316 = vector.broadcast %198 : f32 to vector<16x32xf32>
    %317 = arith.mulf %316, %315 : vector<16x32xf32>
    %318 = arith.addf %302, %317 : vector<16x32xf32>
    %c29_130 = arith.constant 29 : index
    %c0_131 = arith.constant 0 : index
    %319 = vector.load %arg4[%c29_130, %c0_131] : memref<336x32xf32, #tpu.memory_space<vmem>>, vector<16x32xf32>
    %320 = vector.broadcast %205 : f32 to vector<16x32xf32>
    %321 = arith.mulf %320, %319 : vector<16x32xf32>
    %322 = arith.addf %306, %321 : vector<16x32xf32>
    %c30_132 = arith.constant 30 : index
    %c0_133 = arith.constant 0 : index
    %323 = vector.load %arg4[%c30_132, %c0_133] : memref<336x32xf32, #tpu.memory_space<vmem>>, vector<16x32xf32>
    %324 = vector.broadcast %212 : f32 to vector<16x32xf32>
    %325 = arith.mulf %324, %323 : vector<16x32xf32>
    %326 = arith.addf %310, %325 : vector<16x32xf32>
    %c48_134 = arith.constant 48 : index
    %c0_135 = arith.constant 0 : index
    %327 = vector.load %arg4[%c48_134, %c0_135] : memref<336x32xf32, #tpu.memory_space<vmem>>, vector<16x32xf32>
    %328 = vector.broadcast %171 : f32 to vector<16x32xf32>
    %329 = arith.mulf %328, %327 : vector<16x32xf32>
    %330 = arith.addf %314, %329 : vector<16x32xf32>
    %c49_136 = arith.constant 49 : index
    %c0_137 = arith.constant 0 : index
    %331 = vector.load %arg4[%c49_136, %c0_137] : memref<336x32xf32, #tpu.memory_space<vmem>>, vector<16x32xf32>
    %332 = vector.broadcast %178 : f32 to vector<16x32xf32>
    %333 = arith.mulf %332, %331 : vector<16x32xf32>
    %334 = arith.addf %318, %333 : vector<16x32xf32>
    %c50_138 = arith.constant 50 : index
    %c0_139 = arith.constant 0 : index
    %335 = vector.load %arg4[%c50_138, %c0_139] : memref<336x32xf32, #tpu.memory_space<vmem>>, vector<16x32xf32>
    %336 = vector.broadcast %185 : f32 to vector<16x32xf32>
    %337 = arith.mulf %336, %335 : vector<16x32xf32>
    %338 = arith.addf %322, %337 : vector<16x32xf32>
    %c51_140 = arith.constant 51 : index
    %c0_141 = arith.constant 0 : index
    %339 = vector.load %arg4[%c51_140, %c0_141] : memref<336x32xf32, #tpu.memory_space<vmem>>, vector<16x32xf32>
    %340 = vector.broadcast %192 : f32 to vector<16x32xf32>
    %341 = arith.mulf %340, %339 : vector<16x32xf32>
    %342 = arith.addf %326, %341 : vector<16x32xf32>
    %c52_142 = arith.constant 52 : index
    %c0_143 = arith.constant 0 : index
    %343 = vector.load %arg4[%c52_142, %c0_143] : memref<336x32xf32, #tpu.memory_space<vmem>>, vector<16x32xf32>
    %344 = vector.broadcast %199 : f32 to vector<16x32xf32>
    %345 = arith.mulf %344, %343 : vector<16x32xf32>
    %346 = arith.addf %330, %345 : vector<16x32xf32>
    %c53_144 = arith.constant 53 : index
    %c0_145 = arith.constant 0 : index
    %347 = vector.load %arg4[%c53_144, %c0_145] : memref<336x32xf32, #tpu.memory_space<vmem>>, vector<16x32xf32>
    %348 = vector.broadcast %206 : f32 to vector<16x32xf32>
    %349 = arith.mulf %348, %347 : vector<16x32xf32>
    %350 = arith.addf %334, %349 : vector<16x32xf32>
    %c54_146 = arith.constant 54 : index
    %c0_147 = arith.constant 0 : index
    %351 = vector.load %arg4[%c54_146, %c0_147] : memref<336x32xf32, #tpu.memory_space<vmem>>, vector<16x32xf32>
    %352 = vector.broadcast %213 : f32 to vector<16x32xf32>
    %353 = arith.mulf %352, %351 : vector<16x32xf32>
    %354 = arith.addf %338, %353 : vector<16x32xf32>
    %c72_148 = arith.constant 72 : index
    %c0_149 = arith.constant 0 : index
    %355 = vector.load %arg4[%c72_148, %c0_149] : memref<336x32xf32, #tpu.memory_space<vmem>>, vector<16x32xf32>
    %356 = vector.broadcast %172 : f32 to vector<16x32xf32>
    %357 = arith.mulf %356, %355 : vector<16x32xf32>
    %358 = arith.addf %342, %357 : vector<16x32xf32>
    %c73_150 = arith.constant 73 : index
    %c0_151 = arith.constant 0 : index
    %359 = vector.load %arg4[%c73_150, %c0_151] : memref<336x32xf32, #tpu.memory_space<vmem>>, vector<16x32xf32>
    %360 = vector.broadcast %179 : f32 to vector<16x32xf32>
    %361 = arith.mulf %360, %359 : vector<16x32xf32>
    %362 = arith.addf %346, %361 : vector<16x32xf32>
    %c74_152 = arith.constant 74 : index
    %c0_153 = arith.constant 0 : index
    %363 = vector.load %arg4[%c74_152, %c0_153] : memref<336x32xf32, #tpu.memory_space<vmem>>, vector<16x32xf32>
    %364 = vector.broadcast %186 : f32 to vector<16x32xf32>
    %365 = arith.mulf %364, %363 : vector<16x32xf32>
    %366 = arith.addf %350, %365 : vector<16x32xf32>
    %c75_154 = arith.constant 75 : index
    %c0_155 = arith.constant 0 : index
    %367 = vector.load %arg4[%c75_154, %c0_155] : memref<336x32xf32, #tpu.memory_space<vmem>>, vector<16x32xf32>
    %368 = vector.broadcast %193 : f32 to vector<16x32xf32>
    %369 = arith.mulf %368, %367 : vector<16x32xf32>
    %370 = arith.addf %354, %369 : vector<16x32xf32>
    %c76_156 = arith.constant 76 : index
    %c0_157 = arith.constant 0 : index
    %371 = vector.load %arg4[%c76_156, %c0_157] : memref<336x32xf32, #tpu.memory_space<vmem>>, vector<16x32xf32>
    %372 = vector.broadcast %200 : f32 to vector<16x32xf32>
    %373 = arith.mulf %372, %371 : vector<16x32xf32>
    %374 = arith.addf %358, %373 : vector<16x32xf32>
    %c77_158 = arith.constant 77 : index
    %c0_159 = arith.constant 0 : index
    %375 = vector.load %arg4[%c77_158, %c0_159] : memref<336x32xf32, #tpu.memory_space<vmem>>, vector<16x32xf32>
    %376 = vector.broadcast %207 : f32 to vector<16x32xf32>
    %377 = arith.mulf %376, %375 : vector<16x32xf32>
    %378 = arith.addf %362, %377 : vector<16x32xf32>
    %c78_160 = arith.constant 78 : index
    %c0_161 = arith.constant 0 : index
    %379 = vector.load %arg4[%c78_160, %c0_161] : memref<336x32xf32, #tpu.memory_space<vmem>>, vector<16x32xf32>
    %380 = vector.broadcast %214 : f32 to vector<16x32xf32>
    %381 = arith.mulf %380, %379 : vector<16x32xf32>
    %382 = arith.addf %366, %381 : vector<16x32xf32>
    %c96_162 = arith.constant 96 : index
    %c0_163 = arith.constant 0 : index
    %383 = vector.load %arg4[%c96_162, %c0_163] : memref<336x32xf32, #tpu.memory_space<vmem>>, vector<16x32xf32>
    %384 = vector.broadcast %173 : f32 to vector<16x32xf32>
    %385 = arith.mulf %384, %383 : vector<16x32xf32>
    %386 = arith.addf %370, %385 : vector<16x32xf32>
    %c97_164 = arith.constant 97 : index
    %c0_165 = arith.constant 0 : index
    %387 = vector.load %arg4[%c97_164, %c0_165] : memref<336x32xf32, #tpu.memory_space<vmem>>, vector<16x32xf32>
    %388 = vector.broadcast %180 : f32 to vector<16x32xf32>
    %389 = arith.mulf %388, %387 : vector<16x32xf32>
    %390 = arith.addf %374, %389 : vector<16x32xf32>
    %c98 = arith.constant 98 : index
    %c0_166 = arith.constant 0 : index
    %391 = vector.load %arg4[%c98, %c0_166] : memref<336x32xf32, #tpu.memory_space<vmem>>, vector<16x32xf32>
    %392 = vector.broadcast %187 : f32 to vector<16x32xf32>
    %393 = arith.mulf %392, %391 : vector<16x32xf32>
    %394 = arith.addf %378, %393 : vector<16x32xf32>
    %c99 = arith.constant 99 : index
    %c0_167 = arith.constant 0 : index
    %395 = vector.load %arg4[%c99, %c0_167] : memref<336x32xf32, #tpu.memory_space<vmem>>, vector<16x32xf32>
    %396 = vector.broadcast %194 : f32 to vector<16x32xf32>
    %397 = arith.mulf %396, %395 : vector<16x32xf32>
    %398 = arith.addf %382, %397 : vector<16x32xf32>
    %c100 = arith.constant 100 : index
    %c0_168 = arith.constant 0 : index
    %399 = vector.load %arg4[%c100, %c0_168] : memref<336x32xf32, #tpu.memory_space<vmem>>, vector<16x32xf32>
    %400 = vector.broadcast %201 : f32 to vector<16x32xf32>
    %401 = arith.mulf %400, %399 : vector<16x32xf32>
    %402 = arith.addf %386, %401 : vector<16x32xf32>
    %c101 = arith.constant 101 : index
    %c0_169 = arith.constant 0 : index
    %403 = vector.load %arg4[%c101, %c0_169] : memref<336x32xf32, #tpu.memory_space<vmem>>, vector<16x32xf32>
    %404 = vector.broadcast %208 : f32 to vector<16x32xf32>
    %405 = arith.mulf %404, %403 : vector<16x32xf32>
    %406 = arith.addf %390, %405 : vector<16x32xf32>
    %c102 = arith.constant 102 : index
    %c0_170 = arith.constant 0 : index
    %407 = vector.load %arg4[%c102, %c0_170] : memref<336x32xf32, #tpu.memory_space<vmem>>, vector<16x32xf32>
    %408 = vector.broadcast %215 : f32 to vector<16x32xf32>
    %409 = arith.mulf %408, %407 : vector<16x32xf32>
    %410 = arith.addf %394, %409 : vector<16x32xf32>
    %c120_171 = arith.constant 120 : index
    %c0_172 = arith.constant 0 : index
    %411 = vector.load %arg4[%c120_171, %c0_172] : memref<336x32xf32, #tpu.memory_space<vmem>>, vector<16x32xf32>
    %412 = vector.broadcast %174 : f32 to vector<16x32xf32>
    %413 = arith.mulf %412, %411 : vector<16x32xf32>
    %414 = arith.addf %398, %413 : vector<16x32xf32>
    %c121 = arith.constant 121 : index
    %c0_173 = arith.constant 0 : index
    %415 = vector.load %arg4[%c121, %c0_173] : memref<336x32xf32, #tpu.memory_space<vmem>>, vector<16x32xf32>
    %416 = vector.broadcast %181 : f32 to vector<16x32xf32>
    %417 = arith.mulf %416, %415 : vector<16x32xf32>
    %418 = arith.addf %402, %417 : vector<16x32xf32>
    %c122 = arith.constant 122 : index
    %c0_174 = arith.constant 0 : index
    %419 = vector.load %arg4[%c122, %c0_174] : memref<336x32xf32, #tpu.memory_space<vmem>>, vector<16x32xf32>
    %420 = vector.broadcast %188 : f32 to vector<16x32xf32>
    %421 = arith.mulf %420, %419 : vector<16x32xf32>
    %422 = arith.addf %406, %421 : vector<16x32xf32>
    %c123 = arith.constant 123 : index
    %c0_175 = arith.constant 0 : index
    %423 = vector.load %arg4[%c123, %c0_175] : memref<336x32xf32, #tpu.memory_space<vmem>>, vector<16x32xf32>
    %424 = vector.broadcast %195 : f32 to vector<16x32xf32>
    %425 = arith.mulf %424, %423 : vector<16x32xf32>
    %426 = arith.addf %410, %425 : vector<16x32xf32>
    %c124 = arith.constant 124 : index
    %c0_176 = arith.constant 0 : index
    %427 = vector.load %arg4[%c124, %c0_176] : memref<336x32xf32, #tpu.memory_space<vmem>>, vector<16x32xf32>
    %428 = vector.broadcast %202 : f32 to vector<16x32xf32>
    %429 = arith.mulf %428, %427 : vector<16x32xf32>
    %430 = arith.addf %414, %429 : vector<16x32xf32>
    %c125 = arith.constant 125 : index
    %c0_177 = arith.constant 0 : index
    %431 = vector.load %arg4[%c125, %c0_177] : memref<336x32xf32, #tpu.memory_space<vmem>>, vector<16x32xf32>
    %432 = vector.broadcast %209 : f32 to vector<16x32xf32>
    %433 = arith.mulf %432, %431 : vector<16x32xf32>
    %434 = arith.addf %418, %433 : vector<16x32xf32>
    %c126 = arith.constant 126 : index
    %c0_178 = arith.constant 0 : index
    %435 = vector.load %arg4[%c126, %c0_178] : memref<336x32xf32, #tpu.memory_space<vmem>>, vector<16x32xf32>
    %436 = vector.broadcast %216 : f32 to vector<16x32xf32>
    %437 = arith.mulf %436, %435 : vector<16x32xf32>
    %438 = arith.addf %422, %437 : vector<16x32xf32>
    %c144_179 = arith.constant 144 : index
    %c0_180 = arith.constant 0 : index
    %439 = vector.load %arg4[%c144_179, %c0_180] : memref<336x32xf32, #tpu.memory_space<vmem>>, vector<16x32xf32>
    %440 = vector.broadcast %175 : f32 to vector<16x32xf32>
    %441 = arith.mulf %440, %439 : vector<16x32xf32>
    %442 = arith.addf %426, %441 : vector<16x32xf32>
    %c145 = arith.constant 145 : index
    %c0_181 = arith.constant 0 : index
    %443 = vector.load %arg4[%c145, %c0_181] : memref<336x32xf32, #tpu.memory_space<vmem>>, vector<16x32xf32>
    %444 = vector.broadcast %182 : f32 to vector<16x32xf32>
    %445 = arith.mulf %444, %443 : vector<16x32xf32>
    %446 = arith.addf %430, %445 : vector<16x32xf32>
    %c146 = arith.constant 146 : index
    %c0_182 = arith.constant 0 : index
    %447 = vector.load %arg4[%c146, %c0_182] : memref<336x32xf32, #tpu.memory_space<vmem>>, vector<16x32xf32>
    %448 = vector.broadcast %189 : f32 to vector<16x32xf32>
    %449 = arith.mulf %448, %447 : vector<16x32xf32>
    %450 = arith.addf %434, %449 : vector<16x32xf32>
    %c147 = arith.constant 147 : index
    %c0_183 = arith.constant 0 : index
    %451 = vector.load %arg4[%c147, %c0_183] : memref<336x32xf32, #tpu.memory_space<vmem>>, vector<16x32xf32>
    %452 = vector.broadcast %196 : f32 to vector<16x32xf32>
    %453 = arith.mulf %452, %451 : vector<16x32xf32>
    %454 = arith.addf %438, %453 : vector<16x32xf32>
    %c148 = arith.constant 148 : index
    %c0_184 = arith.constant 0 : index
    %455 = vector.load %arg4[%c148, %c0_184] : memref<336x32xf32, #tpu.memory_space<vmem>>, vector<16x32xf32>
    %456 = vector.broadcast %203 : f32 to vector<16x32xf32>
    %457 = arith.mulf %456, %455 : vector<16x32xf32>
    %458 = arith.addf %442, %457 : vector<16x32xf32>
    %c149 = arith.constant 149 : index
    %c0_185 = arith.constant 0 : index
    %459 = vector.load %arg4[%c149, %c0_185] : memref<336x32xf32, #tpu.memory_space<vmem>>, vector<16x32xf32>
    %460 = vector.broadcast %210 : f32 to vector<16x32xf32>
    %461 = arith.mulf %460, %459 : vector<16x32xf32>
    %462 = arith.addf %446, %461 : vector<16x32xf32>
    %c150 = arith.constant 150 : index
    %c0_186 = arith.constant 0 : index
    %463 = vector.load %arg4[%c150, %c0_186] : memref<336x32xf32, #tpu.memory_space<vmem>>, vector<16x32xf32>
    %464 = vector.broadcast %217 : f32 to vector<16x32xf32>
    %465 = arith.mulf %464, %463 : vector<16x32xf32>
    %466 = arith.addf %450, %465 : vector<16x32xf32>
    %c168_187 = arith.constant 168 : index
    %c0_188 = arith.constant 0 : index
    %467 = vector.load %arg4[%c168_187, %c0_188] : memref<336x32xf32, #tpu.memory_space<vmem>>, vector<16x32xf32>
    %468 = vector.broadcast %218 : f32 to vector<16x32xf32>
    %469 = arith.mulf %468, %467 : vector<16x32xf32>
    %470 = arith.addf %454, %469 : vector<16x32xf32>
    %c169 = arith.constant 169 : index
    %c0_189 = arith.constant 0 : index
    %471 = vector.load %arg4[%c169, %c0_189] : memref<336x32xf32, #tpu.memory_space<vmem>>, vector<16x32xf32>
    %472 = vector.broadcast %225 : f32 to vector<16x32xf32>
    %473 = arith.mulf %472, %471 : vector<16x32xf32>
    %474 = arith.addf %458, %473 : vector<16x32xf32>
    %c170 = arith.constant 170 : index
    %c0_190 = arith.constant 0 : index
    %475 = vector.load %arg4[%c170, %c0_190] : memref<336x32xf32, #tpu.memory_space<vmem>>, vector<16x32xf32>
    %476 = vector.broadcast %232 : f32 to vector<16x32xf32>
    %477 = arith.mulf %476, %475 : vector<16x32xf32>
    %478 = arith.addf %462, %477 : vector<16x32xf32>
    %c171 = arith.constant 171 : index
    %c0_191 = arith.constant 0 : index
    %479 = vector.load %arg4[%c171, %c0_191] : memref<336x32xf32, #tpu.memory_space<vmem>>, vector<16x32xf32>
    %480 = vector.broadcast %239 : f32 to vector<16x32xf32>
    %481 = arith.mulf %480, %479 : vector<16x32xf32>
    %482 = arith.addf %466, %481 : vector<16x32xf32>
    %c172 = arith.constant 172 : index
    %c0_192 = arith.constant 0 : index
    %483 = vector.load %arg4[%c172, %c0_192] : memref<336x32xf32, #tpu.memory_space<vmem>>, vector<16x32xf32>
    %484 = vector.broadcast %246 : f32 to vector<16x32xf32>
    %485 = arith.mulf %484, %483 : vector<16x32xf32>
    %486 = arith.addf %470, %485 : vector<16x32xf32>
    %c173 = arith.constant 173 : index
    %c0_193 = arith.constant 0 : index
    %487 = vector.load %arg4[%c173, %c0_193] : memref<336x32xf32, #tpu.memory_space<vmem>>, vector<16x32xf32>
    %488 = vector.broadcast %253 : f32 to vector<16x32xf32>
    %489 = arith.mulf %488, %487 : vector<16x32xf32>
    %490 = arith.addf %474, %489 : vector<16x32xf32>
    %c174 = arith.constant 174 : index
    %c0_194 = arith.constant 0 : index
    %491 = vector.load %arg4[%c174, %c0_194] : memref<336x32xf32, #tpu.memory_space<vmem>>, vector<16x32xf32>
    %492 = vector.broadcast %260 : f32 to vector<16x32xf32>
    %493 = arith.mulf %492, %491 : vector<16x32xf32>
    %494 = arith.addf %478, %493 : vector<16x32xf32>
    %c192_195 = arith.constant 192 : index
    %c0_196 = arith.constant 0 : index
    %495 = vector.load %arg4[%c192_195, %c0_196] : memref<336x32xf32, #tpu.memory_space<vmem>>, vector<16x32xf32>
    %496 = vector.broadcast %219 : f32 to vector<16x32xf32>
    %497 = arith.mulf %496, %495 : vector<16x32xf32>
    %498 = arith.addf %482, %497 : vector<16x32xf32>
    %c193 = arith.constant 193 : index
    %c0_197 = arith.constant 0 : index
    %499 = vector.load %arg4[%c193, %c0_197] : memref<336x32xf32, #tpu.memory_space<vmem>>, vector<16x32xf32>
    %500 = vector.broadcast %226 : f32 to vector<16x32xf32>
    %501 = arith.mulf %500, %499 : vector<16x32xf32>
    %502 = arith.addf %486, %501 : vector<16x32xf32>
    %c194 = arith.constant 194 : index
    %c0_198 = arith.constant 0 : index
    %503 = vector.load %arg4[%c194, %c0_198] : memref<336x32xf32, #tpu.memory_space<vmem>>, vector<16x32xf32>
    %504 = vector.broadcast %233 : f32 to vector<16x32xf32>
    %505 = arith.mulf %504, %503 : vector<16x32xf32>
    %506 = arith.addf %490, %505 : vector<16x32xf32>
    %c195 = arith.constant 195 : index
    %c0_199 = arith.constant 0 : index
    %507 = vector.load %arg4[%c195, %c0_199] : memref<336x32xf32, #tpu.memory_space<vmem>>, vector<16x32xf32>
    %508 = vector.broadcast %240 : f32 to vector<16x32xf32>
    %509 = arith.mulf %508, %507 : vector<16x32xf32>
    %510 = arith.addf %494, %509 : vector<16x32xf32>
    %c196 = arith.constant 196 : index
    %c0_200 = arith.constant 0 : index
    %511 = vector.load %arg4[%c196, %c0_200] : memref<336x32xf32, #tpu.memory_space<vmem>>, vector<16x32xf32>
    %512 = vector.broadcast %247 : f32 to vector<16x32xf32>
    %513 = arith.mulf %512, %511 : vector<16x32xf32>
    %514 = arith.addf %498, %513 : vector<16x32xf32>
    %c197 = arith.constant 197 : index
    %c0_201 = arith.constant 0 : index
    %515 = vector.load %arg4[%c197, %c0_201] : memref<336x32xf32, #tpu.memory_space<vmem>>, vector<16x32xf32>
    %516 = vector.broadcast %254 : f32 to vector<16x32xf32>
    %517 = arith.mulf %516, %515 : vector<16x32xf32>
    %518 = arith.addf %502, %517 : vector<16x32xf32>
    %c198 = arith.constant 198 : index
    %c0_202 = arith.constant 0 : index
    %519 = vector.load %arg4[%c198, %c0_202] : memref<336x32xf32, #tpu.memory_space<vmem>>, vector<16x32xf32>
    %520 = vector.broadcast %261 : f32 to vector<16x32xf32>
    %521 = arith.mulf %520, %519 : vector<16x32xf32>
    %522 = arith.addf %506, %521 : vector<16x32xf32>
    %c216_203 = arith.constant 216 : index
    %c0_204 = arith.constant 0 : index
    %523 = vector.load %arg4[%c216_203, %c0_204] : memref<336x32xf32, #tpu.memory_space<vmem>>, vector<16x32xf32>
    %524 = vector.broadcast %220 : f32 to vector<16x32xf32>
    %525 = arith.mulf %524, %523 : vector<16x32xf32>
    %526 = arith.addf %510, %525 : vector<16x32xf32>
    %c217 = arith.constant 217 : index
    %c0_205 = arith.constant 0 : index
    %527 = vector.load %arg4[%c217, %c0_205] : memref<336x32xf32, #tpu.memory_space<vmem>>, vector<16x32xf32>
    %528 = vector.broadcast %227 : f32 to vector<16x32xf32>
    %529 = arith.mulf %528, %527 : vector<16x32xf32>
    %530 = arith.addf %514, %529 : vector<16x32xf32>
    %c218 = arith.constant 218 : index
    %c0_206 = arith.constant 0 : index
    %531 = vector.load %arg4[%c218, %c0_206] : memref<336x32xf32, #tpu.memory_space<vmem>>, vector<16x32xf32>
    %532 = vector.broadcast %234 : f32 to vector<16x32xf32>
    %533 = arith.mulf %532, %531 : vector<16x32xf32>
    %534 = arith.addf %518, %533 : vector<16x32xf32>
    %c219 = arith.constant 219 : index
    %c0_207 = arith.constant 0 : index
    %535 = vector.load %arg4[%c219, %c0_207] : memref<336x32xf32, #tpu.memory_space<vmem>>, vector<16x32xf32>
    %536 = vector.broadcast %241 : f32 to vector<16x32xf32>
    %537 = arith.mulf %536, %535 : vector<16x32xf32>
    %538 = arith.addf %522, %537 : vector<16x32xf32>
    %c220 = arith.constant 220 : index
    %c0_208 = arith.constant 0 : index
    %539 = vector.load %arg4[%c220, %c0_208] : memref<336x32xf32, #tpu.memory_space<vmem>>, vector<16x32xf32>
    %540 = vector.broadcast %248 : f32 to vector<16x32xf32>
    %541 = arith.mulf %540, %539 : vector<16x32xf32>
    %542 = arith.addf %526, %541 : vector<16x32xf32>
    %c221 = arith.constant 221 : index
    %c0_209 = arith.constant 0 : index
    %543 = vector.load %arg4[%c221, %c0_209] : memref<336x32xf32, #tpu.memory_space<vmem>>, vector<16x32xf32>
    %544 = vector.broadcast %255 : f32 to vector<16x32xf32>
    %545 = arith.mulf %544, %543 : vector<16x32xf32>
    %546 = arith.addf %530, %545 : vector<16x32xf32>
    %c222 = arith.constant 222 : index
    %c0_210 = arith.constant 0 : index
    %547 = vector.load %arg4[%c222, %c0_210] : memref<336x32xf32, #tpu.memory_space<vmem>>, vector<16x32xf32>
    %548 = vector.broadcast %262 : f32 to vector<16x32xf32>
    %549 = arith.mulf %548, %547 : vector<16x32xf32>
    %550 = arith.addf %534, %549 : vector<16x32xf32>
    %c240_211 = arith.constant 240 : index
    %c0_212 = arith.constant 0 : index
    %551 = vector.load %arg4[%c240_211, %c0_212] : memref<336x32xf32, #tpu.memory_space<vmem>>, vector<16x32xf32>
    %552 = vector.broadcast %221 : f32 to vector<16x32xf32>
    %553 = arith.mulf %552, %551 : vector<16x32xf32>
    %554 = arith.addf %538, %553 : vector<16x32xf32>
    %c241 = arith.constant 241 : index
    %c0_213 = arith.constant 0 : index
    %555 = vector.load %arg4[%c241, %c0_213] : memref<336x32xf32, #tpu.memory_space<vmem>>, vector<16x32xf32>
    %556 = vector.broadcast %228 : f32 to vector<16x32xf32>
    %557 = arith.mulf %556, %555 : vector<16x32xf32>
    %558 = arith.addf %542, %557 : vector<16x32xf32>
    %c242 = arith.constant 242 : index
    %c0_214 = arith.constant 0 : index
    %559 = vector.load %arg4[%c242, %c0_214] : memref<336x32xf32, #tpu.memory_space<vmem>>, vector<16x32xf32>
    %560 = vector.broadcast %235 : f32 to vector<16x32xf32>
    %561 = arith.mulf %560, %559 : vector<16x32xf32>
    %562 = arith.addf %546, %561 : vector<16x32xf32>
    %c243_215 = arith.constant 243 : index
    %c0_216 = arith.constant 0 : index
    %563 = vector.load %arg4[%c243_215, %c0_216] : memref<336x32xf32, #tpu.memory_space<vmem>>, vector<16x32xf32>
    %564 = vector.broadcast %242 : f32 to vector<16x32xf32>
    %565 = arith.mulf %564, %563 : vector<16x32xf32>
    %566 = arith.addf %550, %565 : vector<16x32xf32>
    %c244 = arith.constant 244 : index
    %c0_217 = arith.constant 0 : index
    %567 = vector.load %arg4[%c244, %c0_217] : memref<336x32xf32, #tpu.memory_space<vmem>>, vector<16x32xf32>
    %568 = vector.broadcast %249 : f32 to vector<16x32xf32>
    %569 = arith.mulf %568, %567 : vector<16x32xf32>
    %570 = arith.addf %554, %569 : vector<16x32xf32>
    %c245 = arith.constant 245 : index
    %c0_218 = arith.constant 0 : index
    %571 = vector.load %arg4[%c245, %c0_218] : memref<336x32xf32, #tpu.memory_space<vmem>>, vector<16x32xf32>
    %572 = vector.broadcast %256 : f32 to vector<16x32xf32>
    %573 = arith.mulf %572, %571 : vector<16x32xf32>
    %574 = arith.addf %558, %573 : vector<16x32xf32>
    %c246 = arith.constant 246 : index
    %c0_219 = arith.constant 0 : index
    %575 = vector.load %arg4[%c246, %c0_219] : memref<336x32xf32, #tpu.memory_space<vmem>>, vector<16x32xf32>
    %576 = vector.broadcast %263 : f32 to vector<16x32xf32>
    %577 = arith.mulf %576, %575 : vector<16x32xf32>
    %578 = arith.addf %562, %577 : vector<16x32xf32>
    %c264_220 = arith.constant 264 : index
    %c0_221 = arith.constant 0 : index
    %579 = vector.load %arg4[%c264_220, %c0_221] : memref<336x32xf32, #tpu.memory_space<vmem>>, vector<16x32xf32>
    %580 = vector.broadcast %222 : f32 to vector<16x32xf32>
    %581 = arith.mulf %580, %579 : vector<16x32xf32>
    %582 = arith.addf %566, %581 : vector<16x32xf32>
    %c265 = arith.constant 265 : index
    %c0_222 = arith.constant 0 : index
    %583 = vector.load %arg4[%c265, %c0_222] : memref<336x32xf32, #tpu.memory_space<vmem>>, vector<16x32xf32>
    %584 = vector.broadcast %229 : f32 to vector<16x32xf32>
    %585 = arith.mulf %584, %583 : vector<16x32xf32>
    %586 = arith.addf %570, %585 : vector<16x32xf32>
    %c266 = arith.constant 266 : index
    %c0_223 = arith.constant 0 : index
    %587 = vector.load %arg4[%c266, %c0_223] : memref<336x32xf32, #tpu.memory_space<vmem>>, vector<16x32xf32>
    %588 = vector.broadcast %236 : f32 to vector<16x32xf32>
    %589 = arith.mulf %588, %587 : vector<16x32xf32>
    %590 = arith.addf %574, %589 : vector<16x32xf32>
    %c267 = arith.constant 267 : index
    %c0_224 = arith.constant 0 : index
    %591 = vector.load %arg4[%c267, %c0_224] : memref<336x32xf32, #tpu.memory_space<vmem>>, vector<16x32xf32>
    %592 = vector.broadcast %243 : f32 to vector<16x32xf32>
    %593 = arith.mulf %592, %591 : vector<16x32xf32>
    %594 = arith.addf %578, %593 : vector<16x32xf32>
    %c268 = arith.constant 268 : index
    %c0_225 = arith.constant 0 : index
    %595 = vector.load %arg4[%c268, %c0_225] : memref<336x32xf32, #tpu.memory_space<vmem>>, vector<16x32xf32>
    %596 = vector.broadcast %250 : f32 to vector<16x32xf32>
    %597 = arith.mulf %596, %595 : vector<16x32xf32>
    %598 = arith.addf %582, %597 : vector<16x32xf32>
    %c269 = arith.constant 269 : index
    %c0_226 = arith.constant 0 : index
    %599 = vector.load %arg4[%c269, %c0_226] : memref<336x32xf32, #tpu.memory_space<vmem>>, vector<16x32xf32>
    %600 = vector.broadcast %257 : f32 to vector<16x32xf32>
    %601 = arith.mulf %600, %599 : vector<16x32xf32>
    %602 = arith.addf %586, %601 : vector<16x32xf32>
    %c270 = arith.constant 270 : index
    %c0_227 = arith.constant 0 : index
    %603 = vector.load %arg4[%c270, %c0_227] : memref<336x32xf32, #tpu.memory_space<vmem>>, vector<16x32xf32>
    %604 = vector.broadcast %264 : f32 to vector<16x32xf32>
    %605 = arith.mulf %604, %603 : vector<16x32xf32>
    %606 = arith.addf %590, %605 : vector<16x32xf32>
    %c288_228 = arith.constant 288 : index
    %c0_229 = arith.constant 0 : index
    %607 = vector.load %arg4[%c288_228, %c0_229] : memref<336x32xf32, #tpu.memory_space<vmem>>, vector<16x32xf32>
    %608 = vector.broadcast %223 : f32 to vector<16x32xf32>
    %609 = arith.mulf %608, %607 : vector<16x32xf32>
    %610 = arith.addf %594, %609 : vector<16x32xf32>
    %c289 = arith.constant 289 : index
    %c0_230 = arith.constant 0 : index
    %611 = vector.load %arg4[%c289, %c0_230] : memref<336x32xf32, #tpu.memory_space<vmem>>, vector<16x32xf32>
    %612 = vector.broadcast %230 : f32 to vector<16x32xf32>
    %613 = arith.mulf %612, %611 : vector<16x32xf32>
    %614 = arith.addf %598, %613 : vector<16x32xf32>
    %c290 = arith.constant 290 : index
    %c0_231 = arith.constant 0 : index
    %615 = vector.load %arg4[%c290, %c0_231] : memref<336x32xf32, #tpu.memory_space<vmem>>, vector<16x32xf32>
    %616 = vector.broadcast %237 : f32 to vector<16x32xf32>
    %617 = arith.mulf %616, %615 : vector<16x32xf32>
    %618 = arith.addf %602, %617 : vector<16x32xf32>
    %c291 = arith.constant 291 : index
    %c0_232 = arith.constant 0 : index
    %619 = vector.load %arg4[%c291, %c0_232] : memref<336x32xf32, #tpu.memory_space<vmem>>, vector<16x32xf32>
    %620 = vector.broadcast %244 : f32 to vector<16x32xf32>
    %621 = arith.mulf %620, %619 : vector<16x32xf32>
    %622 = arith.addf %606, %621 : vector<16x32xf32>
    %c292 = arith.constant 292 : index
    %c0_233 = arith.constant 0 : index
    %623 = vector.load %arg4[%c292, %c0_233] : memref<336x32xf32, #tpu.memory_space<vmem>>, vector<16x32xf32>
    %624 = vector.broadcast %251 : f32 to vector<16x32xf32>
    %625 = arith.mulf %624, %623 : vector<16x32xf32>
    %626 = arith.addf %610, %625 : vector<16x32xf32>
    %c293 = arith.constant 293 : index
    %c0_234 = arith.constant 0 : index
    %627 = vector.load %arg4[%c293, %c0_234] : memref<336x32xf32, #tpu.memory_space<vmem>>, vector<16x32xf32>
    %628 = vector.broadcast %258 : f32 to vector<16x32xf32>
    %629 = arith.mulf %628, %627 : vector<16x32xf32>
    %630 = arith.addf %614, %629 : vector<16x32xf32>
    %c294 = arith.constant 294 : index
    %c0_235 = arith.constant 0 : index
    %631 = vector.load %arg4[%c294, %c0_235] : memref<336x32xf32, #tpu.memory_space<vmem>>, vector<16x32xf32>
    %632 = vector.broadcast %265 : f32 to vector<16x32xf32>
    %633 = arith.mulf %632, %631 : vector<16x32xf32>
    %634 = arith.addf %618, %633 : vector<16x32xf32>
    %c312_236 = arith.constant 312 : index
    %c0_237 = arith.constant 0 : index
    %635 = vector.load %arg4[%c312_236, %c0_237] : memref<336x32xf32, #tpu.memory_space<vmem>>, vector<16x32xf32>
    %636 = vector.broadcast %224 : f32 to vector<16x32xf32>
    %637 = arith.mulf %636, %635 : vector<16x32xf32>
    %638 = arith.addf %622, %637 : vector<16x32xf32>
    %c313 = arith.constant 313 : index
    %c0_238 = arith.constant 0 : index
    %639 = vector.load %arg4[%c313, %c0_238] : memref<336x32xf32, #tpu.memory_space<vmem>>, vector<16x32xf32>
    %640 = vector.broadcast %231 : f32 to vector<16x32xf32>
    %641 = arith.mulf %640, %639 : vector<16x32xf32>
    %642 = arith.addf %626, %641 : vector<16x32xf32>
    %c314 = arith.constant 314 : index
    %c0_239 = arith.constant 0 : index
    %643 = vector.load %arg4[%c314, %c0_239] : memref<336x32xf32, #tpu.memory_space<vmem>>, vector<16x32xf32>
    %644 = vector.broadcast %238 : f32 to vector<16x32xf32>
    %645 = arith.mulf %644, %643 : vector<16x32xf32>
    %646 = arith.addf %630, %645 : vector<16x32xf32>
    %c315 = arith.constant 315 : index
    %c0_240 = arith.constant 0 : index
    %647 = vector.load %arg4[%c315, %c0_240] : memref<336x32xf32, #tpu.memory_space<vmem>>, vector<16x32xf32>
    %648 = vector.broadcast %245 : f32 to vector<16x32xf32>
    %649 = arith.mulf %648, %647 : vector<16x32xf32>
    %650 = arith.addf %634, %649 : vector<16x32xf32>
    %c316 = arith.constant 316 : index
    %c0_241 = arith.constant 0 : index
    %651 = vector.load %arg4[%c316, %c0_241] : memref<336x32xf32, #tpu.memory_space<vmem>>, vector<16x32xf32>
    %652 = vector.broadcast %252 : f32 to vector<16x32xf32>
    %653 = arith.mulf %652, %651 : vector<16x32xf32>
    %654 = arith.addf %638, %653 : vector<16x32xf32>
    %c317 = arith.constant 317 : index
    %c0_242 = arith.constant 0 : index
    %655 = vector.load %arg4[%c317, %c0_242] : memref<336x32xf32, #tpu.memory_space<vmem>>, vector<16x32xf32>
    %656 = vector.broadcast %259 : f32 to vector<16x32xf32>
    %657 = arith.mulf %656, %655 : vector<16x32xf32>
    %658 = arith.addf %642, %657 : vector<16x32xf32>
    %c318 = arith.constant 318 : index
    %c0_243 = arith.constant 0 : index
    %659 = vector.load %arg4[%c318, %c0_243] : memref<336x32xf32, #tpu.memory_space<vmem>>, vector<16x32xf32>
    %660 = vector.broadcast %266 : f32 to vector<16x32xf32>
    %661 = arith.mulf %660, %659 : vector<16x32xf32>
    %662 = arith.addf %646, %661 : vector<16x32xf32>
    %663 = arith.addf %658, %662 : vector<16x32xf32>
    %664 = arith.addf %650, %654 : vector<16x32xf32>
    %665 = arith.addf %663, %664 : vector<16x32xf32>
    %666 = arith.negf %665 : vector<16x32xf32>
    %667 = math.exp %666 : vector<16x32xf32>
    %cst_244 = arith.constant 1.000000e+00 : f32
    %668 = vector.broadcast %cst_244 : f32 to vector<16x32xf32>
    %669 = arith.addf %668, %667 : vector<16x32xf32>
    %670 = arith.divf %668, %669 : vector<16x32xf32>
    %c0_245 = arith.constant 0 : index
    %c0_246 = arith.constant 0 : index
    %671 = vector.load %arg3[%c0_245, %c0_246] : memref<16x32xf32, #tpu.memory_space<vmem>>, vector<16x32xf32>
    tpu.vector_store %arg3[%c0_245, %c0_246], %670 {strides = array<i32>} : memref<16x32xf32, #tpu.memory_space<vmem>>, vector<16x32xf32>,
    return
  }
  func.func @transform_0(%arg0: i32) -> i32 {
    %c0_i32 = arith.constant 0 : i32
    %c0_i32_0 = arith.constant 0 : i32
    return %c0_i32 : i32
  }
  func.func @transform_1(%arg0: i32) -> (i32, i32, i32) {
    %c0_i32 = arith.constant 0 : i32
    %c0_i32_0 = arith.constant 0 : i32
    %c0_i32_1 = arith.constant 0 : i32
    return %c0_i32, %c0_i32_0, %arg0 : i32, i32, i32
  }
  func.func @transform_2(%arg0: i32) -> (i32, i32) {
    %c0_i32 = arith.constant 0 : i32
    %c0_i32_0 = arith.constant 0 : i32
    return %c0_i32, %arg0 : i32, i32
  }
}

</mosaic_0001>

<bundles_post_ra>
// kernel: tpu_custom_call.1
= control target key start
LH: loop header
LB: loop body
LE: loop exit
PB: predicated region body
PF: predicated region fallthrough
CT: control target
= control target key end

     0   :  { %s2971_s0 = inlined_call_operand.hbm [shape: f32[98], index: 0, kind: input, shape index: {}]   ;;  %s2972_s1 = inlined_call_operand.hbm [shape: f32[4,16,32], index: 1, kind: input, shape index: {}]   ;;  %s2973_s2 = inlined_call_operand.hbm [shape: f32[16,32], index: 2, kind: output, shape index: {}]  }
   0x1   :  { %3095 = sst [smem:[#allocation112_spill]] %s2973_s2 }
   0x2   :  { %7 = vsyncpa [#allocation6], 0 }
   0x3   :  { %8 = vsyncpa [#allocation4], 0 }
   0x4   :  { %9 = vsyncpa [#allocation5], 0  ;;  %s1534_s11 = scalar_lea.hbm %s2971_s0, 16 }
   0x5   :  { %p1535_p0 = scmp.ne.s32.totalorder %s2971_s0, %s1534_s11  ;;  %p1538_p1 = scmp.lt.u32.totalorder %s1534_s11, %s2971_s0 }
   0x7   :  { %p1540_p2 = pnand %p1538_p1, %p1535_p0 }
   0x9   :  { %1543 = shalt.err (!%p1540_p2)
}
   0xa   :  { %s1594_s16 = smov [#allocation3]   ;;  %s1595_s19 = smov [#allocation7]  }
   0xb   :  { %17 = dma.hbm_to_smem %s2971_s0, 16, %s1594_s16, [#allocation6]  }
   0xc   :  { %s23_s20 = sshll.u32 %s1595_s19, 4  ;;  %s1544_s23 = scalar_lea.hbm %s2972_s1, 1024  ;;  %s24_s20 = int_to_ptr.vmem [resolvable:$true] %s23_s20 }
   0xd   :  { %p1545_p3 = scmp.ne.s32.totalorder %s2972_s1, %s1544_s23  ;;  %p1548_p4 = scmp.lt.u32.totalorder %s1544_s23, %s2972_s1 }
   0xf   :  { %p1550_p5 = pnand %p1548_p4, %p1545_p3 }
  0x11   :  { %1553 = shalt.err (!%p1550_p5)
}
  0x12   :  { %s1554_s28 = scalar_lea.vmem %s24_s20, 1024  ;;  %p1559_p7 = scmp.lt.s32.totalorder %s24_s20, %s24_s20 }
  0x13   :  { %p1555_p6 = scmp.ne.s32.totalorder %s24_s20, %s1554_s28  ;;  %p1560_p8 = scmp.lt.s32.totalorder %s1554_s28, %s1554_s28 }
  0x15   :  { %p1561_p9 = por %p1560_p8, %p1559_p7 }
  0x17   :  { %p1562_p10 = pnand %p1561_p9, %p1555_p6 }
  0x19   :  { %1565 = shalt.err (!%p1562_p10)
}
  0x1a   :  { %s2974_s0 = smov 128   ;;  %s2975_s29 = smov 8  }
  0x1b   :  { %29 = dma.hbm_to_vmem [thread:$0]  %s2972_s1, 1024, %s24_s20, [#allocation4], %s2974_s0, %s2974_s0, %s2975_s29  }
  0x1c   :  { %1588 = dma.done.wait [#allocation6], 16  }
  0x1d   :  { %1589 = vsyncadd [#allocation6], 4294967280 }
  0x1e   :  { %1590 = dma.done.wait [#allocation4], 1024  }
  0x1f   :  { %1591 = vsyncadd [#allocation4], 4294966272 }
  0x20   :  { %36 = sfence }
  0x21   :  { %vm39_vm0 = vcmask 258048   ;;  %v44_v0 = vld [vmem:[#allocation7 + $0x8] sm:$0xff]  ;;  %v47_v1 = vld [vmem:[#allocation7 + $0x18] sm:$0xff]  ;;  %v1598_v3 = vmov 0.0   ;;  %vm37_vm1 = vcmask 256000   ;;  %v43_v5 = vld [vmem:[#allocation7] sm:$0xff] }
  0x22   :  { %v54_v2 = vld [vmem:[#allocation7 + $0x28] sm:$0xff]  ;;  %40 = vst.msk [vmem:[#allocation2 + $0x5b] sm:$0x1f] %vm39_vm0, %v1598_v3  ;;  %v49_v4 = vadd.f32 %v47_v1, %v44_v0  ;;  %42 = vst.msk [vmem:[#allocation2 + $0x103] sm:$0x1f] %vm39_vm0, %v1598_v3  ;;  %v46_v6 = vld [vmem:[#allocation7 + $0x10] sm:$0xff]  ;;  %v51_v7 = vmax.f32 %v44_v0, %v47_v1 }
  0x23   :  { %v61_v8 = vld [vmem:[#allocation7 + $0x38] sm:$0xff]  ;;  %38 = vst.msk [vmem:[#allocation2 + $0x48] sm:$0x7] %vm37_vm1, %v1598_v3  ;;  %v48_v9 = vadd.f32 %v46_v6, %v43_v5  ;;  %v53_v10 = vld [vmem:[#allocation7 + $0x20] sm:$0xff]  ;;  %41 = vst.msk [vmem:[#allocation2 + $0xf0] sm:$0x7] %vm37_vm1, %v1598_v3  ;;  %v50_v11 = vmax.f32 %v43_v5, %v46_v6 }
  0x24   :  { %v56_v12 = vadd.f32 %v54_v2, %v49_v4  ;;  %v60_v13 = vld [vmem:[#allocation7 + $0x30] sm:$0xff]  ;;  %v58_v14 = vmax.f32 %v51_v7, %v54_v2  ;;  %vm68_vm2 = vcmask 261120   ;;  %s1599_s1 = smov 32   ;;  %vm94_vm3 = vcmask 1047808   ;;  %s1600_s4 = smov 99  }
  0x25   :  { %v55_v15 = vadd.f32 %v53_v10, %v48_v9  ;;  %v57_v16 = vmax.f32 %v50_v11, %v53_v10  ;;  %s1601_s5 = smov 98   ;;  %s1602_s6 = smov 97  }
  0x26   :  { %v63_v17 = vadd.f32 %v61_v8, %v56_v12  ;;  %v65_v18 = vmax.f32 %v58_v14, %v61_v8  ;;  %s1603_s7 = smov 127   ;;  %s1604_s8 = smov 126  }
  0x27   :  { %v62_v19 = vadd.f32 %v60_v13, %v55_v15  ;;  %v64_v20 = vmax.f32 %v57_v16, %v60_v13  ;;  %s1605_s9 = smov 125   ;;  %s2004_s10 = sld [smem:[#allocation3 + $0x31]] }
  0x28   :  { %v67_v21 = vmul.f32 0.25, %v63_v17  ;;  %72 = vst.msk [vmem:[#allocation2 + $0xfb] sm:$0xff] %vm68_vm2, %v65_v18  ;;  %s2006_s11 = sld [smem:[#allocation3 + $0x38]]  ;;  %s2008_s12 = sld [smem:[#allocation3 + $0x3f]] }
  0x29   :  { %v66_v22 = vmul.f32 0.25, %v62_v19  ;;  %71 = vst.msk [vmem:[#allocation2 + $0xf3] sm:$0xff] %vm68_vm2, %v64_v20  ;;  %s2010_s13 = sld [smem:[#allocation3 + $0x46]]  ;;  %s2012_s14 = sld [smem:[#allocation3 + $0x4d]] }
  0x2a   :  { %70 = vst.msk [vmem:[#allocation2 + $0x53] sm:$0xff] %vm68_vm2, %v67_v21  ;;  %s2014_s15 = sld [smem:[#allocation3 + $0x54]]  ;;  %s2016_s16 = sld [smem:[#allocation3 + $0x5b]] }
  0x2b   :  { %69 = vst.msk [vmem:[#allocation2 + $0x4b] sm:$0xff] %vm68_vm2, %v66_v22  ;;  %s2018_s17 = sld [smem:[#allocation3 + $0x32]]  ;;  %s2020_s18 = sld [smem:[#allocation3 + $0x39]] }
  0x2c   :  { %s2022_s19 = sld [smem:[#allocation3 + $0x40]]  ;;  %s2024_s20 = sld [smem:[#allocation3 + $0x47]] }
  0x2d   :  { %3096 = sst [smem:[#allocation12_spill]] %s2004_s10  ;;  %s2026_s21 = sld [smem:[#allocation3 + $0x4e]] }
  0x2e   :  { %3097 = sst [smem:[#allocation13_spill]] %s2006_s11  ;;  %s2028_s22 = sld [smem:[#allocation3 + $0x55]] }
  0x2f   :  { %v1703_v28 = vld [vmem:[#allocation2 + $0x100] sm:$0xff]  ;;  %3098 = sst [smem:[#allocation14_spill]] %s2008_s12  ;;  %s2030_s23 = sld [smem:[#allocation3 + $0x5c]] }
  0x30   :  { %v1695_v26 = vld [vmem:[#allocation2 + $0xf8] sm:$0xff]  ;;  %v1697_v27 = vld [vmem:[#allocation2 + $0xf0] sm:$0xff]  ;;  %3099 = sst [smem:[#allocation15_spill]] %s2010_s13  ;;  %s2032_s24 = sld [smem:[#allocation3]] }
  0x31   :  { %v1653_v23 = vld [vmem:[#allocation2 + $0x58] sm:$0xff]  ;;  %3100 = sst [smem:[#allocation16_spill]] %s2012_s14  ;;  %s2034_s25 = sld [smem:[#allocation3 + $0x7]] }
  0x32   :  { %101 = vrot.lane.b32.xlu1 %v1653_v23, %s1599_s1  ;;  %v1657_v24 = vld [vmem:[#allocation2 + $0x48] sm:$0xff]  ;;  %v1661_v25 = vld [vmem:[#allocation2 + $0x50] sm:$0xff]  ;;  %3101 = sst [smem:[#allocation17_spill]] %s2014_s15  ;;  %s2036_s26 = sld [smem:[#allocation3 + $0xe]] }
  0x33   :  { %95 = vrot.lane.b32.xlu0 %v1657_v24, %s1599_s1  ;;  %3102 = sst [smem:[#allocation18_spill]] %s2016_s16  ;;  %s2038_s27 = sld [smem:[#allocation3 + $0x15]] }
  0x34   :  { %3103 = sst [smem:[#allocation19_spill]] %s2018_s17  ;;  %s2040_s28 = sld [smem:[#allocation3 + $0x1c]] }
  0x35   :  { %3104 = sst [smem:[#allocation20_spill]] %s2020_s18  ;;  %s2042_s30 = sld [smem:[#allocation3 + $0x23]] }
  0x36   :  { %179 = vrot.lane.b32.xlu1 %v1657_v24, %s1599_s1  ;;  %3105 = sst [smem:[#allocation21_spill]] %s2022_s19  ;;  %s2044_s3 = sld [smem:[#allocation3 + $0x2a]] }
  0x37   :  { %98 = vrot.lane.b32.xlu0 %v1661_v25, %s1599_s1  ;;  %3106 = sst [smem:[#allocation22_spill]] %s2024_s20  ;;  %s2064_s29 = sld [smem:[#allocation3 + $0x9]] }
  0x38   :  { %3107 = sst [smem:[#allocation23_spill]] %s2026_s21  ;;  %s2062_s0 = sld [smem:[#allocation3 + $0x2]] }
  0x39   :  { %3108 = sst [smem:[#allocation24_spill]] %s2028_s22  ;;  %s2066_s2 = sld [smem:[#allocation3 + $0x10]] }
  0x3a   :  { %185 = vrot.lane.b32.xlu1 %v1653_v23, %s1599_s1  ;;  %3109 = sst [smem:[#allocation25_spill]] %s2030_s23  ;;  %s2131_s16 = sld [smem:[#allocation3 + $0xc]] }
  0x3b   :  { %182 = vrot.lane.b32.xlu0 %v1661_v25, %s1599_s1  ;;  %3110 = sst [smem:[#allocation26_spill]] %s2032_s24  ;;  %s2140_s18 = sld [smem:[#allocation3 + $0x1a]] }
  0x3c   :  { %3111 = sst [smem:[#allocation27_spill]] %s2034_s25  ;;  %s2142_s17 = sld [smem:[#allocation3 + $0x21]] }
  0x3d   :  { %3112 = sst [smem:[#allocation28_spill]] %s2036_s26  ;;  %s2152_s22 = sld [smem:[#allocation3 + $0x2f]] }
  0x3e   :  { %266 = vrot.lane.b32.xlu1 %v1661_v25, %s1599_s1  ;;  %3113 = sst [smem:[#allocation29_spill]] %s2038_s27  ;;  %s2150_s20 = sld [smem:[#allocation3 + $0x28]] }
  0x3f   :  { %263 = vrot.lane.b32.xlu0 %v1657_v24, %s1599_s1  ;;  %3114 = sst [smem:[#allocation30_spill]] %s2040_s28  ;;  %s2161_s26 = sld [smem:[#allocation3 + $0x6]] }
  0x40   :  { %3115 = sst [smem:[#allocation31_spill]] %s2042_s30  ;;  %s2163_s28 = sld [smem:[#allocation3 + $0xd]] }
  0x41   :  { %3116 = sst [smem:[#allocation32_spill]] %s2044_s3  ;;  %s2182_s21 = sld [smem:[#allocation3 + $0x29]] }
  0x42   :  { %347 = vrot.lane.b32.xlu1 %v1657_v24, %s1599_s1  ;;  %3124 = sst [smem:[#allocation40_spill]] %s2062_s0  ;;  %s2099_s0 = sld [smem:[#allocation3 + $0x2d]] }
  0x43   :  { %269 = vrot.lane.b32.xlu0 %v1653_v23, %s1599_s1  ;;  %3125 = sst [smem:[#allocation41_spill]] %s2064_s29  ;;  %s2092_s29 = sld [smem:[#allocation3 + $0x1f]] }
  0x44   :  { %3126 = sst [smem:[#allocation42_spill]] %s2066_s2  ;;  %s2084_s2 = sld [smem:[#allocation3 + $0xa]] }
  0x45   :  { %3142 = sst [smem:[#allocation58_spill]] %s2140_s18  ;;  %s2199_s30 = sld [smem:[#allocation3 + $0x41]] }
  0x46   :  { %353 = vrot.lane.b32.xlu1 %v1653_v23, %s1599_s1  ;;  %3143 = sst [smem:[#allocation59_spill]] %s2142_s17  ;;  %s2219_s25 = sld [smem:[#allocation3 + $0x5d]] }
  0x47   :  { %350 = vrot.lane.b32.xlu0 %v1661_v25, %s1599_s1  ;;  %3146 = sst [smem:[#allocation60_spill]] %s2152_s22  ;;  %s2209_s19 = sld [smem:[#allocation3 + $0x4f]] }
  0x48   :  { %3135 = sst [smem:[#allocation51_spill]] %s2099_s0  ;;  %s2229_s24 = sld [smem:[#allocation3 + $0x35]] }
  0x49   :  { %s2114_s0 = sld [smem:[#allocation3 + $0x27]]  ;;  %3150 = sst [smem:[#allocation61_spill]] %s2161_s26 }
  0x4a   :  { %434 = vrot.lane.b32.xlu1 %v1661_v25, %s1599_s1  ;;  %3151 = sst [smem:[#allocation62_spill]] %s2163_s28  ;;  %s2306_s17 = sld [smem:[#allocation3 + $0x45]] }
  0x4b   :  { %431 = vrot.lane.b32.xlu0 %v1657_v24, %s1599_s1  ;;  %s2180_s28 = sld [smem:[#allocation3 + $0x22]]  ;;  %3165 = sst [smem:[#allocation65_spill]] %s2199_s30 }
  0x4c   :  { %s2217_s30 = sld [smem:[#allocation3 + $0x56]]  ;;  %s2253_s23 = sld [smem:[#allocation3 + $0x42]] }
  0x4d   :  { %s2308_s18 = sld [smem:[#allocation3 + $0x51]]  ;;  %s2313_s26 = sld [smem:[#allocation3 + $0x4b]] }
  0x4e   :  { %515 = vrot.lane.b32.xlu1 %v1657_v24, %s1599_s1  ;;  %3170 = sst [smem:[#allocation67_spill]] %s2229_s24  ;;  %s2272_s24 = sld [smem:[#allocation3 + $0x36]] }
  0x4f   :  { %437 = vrot.lane.b32.xlu0 %v1653_v23, %s1599_s1  ;;  %3139 = sst [smem:[#allocation55_spill]] %s2114_s0  ;;  %s2290_s0 = sld [smem:[#allocation3 + $0x3e]] }
  0x50   :  { %s2315_s22 = sld [smem:[#allocation3 + $0x58]] }
  0x52   :  { %521 = vrot.lane.b32.xlu1 %v1653_v23, %s1599_s1 }
  0x53   :  { %518 = vrot.lane.b32.xlu0 %v1661_v25, %s1599_s1 }
  0x56   :  { %139 = vrot.lane.b32.xlu1 %v1695_v26, %s1599_s1 }
  0x57   :  { %136 = vrot.lane.b32.xlu0 %v1697_v27, %s1599_s1 }
  0x5a   :  { %220 = vrot.lane.b32.xlu1 %v1697_v27, %s1599_s1 }
  0x5b   :  { %142 = vrot.lane.b32.xlu0 %v1703_v28, %s1599_s1 }
  0x5e   :  { %226 = vrot.lane.b32.xlu1 %v1703_v28, %s1599_s1 }
  0x5f   :  { %223 = vrot.lane.b32.xlu0 %v1695_v26, %s1599_s1 }
  0x62   :  { %307 = vrot.lane.b32.xlu1 %v1695_v26, %s1599_s1 }
  0x63   :  { %304 = vrot.lane.b32.xlu0 %v1697_v27, %s1599_s1 }
  0x66   :  { %388 = vrot.lane.b32.xlu1 %v1697_v27, %s1599_s1 }
  0x67   :  { %310 = vrot.lane.b32.xlu0 %v1703_v28, %s1599_s1 }
  0x6a   :  { %394 = vrot.lane.b32.xlu1 %v1703_v28, %s1599_s1 }
  0x6b   :  { %391 = vrot.lane.b32.xlu0 %v1695_v26, %s1599_s1 }
  0x6e   :  { %475 = vrot.lane.b32.xlu1 %v1695_v26, %s1599_s1 }
  0x6f   :  { %472 = vrot.lane.b32.xlu0 %v1697_v27, %s1599_s1 }
  0x72   :  { %556 = vrot.lane.b32.xlu1 %v1697_v27, %s1599_s1 }
  0x73   :  { %478 = vrot.lane.b32.xlu0 %v1703_v28, %s1599_s1 }
  0x76   :  { %562 = vrot.lane.b32.xlu1 %v1703_v28, %s1599_s1 }
  0x77   :  { %559 = vrot.lane.b32.xlu0 %v1695_v26, %s1599_s1 }
  0xa4   :  { %v102_v29 = vpop.permute.xlu1 %101 }
  0xa5   :  { %v96_v30 = vpop.permute.xlu0 %95  ;;  %v103_v10 = vsel %vm94_vm3, %v102_v29, %v1653_v23 }
  0xa6   :  { %v97_v8 = vsel %vm94_vm3, %v96_v30, %v1657_v24 }
  0xa8   :  { %v180_v31 = vpop.permute.xlu1 %179 }
  0xa9   :  { %v99_v32 = vpop.permute.xlu0 %98  ;;  %v181_v9 = vsel %vm94_vm3, %v180_v31, %v1657_v24 }
  0xaa   :  { %v100_v7 = vsel %vm94_vm3, %v99_v32, %v1661_v25 }
  0xac   :  { %v186_v33 = vpop.permute.xlu1 %185 }
  0xad   :  { %v183_v34 = vpop.permute.xlu0 %182  ;;  %v187_v11 = vsel %vm94_vm3, %v186_v33, %v1653_v23 }
  0xae   :  { %v184_v12 = vsel %vm94_vm3, %v183_v34, %v1661_v25 }
  0xb0   :  { %v267_v35 = vpop.permute.xlu1 %266 }
  0xb1   :  { %v1737_v36 = vpop.permute.xlu0 %263  ;;  %v268_v13 = vsel %vm94_vm3, %v267_v35, %v1661_v25 }
  0xb2   :  { %v265_v14 = vsel %vm94_vm3, %v1737_v36, %v1657_v24 }
  0xb4   :  { %v1739_v37 = vpop.permute.xlu1 %347 }
  0xb5   :  { %v1741_v38 = vpop.permute.xlu0 %269  ;;  %v349_v15 = vsel %vm94_vm3, %v1739_v37, %v1657_v24 }
  0xb6   :  { %v271_v16 = vsel %vm94_vm3, %v1741_v38, %v1653_v23 }
  0xb8   :  { %v1743_v39 = vpop.permute.xlu1 %353 }
  0xb9   :  { %v1745_v40 = vpop.permute.xlu0 %350  ;;  %v355_v17 = vsel %vm94_vm3, %v1743_v39, %v1653_v23 }
  0xba   :  { %v352_v18 = vsel %vm94_vm3, %v1745_v40, %v1661_v25 }
  0xbc   :  { %v1747_v41 = vpop.permute.xlu1 %434 }
  0xbd   :  { %v1749_v42 = vpop.permute.xlu0 %431  ;;  %v436_v19 = vsel %vm94_vm3, %v1747_v41, %v1661_v25 }
  0xbe   :  { %v433_v20 = vsel %vm94_vm3, %v1749_v42, %v1657_v24 }
  0xc0   :  { %v1751_v43 = vpop.permute.xlu1 %515 }
  0xc1   :  { %v1753_v44 = vpop.permute.xlu0 %437  ;;  %v517_v22 = vsel %vm94_vm3, %v1751_v43, %v1657_v24 }
  0xc2   :  { %v439_v30 = vsel %vm94_vm3, %v1753_v44, %v1653_v23 }
  0xc4   :  { %v1755_v45 = vpop.permute.xlu1 %521 }
  0xc5   :  { %v1757_v46 = vpop.permute.xlu0 %518  ;;  %v523_v31 = vsel %vm94_vm3, %v1755_v45, %v1653_v23 }
  0xc6   :  { %v520_v32 = vsel %vm94_vm3, %v1757_v46, %v1661_v25 }
  0xc8   :  { %v140_v47 = vpop.permute.xlu1 %139 }
  0xc9   :  { %v137_v48 = vpop.permute.xlu0 %136  ;;  %v141_v49 = vsel %vm94_vm3, %v140_v47, %v1695_v26 }
  0xca   :  { %147 = vrot.lane.b32.xlu1 %v141_v49, %s1599_s1  ;;  %v138_v50 = vsel %vm94_vm3, %v137_v48, %v1697_v27 }
  0xcb   :  { %145 = vrot.lane.b32.xlu0 %v138_v50, %s1599_s1 }
  0xcc   :  { %v221_v51 = vpop.permute.xlu1 %220 }
  0xcd   :  { %v143_v52 = vpop.permute.xlu0 %142  ;;  %v222_v53 = vsel %vm94_vm3, %v221_v51, %v1697_v27 }
  0xce   :  { %229 = vrot.lane.b32.xlu1 %v222_v53, %s1599_s1  ;;  %v144_v54 = vsel %vm94_vm3, %v143_v52, %v1703_v28 }
  0xcf   :  { %149 = vrot.lane.b32.xlu0 %v144_v54, %s1599_s1 }
  0xd0   :  { %v227_v55 = vpop.permute.xlu1 %226 }
  0xd1   :  { %v224_v56 = vpop.permute.xlu0 %223  ;;  %v228_v57 = vsel %vm94_vm3, %v227_v55, %v1703_v28 }
  0xd2   :  { %233 = vrot.lane.b32.xlu1 %v228_v57, %s1599_s1  ;;  %v225_v58 = vsel %vm94_vm3, %v224_v56, %v1695_v26 }
  0xd3   :  { %231 = vrot.lane.b32.xlu0 %v225_v58, %s1599_s1 }
  0xd4   :  { %v308_v59 = vpop.permute.xlu1 %307 }
  0xd5   :  { %v305_v60 = vpop.permute.xlu0 %304  ;;  %v309_v61 = vsel %vm94_vm3, %v308_v59, %v1695_v26 }
  0xd6   :  { %315 = vrot.lane.b32.xlu1 %v309_v61, %s1599_s1  ;;  %v306_v62 = vsel %vm94_vm3, %v305_v60, %v1697_v27 }
  0xd7   :  { %313 = vrot.lane.b32.xlu0 %v306_v62, %s1599_s1 }
  0xd8   :  { %v389_v63 = vpop.permute.xlu1 %388 }
  0xd9   :  { %v311_v0 = vpop.permute.xlu0 %310  ;;  %v390_v1 = vsel %vm94_vm3, %v389_v63, %v1697_v27 }
  0xda   :  { %397 = vrot.lane.b32.xlu1 %v390_v1, %s1599_s1  ;;  %v312_v2 = vsel %vm94_vm3, %v311_v0, %v1703_v28 }
  0xdb   :  { %317 = vrot.lane.b32.xlu0 %v312_v2, %s1599_s1 }
  0xdc   :  { %v395_v3 = vpop.permute.xlu1 %394 }
  0xdd   :  { %v392_v4 = vpop.permute.xlu0 %391  ;;  %v396_v5 = vsel %vm94_vm3, %v395_v3, %v1703_v28 }
  0xde   :  { %401 = vrot.lane.b32.xlu1 %v396_v5, %s1599_s1  ;;  %v393_v6 = vsel %vm94_vm3, %v392_v4, %v1695_v26 }
  0xdf   :  { %399 = vrot.lane.b32.xlu0 %v393_v6, %s1599_s1 }
  0xe0   :  { %v476_v21 = vpop.permute.xlu1 %475 }
  0xe1   :  { %v473_v29 = vpop.permute.xlu0 %472  ;;  %v477_v34 = vsel %vm94_vm3, %v476_v21, %v1695_v26 }
  0xe2   :  { %106 = vrot.lane.b32.xlu1 %v100_v7, %s1599_s1  ;;  %v474_v36 = vsel %vm94_vm3, %v473_v29, %v1697_v27 }
  0xe3   :  { %104 = vrot.lane.b32.xlu0 %v97_v8, %s1599_s1 }
  0xe4   :  { %v557_v33 = vpop.permute.xlu1 %556 }
  0xe5   :  { %v479_v35 = vpop.permute.xlu0 %478  ;;  %v558_v37 = vsel %vm94_vm3, %v557_v33, %v1697_v27 }
  0xe6   :  { %188 = vrot.lane.b32.xlu1 %v181_v9, %s1599_s1  ;;  %v480_v38 = vsel %vm94_vm3, %v479_v35, %v1703_v28 }
  0xe7   :  { %108 = vrot.lane.b32.xlu0 %v103_v10, %s1599_s1 }
  0xe8   :  { %v563_v39 = vpop.permute.xlu1 %562 }
  0xe9   :  { %v560_v40 = vpop.permute.xlu0 %559  ;;  %v564_v41 = vsel %vm94_vm3, %v563_v39, %v1703_v28 }
  0xea   :  { %192 = vrot.lane.b32.xlu1 %v187_v11, %s1599_s1  ;;  %v561_v42 = vsel %vm94_vm3, %v560_v40, %v1695_v26 }
  0xeb   :  { %190 = vrot.lane.b32.xlu0 %v184_v12, %s1599_s1 }
  0xee   :  { %274 = vrot.lane.b32.xlu1 %v268_v13, %s1599_s1 }
  0xef   :  { %272 = vrot.lane.b32.xlu0 %v265_v14, %s1599_s1 }
  0xf2   :  { %356 = vrot.lane.b32.xlu1 %v349_v15, %s1599_s1 }
  0xf3   :  { %276 = vrot.lane.b32.xlu0 %v271_v16, %s1599_s1 }
  0xf6   :  { %360 = vrot.lane.b32.xlu1 %v355_v17, %s1599_s1 }
  0xf7   :  { %358 = vrot.lane.b32.xlu0 %v352_v18, %s1599_s1 }
  0xfa   :  { %442 = vrot.lane.b32.xlu1 %v436_v19, %s1599_s1 }
  0xfb   :  { %440 = vrot.lane.b32.xlu0 %v433_v20, %s1599_s1 }
  0xfe   :  { %524 = vrot.lane.b32.xlu1 %v517_v22, %s1599_s1 }
  0xff   :  { %444 = vrot.lane.b32.xlu0 %v439_v30, %s1599_s1 }
 0x102   :  { %528 = vrot.lane.b32.xlu1 %v523_v31, %s1599_s1 }
 0x103   :  { %526 = vrot.lane.b32.xlu0 %v520_v32, %s1599_s1 }
 0x106   :  { %483 = vrot.lane.b32.xlu1 %v477_v34, %s1599_s1 }
 0x107   :  { %481 = vrot.lane.b32.xlu0 %v474_v36, %s1599_s1 }
 0x10a   :  { %565 = vrot.lane.b32.xlu1 %v558_v37, %s1599_s1 }
 0x10b   :  { %485 = vrot.lane.b32.xlu0 %v480_v38, %s1599_s1 }
 0x10e   :  { %569 = vrot.lane.b32.xlu1 %v564_v41, %s1599_s1 }
 0x10f   :  { %567 = vrot.lane.b32.xlu0 %v561_v42, %s1599_s1  ;;  %s2046_s1 = sld [smem:[#allocation3 + $0x1]] }
 0x115   :  { %3117 = sst [smem:[#allocation33_spill]] %s2046_s1  ;;  %s2068_s1 = sld [smem:[#allocation3 + $0x17]] }
 0x11b   :  { %3127 = sst [smem:[#allocation43_spill]] %s2068_s1  ;;  %s2086_s1 = sld [smem:[#allocation3 + $0x11]] }
 0x13c   :  { %v148_v43 = vpop.permute.xlu1 %147 }
 0x13d   :  { %v146_v44 = vpop.permute.xlu0 %145  ;;  %v152_v45 = vsel %vm94_vm3, %v148_v43, %v1695_v26 }
 0x13e   :  { %159 = vrot.lane.b32.xlu1 %v152_v45, %s1600_s4  ;;  %v151_v46 = vsel %vm94_vm3, %v146_v44, %v1697_v27 }
 0x13f   :  { %157 = vrot.lane.b32.xlu0 %v151_v46, %s1600_s4 }
 0x140   :  { %v230_v47 = vpop.permute.xlu1 %229 }
 0x141   :  { %v150_v48 = vpop.permute.xlu0 %149  ;;  %v235_v49 = vsel %vm94_vm3, %v230_v47, %v1697_v27 }
 0x142   :  { %241 = vrot.lane.b32.xlu1 %v235_v49, %s1601_s5  ;;  %v153_v50 = vsel %vm94_vm3, %v150_v48, %v1703_v28 }
 0x143   :  { %161 = vrot.lane.b32.xlu0 %v153_v50, %s1600_s4 }
 0x144   :  { %v234_v51 = vpop.permute.xlu1 %233 }
 0x145   :  { %v232_v52 = vpop.permute.xlu0 %231  ;;  %v237_v53 = vsel %vm94_vm3, %v234_v51, %v1703_v28 }
 0x146   :  { %245 = vrot.lane.b32.xlu1 %v237_v53, %s1601_s5  ;;  %v236_v54 = vsel %vm94_vm3, %v232_v52, %v1695_v26 }
 0x147   :  { %243 = vrot.lane.b32.xlu0 %v236_v54, %s1601_s5 }
 0x148   :  { %v1896_v55 = vpop.permute.xlu1 %315 }
 0x149   :  { %v1898_v56 = vpop.permute.xlu0 %313 }
 0x14a   :  { %v319_v39 = vsel %vm94_vm3, %v1898_v56, %v1697_v27  ;;  %v1035_v56 = vstv %s2004_s10  ;;  %s2173_s10 = sld [smem:[#allocation3 + $0x1b]] }
 0x14c   :  { %v1900_v57 = vpop.permute.xlu1 %397 }
 0x14d   :  { %v1902_v58 = vpop.permute.xlu0 %317  ;;  %v403_v40 = vsel %vm94_vm3, %v1900_v57, %v1697_v27  ;;  %v3087_v57 = vstv %s2006_s11  ;;  %s2171_s11 = sld [smem:[#allocation3 + $0x14]] }
 0x14e   :  { %v321_v41 = vsel %vm94_vm3, %v1902_v58, %v1703_v28 }
 0x150   :  { %v1904_v59 = vpop.permute.xlu1 %401 }
 0x151   :  { %v1906_v60 = vpop.permute.xlu0 %399  ;;  %v405_v42 = vsel %vm94_vm3, %v1904_v59, %v1703_v28  ;;  %v3086_v59 = vstv %s2008_s12  ;;  %s2121_s12 = sld [smem:[#allocation3 + $0x2e]] }
 0x152   :  { %v404_v43 = vsel %vm94_vm3, %v1906_v60, %v1695_v26  ;;  %v3088_v60 = vstv %s2010_s13  ;;  %s2123_s13 = sld [smem:[#allocation3 + $0x5]] }
 0x154   :  { %v107_v61 = vpop.permute.xlu1 %106 }
 0x155   :  { %v105_v62 = vpop.permute.xlu0 %104  ;;  %v111_v63 = vsel %vm94_vm3, %v107_v61, %v1661_v25  ;;  %v3089_v61 = vstv %s2012_s14  ;;  %s2241_s14 = sld [smem:[#allocation3 + $0x43]] }
 0x156   :  { %120 = vrot.lane.b32.xlu1 %v111_v63, %s1600_s4  ;;  %v110_v0 = vsel %vm94_vm3, %v105_v62, %v1657_v24  ;;  %v3090_v62 = vstv %s2014_s15  ;;  %s2133_s15 = sld [smem:[#allocation3 + $0x13]] }
 0x157   :  { %118 = vrot.lane.b32.xlu0 %v110_v0, %s1600_s4  ;;  %3140 = sst [smem:[#allocation56_spill]] %s2121_s12 }
 0x158   :  { %v189_v1 = vpop.permute.xlu1 %188  ;;  %3141 = sst [smem:[#allocation57_spill]] %s2123_s13  ;;  %s2292_s13 = sld [smem:[#allocation3 + $0x57]] }
 0x159   :  { %v109_v2 = vpop.permute.xlu0 %108  ;;  %v194_v3 = vsel %vm94_vm3, %v189_v1, %v1657_v24  ;;  %s2298_s12 = sld [smem:[#allocation3 + $0x44]] }
 0x15a   :  { %202 = vrot.lane.b32.xlu1 %v194_v3, %s1601_s5  ;;  %v112_v4 = vsel %vm94_vm3, %v109_v2, %v1653_v23 }
 0x15b   :  { %122 = vrot.lane.b32.xlu0 %v112_v4, %s1600_s4  ;;  %s2048_s4 = sld [smem:[#allocation3 + $0x8]]  ;;  %3173 = sst [smem:[#allocation69_spill]] %s2241_s14 }
 0x15c   :  { %v193_v5 = vpop.permute.xlu1 %192  ;;  %s2262_s14 = sld [smem:[#allocation3 + $0x49]] }
 0x15d   :  { %v191_v6 = vpop.permute.xlu0 %190  ;;  %v196_v7 = vsel %vm94_vm3, %v193_v5, %v1653_v23 }
 0x15e   :  { %206 = vrot.lane.b32.xlu1 %v196_v7, %s1601_s5  ;;  %v195_v8 = vsel %vm94_vm3, %v191_v6, %v1661_v25 }
 0x15f   :  { %204 = vrot.lane.b32.xlu0 %v195_v8, %s1601_s5  ;;  %s2050_s5 = sld [smem:[#allocation3 + $0xf]]  ;;  %3176 = sst [smem:[#allocation71_spill]] %s2298_s12 }
 0x160   :  { %v275_v9 = vpop.permute.xlu1 %274  ;;  %s3206_s12 = sld [smem:[#allocation14_spill]] }
 0x161   :  { %v273_v10 = vpop.permute.xlu0 %272  ;;  %v279_v11 = vsel %vm94_vm3, %v275_v9, %v1661_v25  ;;  %3118 = sst [smem:[#allocation34_spill]] %s2048_s4  ;;  %s2190_s4 = sld [smem:[#allocation3 + $0x33]]  ;;  %v880_v9 = vld [vmem:[#allocation2 + $0x56] sm:$0xff] }
 0x162   :  { %288 = vrot.lane.b32.xlu1 %v279_v11, %s1602_s6  ;;  %v278_v12 = vsel %vm94_vm3, %v273_v10, %v1657_v24 }
 0x163   :  { %286 = vrot.lane.b32.xlu0 %v278_v12, %s1602_s6 }
 0x164   :  { %v357_v13 = vpop.permute.xlu1 %356 }
 0x165   :  { %v277_v14 = vpop.permute.xlu0 %276  ;;  %v362_v15 = vsel %vm94_vm3, %v357_v13, %v1657_v24  ;;  %3119 = sst [smem:[#allocation35_spill]] %s2050_s5  ;;  %s2070_s5 = sld [smem:[#allocation3 + $0x3]] }
 0x166   :  { %370 = vrot.lane.b32.xlu1 %v362_v15, %s1603_s7  ;;  %v280_v16 = vsel %vm94_vm3, %v277_v14, %v1653_v23 }
 0x167   :  { %290 = vrot.lane.b32.xlu0 %v280_v16, %s1602_s6  ;;  %3162 = sst [smem:[#allocation63_spill]] %s2190_s4  ;;  %s2327_s4 = sld [smem:[#allocation3 + $0x4c]] }
 0x168   :  { %v361_v17 = vpop.permute.xlu1 %360 }
 0x169   :  { %v359_v18 = vpop.permute.xlu0 %358  ;;  %v364_v19 = vsel %vm94_vm3, %v361_v17, %v1653_v23 }
 0x16a   :  { %374 = vrot.lane.b32.xlu1 %v364_v19, %s1603_s7  ;;  %v363_v20 = vsel %vm94_vm3, %v359_v18, %v1661_v25 }
 0x16b   :  { %372 = vrot.lane.b32.xlu0 %v363_v20, %s1603_s7  ;;  %3128 = sst [smem:[#allocation44_spill]] %s2070_s5  ;;  %s2088_s5 = sld [smem:[#allocation3 + $0x4]] }
 0x16c   :  { %v443_v21 = vpop.permute.xlu1 %442  ;;  %s3155_s3 = sld [smem:[#allocation44_spill]] }
 0x16d   :  { %v441_v22 = vpop.permute.xlu0 %440  ;;  %v447_v29 = vsel %vm94_vm3, %v443_v21, %v1661_v25  ;;  %3157 = sst [smem:[#allocation44_spill]] %s2182_s21  ;;  %s2320_s21 = sld [smem:[#allocation3 + $0x5f]] }
 0x16e   :  { %456 = vrot.lane.b32.xlu1 %v447_v29, %s1604_s8  ;;  %v446_v30 = vsel %vm94_vm3, %v441_v22, %v1657_v24 }
 0x16f   :  { %454 = vrot.lane.b32.xlu0 %v446_v30, %s1604_s8 }
 0x170   :  { %v525_v31 = vpop.permute.xlu1 %524 }
 0x171   :  { %v445_v32 = vpop.permute.xlu0 %444  ;;  %v530_v33 = vsel %vm94_vm3, %v525_v31, %v1657_v24  ;;  %v320_v24 = vsel %vm94_vm3, %v1896_v55, %v1695_v26  ;;  %3132 = sst [smem:[#allocation48_spill]] %s2088_s5  ;;  %s2104_s5 = sld [smem:[#allocation3 + $0x12]] }
 0x172   :  { %538 = vrot.lane.b32.xlu1 %v530_v33, %s1605_s9  ;;  %v448_v34 = vsel %vm94_vm3, %v445_v32, %v1653_v23  ;;  %v837_v32 = vld [vmem:[#allocation2 + $0x48] sm:$0xff]  ;;  %v1223_v33 = vld [vmem:[#allocation2 + $0xfe] sm:$0xff] }
 0x173   :  { %458 = vrot.lane.b32.xlu0 %v448_v34, %s1604_s8 }
 0x174   :  { %v529_v35 = vpop.permute.xlu1 %528 }
 0x175   :  { %v527_v36 = vpop.permute.xlu0 %526  ;;  %v532_v37 = vsel %vm94_vm3, %v529_v35, %v1653_v23 }
 0x176   :  { %542 = vrot.lane.b32.xlu1 %v532_v37, %s1605_s9  ;;  %v531_v38 = vsel %vm94_vm3, %v527_v36, %v1661_v25  ;;  %v844_v37 = vld [vmem:[#allocation2 + $0x49] sm:$0xff] }
 0x177   :  { %540 = vrot.lane.b32.xlu0 %v531_v38, %s1605_s9  ;;  %3136 = sst [smem:[#allocation52_spill]] %s2104_s5  ;;  %v851_v38 = vld [vmem:[#allocation2 + $0x4a] sm:$0xff]  ;;  %s3177_s5 = sld [smem:[#allocation65_spill]] }
 0x178   :  { %v484_v23 = vpop.permute.xlu1 %483  ;;  %3179 = sst [smem:[#allocation65_spill]] %s2313_s26  ;;  %s3205_s26 = sld [smem:[#allocation13_spill]] }
 0x179   :  { %v482_v25 = vpop.permute.xlu0 %481  ;;  %v488_v45 = vsel %vm94_vm3, %v484_v23, %v1695_v26  ;;  %v1208_v23 = vld [vmem:[#allocation2 + $0xf4] sm:$0xff] }
 0x17a   :  { %327 = vrot.lane.b32.xlu1 %v320_v24, %s1602_s6  ;;  %v487_v47 = vsel %vm94_vm3, %v482_v25, %v1697_v27  ;;  %v839_v25 = vstv %s3155_s3  ;;  %s2197_s3 = sld [smem:[#allocation3 + $0x3a]] }
 0x17b   :  { %325 = vrot.lane.b32.xlu0 %v319_v39, %s1602_s6 }
 0x17c   :  { %v566_v44 = vpop.permute.xlu1 %565 }
 0x17d   :  { %v486_v46 = vpop.permute.xlu0 %485  ;;  %v571_v48 = vsel %vm94_vm3, %v566_v44, %v1697_v27  ;;  %v852_v44 = vld [vmem:[#allocation2 + $0x52] sm:$0xff] }
 0x17e   :  { %409 = vrot.lane.b32.xlu1 %v403_v40, %s1603_s7  ;;  %v489_v49 = vsel %vm94_vm3, %v486_v46, %v1703_v28 }
 0x17f   :  { %329 = vrot.lane.b32.xlu0 %v321_v41, %s1602_s6  ;;  %s2052_s6 = sld [smem:[#allocation3 + $0x16]]  ;;  %v858_v41 = vld [vmem:[#allocation2 + $0x4b] sm:$0xff] }
 0x180   :  { %v570_v50 = vpop.permute.xlu1 %569  ;;  %3164 = sst [smem:[#allocation64_spill]] %s2197_s3  ;;  %s2358_s3 = sld [smem:[#allocation3 + $0x61]] }
 0x181   :  { %v568_v51 = vpop.permute.xlu0 %567  ;;  %v573_v52 = vsel %vm94_vm3, %v570_v50, %v1703_v28  ;;  %v859_v50 = vld [vmem:[#allocation2 + $0x53] sm:$0xff] }
 0x182   :  { %413 = vrot.lane.b32.xlu1 %v405_v42, %s1603_s7  ;;  %v572_v53 = vsel %vm94_vm3, %v568_v51, %v1695_v26  ;;  %v73_v26 = vlaneseq  ;;  %v838_v42 = vld [vmem:[#allocation2 + $0x50] sm:$0xff] }
 0x183   :  { %411 = vrot.lane.b32.xlu0 %v404_v43, %s1603_s7  ;;  %s2054_s7 = sld [smem:[#allocation3 + $0x1d]]  ;;  %v845_v43 = vld [vmem:[#allocation2 + $0x51] sm:$0xff] }
 0x184   :  { %v74_v27 = vand.u32 127, %v73_v26  ;;  %v865_v51 = vld [vmem:[#allocation2 + $0x4c] sm:$0xff]  ;;  %v1195_v26 = vld [vmem:[#allocation2 + $0xfa] sm:$0xff] }
 0x185   :  { %3120 = sst [smem:[#allocation36_spill]] %s2052_s6  ;;  %s2072_s6 = sld [smem:[#allocation3 + $0x1e]] }
 0x186   :  { %495 = vrot.lane.b32.xlu1 %v488_v45, %s1604_s8  ;;  %v2056_v28 = vand.u32 15, %v74_v27 }
 0x187   :  { %493 = vrot.lane.b32.xlu0 %v487_v47, %s1604_s8 }
 0x188   :  { %v2075_v54 = vadd.s32 4294967293, %v2056_v28  ;;  %v2082_v55 = vadd.s32 4294967294, %v2056_v28  ;;  %v2148_v16 = vadd.s32 4294967295, %v2056_v28  ;;  %v2159_v21 = vadd.s32 1, %v2056_v28 }
 0x189   :  { %3121 = sst [smem:[#allocation37_spill]] %s2054_s7  ;;  %s2188_s7 = sld [smem:[#allocation3 + $0x30]] }
 0x18a   :  { %577 = vrot.lane.b32.xlu1 %v571_v48, %s1605_s9  ;;  %vm88_vm4 = vcmp.ge.s32.totalorder %v2075_v54, 0  ;;  %vm173_vm5 = vcmp.ge.s32.totalorder %v2082_v55, 0  ;;  %v846_v48 = vstv %s2084_s2  ;;  %s2207_s2 = sld [smem:[#allocation3 + $0x48]]  ;;  %vm257_vm6 = vcmp.ge.s32.totalorder %v2148_v16, 0 }
 0x18b   :  { %497 = vrot.lane.b32.xlu0 %v489_v49, %s1604_s8  ;;  %s2058_s8 = sld [smem:[#allocation3 + $0x24]]  ;;  %3129 = sst [smem:[#allocation45_spill]] %s2072_s6  ;;  %v853_v49 = vstv %s2086_s1  ;;  %v2235_v7 = vmul.f32 %v846_v48, %v845_v43  ;;  %vm342_vm7 = vcmp.lt.s32.totalorder %v2159_v21, 16 }
 0x18c   :  { %s2090_s6 = sld [smem:[#allocation3 + $0x18]]  ;;  %s3168_s1 = sld [smem:[#allocation51_spill]] }
 0x18d   :  { %3169 = sst [smem:[#allocation51_spill]] %s2219_s25  ;;  %s2274_s25 = sld [smem:[#allocation3 + $0x50]] }
 0x18e   :  { %581 = vrot.lane.b32.xlu1 %v573_v52, %s1605_s9 }
 0x18f   :  { %579 = vrot.lane.b32.xlu0 %v572_v53, %s1605_s9  ;;  %s2060_s9 = sld [smem:[#allocation3 + $0x2b]]  ;;  %v1201_v53 = vld [vmem:[#allocation2 + $0xf3] sm:$0xff] }
 0x190   :  { %3167 = sst [smem:[#allocation66_spill]] %s2207_s2  ;;  %s2334_s2 = sld [smem:[#allocation3 + $0x60]] }
 0x191   :  { %3122 = sst [smem:[#allocation38_spill]] %s2058_s8  ;;  %s2077_s8 = sld [smem:[#allocation3 + $0x25]] }
 0x192   :  { %3133 = sst [smem:[#allocation49_spill]] %s2090_s6  ;;  %s2106_s6 = sld [smem:[#allocation3 + $0x19]]  ;;  %v881_v8 = vstv %s3168_s1 }
 0x193   :  { %s3160_s27 = sld [smem:[#allocation49_spill]]  ;;  %s2251_s1 = sld [smem:[#allocation3 + $0x3b]]  ;;  %v2259_v43 = vmul.f32 %v881_v8, %v880_v9  ;;  %v1196_v9 = vstv %s2253_s23 }
 0x194   :  { %3161 = sst [smem:[#allocation49_spill]] %s2188_s7  ;;  %s2329_s7 = sld [smem:[#allocation3 + $0x52]] }
 0x195   :  { %3123 = sst [smem:[#allocation39_spill]] %s2060_s9  ;;  %s2079_s9 = sld [smem:[#allocation3 + $0x2c]] }
 0x196   :  { %3184 = sst [smem:[#allocation74_spill]] %s2334_s2  ;;  %s2344_s23 = sld [smem:[#allocation3 + $0x53]] }
 0x197   :  { %3130 = sst [smem:[#allocation46_spill]] %s2077_s8  ;;  %s2094_s8 = sld [smem:[#allocation3 + $0x26]] }
 0x198   :  { %3137 = sst [smem:[#allocation53_spill]] %s2106_s6  ;;  %s2284_s6 = sld [smem:[#allocation3 + $0x3d]] }
 0x199   :  { %v860_v27 = vstv %s3160_s27  ;;  %s2227_s27 = sld [smem:[#allocation3 + $0x34]] }
 0x19a   :  { %3182 = sst [smem:[#allocation72_spill]] %s2329_s7  ;;  %s3210_s7 = sld [smem:[#allocation18_spill]] }
 0x19b   :  { %3131 = sst [smem:[#allocation47_spill]] %s2079_s9  ;;  %s3208_s2 = sld [smem:[#allocation16_spill]] }
 0x19c   :  { %s2097_s9 = sld [smem:[#allocation3 + $0xb]] }
 0x1a2   :  { %3134 = sst [smem:[#allocation50_spill]] %s2097_s9  ;;  %s2112_s9 = sld [smem:[#allocation3 + $0x20]] }
 0x1a8   :  { %3138 = sst [smem:[#allocation54_spill]] %s2112_s9  ;;  %s2282_s9 = sld [smem:[#allocation3 + $0x37]] }
 0x1ae   :  { %3175 = sst [smem:[#allocation70_spill]] %s2282_s9  ;;  %s2300_s9 = sld [smem:[#allocation3 + $0x5e]] }
 0x1b0   :  { %v160_v58 = vpop.permute.xlu1 %159 }
 0x1b1   :  { %v167_v63 = vsel %vm88_vm4, %v160_v58, 0.0  ;;  %v158_v1 = vpop.permute.xlu0 %157  ;;  %v866_v58 = vld [vmem:[#allocation2 + $0x54] sm:$0xff] }
 0x1b2   :  { %170 = vst.msk [vmem:[#allocation2 + $0xb0] sm:$0xff] %vm68_vm2, %v167_v63  ;;  %v166_v4 = vsel %vm88_vm4, %v158_v1, 0.0  ;;  %v2213_v1 = vmul.f32 %v839_v25, %v837_v32  ;;  %v2231_v32 = vmul.f32 %v860_v27, %v858_v41 }
 0x1b3   :  { %169 = vst.msk [vmem:[#allocation2 + $0xa8] sm:$0xff] %vm68_vm2, %v166_v4  ;;  %v867_v4 = vstv %s2092_s29  ;;  %s3178_s29 = sld [smem:[#allocation51_spill]] }
 0x1b4   :  { %v242_v12 = vpop.permute.xlu1 %241  ;;  %v2247_v63 = vmul.f32 %v867_v4, %v866_v58  ;;  %v2280_v58 = vadd.s32 3, %v2056_v28  ;;  %3181 = sst [smem:[#allocation51_spill]] %s2327_s4  ;;  %v1224_v31 = vstv %s2300_s9  ;;  %s3227_s9 = sld [smem:[#allocation20_spill]] }
 0x1b5   :  { %v250_v17 = vsel %vm173_vm5, %v242_v12, 0.0  ;;  %v162_v18 = vpop.permute.xlu0 %161  ;;  %v872_v12 = vld [vmem:[#allocation2 + $0x4d] sm:$0xff]  ;;  %s3212_s4 = sld [smem:[#allocation19_spill]] }
 0x1b6   :  { %253 = vst.msk [vmem:[#allocation2 + $0xc0] sm:$0xff] %vm68_vm2, %v250_v17  ;;  %v168_v22 = vsel %vm88_vm4, %v162_v18, 0.0  ;;  %v873_v17 = vld [vmem:[#allocation2 + $0x55] sm:$0xff]  ;;  %v874_v18 = vstv %s2094_s8  ;;  %s2239_s8 = sld [smem:[#allocation3 + $0x3c]]  ;;  %vm510_vm9 = vcmp.lt.s32.totalorder %v2280_v58, 16 }
 0x1b7   :  { %171 = vst.msk [vmem:[#allocation2 + $0xb8] sm:$0xff] %vm68_vm2, %v168_v22  ;;  %v2221_v22 = vmul.f32 %v846_v48, %v844_v37  ;;  %v2237_v37 = vmul.f32 %v853_v49, %v852_v44  ;;  %v2255_v41 = vmul.f32 %v874_v18, %v873_v17  ;;  %v1180_v17 = vld [vmem:[#allocation2 + $0xf0] sm:$0xff]  ;;  %v1210_v48 = vstv %s2274_s25 }
 0x1b8   :  { %v246_v24 = vpop.permute.xlu1 %245  ;;  %v1222_v44 = vld [vmem:[#allocation2 + $0xf6] sm:$0xff] }
 0x1b9   :  { %v252_v45 = vsel %vm173_vm5, %v246_v24, 0.0  ;;  %v244_v46 = vpop.permute.xlu0 %243  ;;  %v2223_v24 = vmul.f32 %v853_v49, %v851_v38  ;;  %v2243_v38 = vmul.f32 %v860_v27, %v859_v50  ;;  %v1188_v50 = vld [vmem:[#allocation2 + $0xf9] sm:$0xff] }
 0x1ba   :  { %255 = vst.msk [vmem:[#allocation2 + $0xd0] sm:$0xff] %vm68_vm2, %v252_v45  ;;  %v251_v52 = vsel %vm173_vm5, %v244_v46, 0.0  ;;  %v879_v46 = vld [vmem:[#allocation2 + $0x4e] sm:$0xff]  ;;  %v2245_v45 = vmul.f32 %v867_v4, %v865_v51  ;;  %v2270_v51 = vadd.s32 2, %v2056_v28  ;;  %v1203_v4 = vstv %s2262_s14  ;;  %v1202_v27 = vld [vmem:[#allocation2 + $0xfb] sm:$0xff]  ;;  %s2346_s14 = sld [smem:[#allocation3 + $0x5a]] }
 0x1bb   :  { %254 = vst.msk [vmem:[#allocation2 + $0xc8] sm:$0xff] %vm68_vm2, %v251_v52  ;;  %v2233_v52 = vmul.f32 %v839_v25, %v838_v42  ;;  %v2249_v25 = vmul.f32 %v874_v18, %v872_v12  ;;  %v2257_v42 = vmul.f32 %v881_v8, %v879_v46  ;;  %v1181_v12 = vld [vmem:[#allocation2 + $0xf8] sm:$0xff]  ;;  %v1182_v18 = vstv %s2227_s27  ;;  %s2332_s27 = sld [smem:[#allocation3 + $0x59]]  ;;  %v1075_v30 = vld [vmem:[#allocation2 + $0xae] sm:$0xff] }
 0x1bc   :  { %3172 = sst [smem:[#allocation68_spill]] %s2239_s8  ;;  %s2264_s8 = sld [smem:[#allocation3 + $0x4a]]  ;;  %v1187_v8 = vld [vmem:[#allocation2 + $0xf1] sm:$0xff]  ;;  %v1189_v46 = vstv %s2251_s1  ;;  %v2336_v47 = vmul.f32 %v1182_v18, %v1180_v17  ;;  %v2338_v40 = vmul.f32 %v1182_v18, %v1181_v12  ;;  %v1209_v12 = vld [vmem:[#allocation2 + $0xfc] sm:$0xff]  ;;  %vm426_vm8 = vcmp.lt.s32.totalorder %v2270_v51, 16 }
 0x1bd   :  { %v1194_v49 = vld [vmem:[#allocation2 + $0xf2] sm:$0xff]  ;;  %v2348_v35 = vmul.f32 %v1189_v46, %v1187_v8  ;;  %v2350_v34 = vmul.f32 %v1189_v46, %v1188_v50  ;;  %s3191_s25 = sld [smem:[#allocation68_spill]]  ;;  %s3192_s1 = sld [smem:[#allocation69_spill]]  ;;  %v2360_v8 = vmul.f32 %v1196_v9, %v1195_v26  ;;  %v2362_v50 = vmul.f32 %v1203_v4, %v1201_v53  ;;  %v1082_v13 = vld [vmem:[#allocation2 + $0xc0] sm:$0xff] }
 0x1be   :  { %3185 = vst [vmem:[#allocation75_spill] sm:$0xff] %v2336_v47  ;;  %3186 = vst [vmem:[#allocation76_spill] sm:$0xff] %v2338_v40  ;;  %v2352_v17 = vmul.f32 %v1196_v9, %v1194_v49  ;;  %3193 = sst [smem:[#allocation68_spill]] %s2358_s3  ;;  %v1215_v49 = vld [vmem:[#allocation2 + $0xf5] sm:$0xff]  ;;  %v1217_v46 = vstv %s2292_s13  ;;  %v2372_v26 = vmul.f32 %v1210_v48, %v1209_v12  ;;  %v1040_v12 = vld [vmem:[#allocation2 + $0xa9] sm:$0xff]  ;;  %s3209_s13 = sld [smem:[#allocation17_spill]] }
 0x1bf   :  { %3188 = vst [vmem:[#allocation78_spill] sm:$0xff] %v2348_v35  ;;  %3189 = vst [vmem:[#allocation79_spill] sm:$0xff] %v2350_v34  ;;  %v2379_v19 = vmul.f32 %v1217_v46, %v1215_v49  ;;  %v2390_v49 = vmul.f32 %v1224_v31, %v1223_v33  ;;  %v1061_v53 = vld [vmem:[#allocation2 + $0xac] sm:$0xff]  ;;  %v1062_v11 = vld [vmem:[#allocation2 + $0xb4] sm:$0xff]  ;;  %v2423_v10 = vmul.f32 %v3087_v57, %v1040_v12  ;;  %v3219_v12 = vstv %s3210_s7  ;;  %s3236_s3 = sld [smem:[#allocation30_spill]] }
 0x1c0   :  { %3187 = sst [smem:[#allocation77_spill]] %s2346_s14  ;;  %3190 = vst [vmem:[#allocation80_spill] sm:$0xff] %v2352_v17  ;;  %3194 = vst [vmem:[#allocation81_spill] sm:$0xff] %v2360_v8  ;;  %v1041_v15 = vld [vmem:[#allocation2 + $0xb1] sm:$0xff]  ;;  %s3263_s14 = sld [smem:[#allocation34_spill]] }
 0x1c1   :  { %3183 = sst [smem:[#allocation73_spill]] %s2332_s27  ;;  %3195 = vst [vmem:[#allocation82_spill] sm:$0xff] %v2362_v50  ;;  %3198 = vst [vmem:[#allocation85_spill] sm:$0xff] %v2372_v26  ;;  %v1055_v9 = vld [vmem:[#allocation2 + $0xb3] sm:$0xff]  ;;  %s3207_s27 = sld [smem:[#allocation15_spill]] }
 0x1c2   :  { %3199 = vst [vmem:[#allocation86_spill] sm:$0xff] %v2379_v19  ;;  %3202 = vst [vmem:[#allocation89_spill] sm:$0xff] %v2390_v49  ;;  %v1076_v6 = vld [vmem:[#allocation2 + $0xb6] sm:$0xff]  ;;  %v1083_v55 = vld [vmem:[#allocation2 + $0xc8] sm:$0xff]  ;;  %v3239_v49 = vstv %s3212_s4 }
 0x1c3   :  { %3214 = vst [vmem:[#allocation92_spill] sm:$0xff] %v2423_v10  ;;  %v1090_v3 = vld [vmem:[#allocation2 + $0xc9] sm:$0xff] }
 0x1c4   :  { %v1097_v2 = vld [vmem:[#allocation2 + $0xca] sm:$0xff] }
 0x1c6   :  { %v3420_v58 = vld [vmem:[#allocation78_spill] sm:$0xff] }
 0x1c8   :  { %v121_v28 = vpop.permute.xlu1 %120 }
 0x1c9   :  { %v128_v36 = vsel %vm88_vm4, %v121_v28, 0.0  ;;  %v119_v39 = vpop.permute.xlu0 %118  ;;  %v1216_v28 = vld [vmem:[#allocation2 + $0xfd] sm:$0xff] }
 0x1ca   :  { %131 = vst.msk [vmem:[#allocation2 + $0x8] sm:$0xff] %vm68_vm2, %v128_v36  ;;  %v127_v18 = vsel %vm88_vm4, %v119_v39, 0.0  ;;  %v2366_v36 = vmul.f32 %v1203_v4, %v1202_v27  ;;  %v2368_v39 = vmul.f32 %v1210_v48, %v1208_v23  ;;  %v2381_v23 = vmul.f32 %v1217_v46, %v1216_v28  ;;  %v1034_v4 = vld [vmem:[#allocation2 + $0xb0] sm:$0xff]  ;;  %v1033_v48 = vld [vmem:[#allocation2 + $0xa8] sm:$0xff] }
 0x1cb   :  { %130 = vst.msk [vmem:[#allocation2] sm:$0xff] %vm68_vm2, %v127_v18  ;;  %v1047_v46 = vld [vmem:[#allocation2 + $0xaa] sm:$0xff]  ;;  %v1069_v28 = vld [vmem:[#allocation2 + $0xb5] sm:$0xff]  ;;  %v2415_v0 = vmul.f32 %v1035_v56, %v1034_v4  ;;  %v2419_v33 = vmul.f32 %v1035_v56, %v1033_v48  ;;  %v2436_v56 = vmul.f32 %v3089_v61, %v1061_v53  ;;  %v3225_v53 = vstv %s3206_s12  ;;  %s3235_s12 = sld [smem:[#allocation26_spill]] }
 0x1cc   :  { %3196 = vst [vmem:[#allocation83_spill] sm:$0xff] %v2366_v36  ;;  %3197 = vst [vmem:[#allocation84_spill] sm:$0xff] %v2368_v39  ;;  %v203_v29 = vpop.permute.xlu1 %202  ;;  %v1054_v27 = vld [vmem:[#allocation2 + $0xab] sm:$0xff]  ;;  %v3228_v39 = vstv %s3207_s27  ;;  %s3254_s27 = sld [smem:[#allocation31_spill]] }
 0x1cd   :  { %v211_v14 = vsel %vm173_vm5, %v203_v29, 0.0  ;;  %v123_v18 = vpop.permute.xlu0 %122  ;;  %3200 = vst [vmem:[#allocation87_spill] sm:$0xff] %v2381_v23  ;;  %v2388_v29 = vmul.f32 %v1224_v31, %v1222_v44  ;;  %v1068_v44 = vld [vmem:[#allocation2 + $0xad] sm:$0xff]  ;;  %3211 = vst [vmem:[#allocation90_spill] sm:$0xff] %v2415_v0  ;;  %v2432_v4 = vmul.f32 %v3088_v60, %v1054_v27  ;;  %v3223_v27 = vstv %s3205_s26  ;;  %s3231_s26 = sld [smem:[#allocation21_spill]] }
 0x1ce   :  { %214 = vst.msk [vmem:[#allocation2 + $0x18] sm:$0xff] %vm68_vm2, %v211_v14  ;;  %v129_v20 = vsel %vm88_vm4, %v123_v18, 0.0  ;;  %3213 = vst [vmem:[#allocation91_spill] sm:$0xff] %v2419_v33  ;;  %v2440_v48 = vmul.f32 %v3090_v62, %v1068_v44  ;;  %v1103_v14 = vld [vmem:[#allocation2 + $0xc3] sm:$0xff]  ;;  %v2452_v60 = vmul.f32 %v3223_v27, %v1041_v15  ;;  %v1104_v44 = vld [vmem:[#allocation2 + $0xcb] sm:$0xff]  ;;  %v3233_v27 = vstv %s3209_s13  ;;  %s3258_s13 = sld [smem:[#allocation29_spill]] }
 0x1cf   :  { %3201 = vst [vmem:[#allocation88_spill] sm:$0xff] %v2388_v29  ;;  %132 = vst.msk [vmem:[#allocation2 + $0x10] sm:$0xff] %vm68_vm2, %v129_v20  ;;  %v1048_v20 = vld [vmem:[#allocation2 + $0xb2] sm:$0xff] }
 0x1d0   :  { %v207_v31 = vpop.permute.xlu1 %206  ;;  %3216 = vst [vmem:[#allocation94_spill] sm:$0xff] %v2432_v4  ;;  %3217 = vst [vmem:[#allocation95_spill] sm:$0xff] %v2436_v56  ;;  %v2456_v61 = vmul.f32 %v3225_v53, %v1048_v20  ;;  %v2470_v20 = vmul.f32 %v3233_v27, %v1069_v28 }
 0x1d1   :  { %v213_v18 = vsel %vm173_vm5, %v207_v31, 0.0  ;;  %v205_v54 = vpop.permute.xlu0 %204  ;;  %3218 = vst [vmem:[#allocation96_spill] sm:$0xff] %v2440_v48  ;;  %v1096_v31 = vld [vmem:[#allocation2 + $0xc2] sm:$0xff]  ;;  %3224 = vst [vmem:[#allocation99_spill] sm:$0xff] %v2452_v60 }
 0x1d2   :  { %216 = vst.msk [vmem:[#allocation2 + $0x28] sm:$0xff] %vm68_vm2, %v213_v18  ;;  %v212_v5 = vsel %vm173_vm5, %v205_v54, 0.0  ;;  %v2427_v18 = vmul.f32 %v3086_v59, %v1047_v46  ;;  %v1089_v54 = vld [vmem:[#allocation2 + $0xc1] sm:$0xff]  ;;  %v2444_v46 = vmul.f32 %v3219_v12, %v1075_v30  ;;  %3226 = vst [vmem:[#allocation100_spill] sm:$0xff] %v2456_v61 }
 0x1d3   :  { %215 = vst.msk [vmem:[#allocation2 + $0x20] sm:$0xff] %vm68_vm2, %v212_v5  ;;  %v3221_v5 = vstv %s3212_s4  ;;  %v690_v30 = vld [vmem:[#allocation2] sm:$0xff]  ;;  %3234 = vst [vmem:[#allocation103_spill] sm:$0xff] %v2470_v20  ;;  %v691_v53 = vld [vmem:[#allocation2 + $0x8] sm:$0xff]  ;;  %s3249_s4 = sld [smem:[#allocation27_spill]] }
 0x1d4   :  { %3215 = vst [vmem:[#allocation93_spill] sm:$0xff] %v2427_v18  ;;  %3220 = vst [vmem:[#allocation97_spill] sm:$0xff] %v2444_v46  ;;  %v289_v59 = vpop.permute.xlu1 %288  ;;  %v2448_v57 = vmul.f32 %v3221_v5, %v1082_v13  ;;  %v718_v12 = vld [vmem:[#allocation2 + $0x4] sm:$0xff]  ;;  %v2462_v13 = vmul.f32 %v3228_v39, %v1055_v9  ;;  %v3230_v5 = vstv %s3208_s2  ;;  %v3237_v39 = vstv %s3210_s7  ;;  %s3240_s2 = sld [smem:[#allocation22_spill]]  ;;  %s3252_s7 = sld [smem:[#allocation28_spill]] }
 0x1d5   :  { %v296_v62 = vsel %vm257_vm6, %v289_v59, 0.0  ;;  %v287_v26 = vpop.permute.xlu0 %286  ;;  %v2466_v15 = vmul.f32 %v3230_v5, %v1062_v11  ;;  %v697_v40 = vld [vmem:[#allocation2 + $0x1] sm:$0xff]  ;;  %v2477_v9 = vmul.f32 %v3237_v39, %v1076_v6  ;;  %v2481_v11 = vmul.f32 %v3239_v49, %v1083_v55 }
 0x1d6   :  { %3222 = vst [vmem:[#allocation98_spill] sm:$0xff] %v2448_v57  ;;  %3229 = vst [vmem:[#allocation101_spill] sm:$0xff] %v2462_v13  ;;  %v704_v47 = vld [vmem:[#allocation2 + $0x2] sm:$0xff]  ;;  %v295_v59 = vsel %vm257_vm6, %v287_v26, 0.0  ;;  %v3242_v5 = vstv %s3227_s9  ;;  %v3246_v26 = vstv %s3231_s26  ;;  %v3251_v55 = vstv %s3235_s12  ;;  %v705_v50 = vld [vmem:[#allocation2 + $0xa] sm:$0xff]  ;;  %s3261_s9 = sld [smem:[#allocation32_spill]] }
 0x1d7   :  { %3232 = vst [vmem:[#allocation102_spill] sm:$0xff] %v2466_v15  ;;  %299 = vst.msk [vmem:[#allocation2 + $0x38] sm:$0xff] %vm68_vm2, %v296_v62  ;;  %v2485_v28 = vmul.f32 %v3242_v5, %v1089_v54  ;;  %v3244_v27 = vmov %v3242_v5  ;;  %v711_v23 = vld [vmem:[#allocation2 + $0x3] sm:$0xff]  ;;  %v2494_v6 = vmul.f32 %v3246_v26, %v1096_v31  ;;  %v3248_v39 = vmov %v3246_v26  ;;  %s3262_s26 = sld [smem:[#allocation33_spill]]  ;;  %s3270_s12 = sld [smem:[#allocation35_spill]] }
 0x1d8   :  { %3238 = vst [vmem:[#allocation104_spill] sm:$0xff] %v2477_v9  ;;  %3241 = vst [vmem:[#allocation105_spill] sm:$0xff] %v2481_v11  ;;  %v2489_v29 = vmul.f32 %v3244_v27, %v1090_v3  ;;  %v725_v62 = vld [vmem:[#allocation2 + $0x5] sm:$0xff]  ;;  %v2498_v49 = vmul.f32 %v3248_v39, %v1097_v2  ;;  %v693_v54 = vmul.f32 %v3251_v55, %v690_v30  ;;  %v3253_v5 = vstv %s3236_s3  ;;  %v739_v3 = vld [vmem:[#allocation2 + $0x18] sm:$0xff]  ;;  %v371_v8 = vpop.permute.xlu1 %370 }
 0x1d9   :  { %3243 = vst [vmem:[#allocation106_spill] sm:$0xff] %v2485_v28  ;;  %v732_v19 = vld [vmem:[#allocation2 + $0x6] sm:$0xff]  ;;  %298 = vst.msk [vmem:[#allocation2 + $0x30] sm:$0xff] %vm68_vm2, %v295_v59  ;;  %v721_v36 = vmul.f32 %v3253_v5, %v718_v12  ;;  %v3260_v26 = vmov %v3251_v55  ;;  %v733_v55 = vld [vmem:[#allocation2 + $0xe] sm:$0xff]  ;;  %v379_v12 = vsel %vm342_vm7, %v371_v8, 0.0  ;;  %v291_v5 = vpop.permute.xlu0 %290  ;;  %v3264_v35 = vstv %s3249_s4 }
 0x1da   :  { %3245 = vst [vmem:[#allocation107_spill] sm:$0xff] %v2489_v29  ;;  %3247 = vst [vmem:[#allocation108_spill] sm:$0xff] %v2494_v6  ;;  %v698_v27 = vld [vmem:[#allocation2 + $0x9] sm:$0xff]  ;;  %v3255_v17 = vstv %s3240_s2  ;;  %v694_v2 = vmul.f32 %v3260_v26, %v691_v53  ;;  %v3266_v6 = vstv %s3254_s27  ;;  %v746_v29 = vld [vmem:[#allocation2 + $0x19] sm:$0xff]  ;;  %v297_v26 = vsel %vm257_vm6, %v291_v5, 0.0  ;;  %s3273_s2 = sld [smem:[#allocation36_spill]] }
 0x1db   :  { %3250 = vst [vmem:[#allocation109_spill] sm:$0xff] %v2498_v49  ;;  %v2506_v34 = vmul.f32 %v3255_v17, %v1103_v14  ;;  %v3257_v59 = vmov %v3255_v17  ;;  %v719_v39 = vld [vmem:[#allocation2 + $0xc] sm:$0xff]  ;;  %v700_v49 = vmul.f32 %v3264_v35, %v697_v40  ;;  %v3265_v17 = vstv %s3252_s7  ;;  %v747_v53 = vld [vmem:[#allocation2 + $0x21] sm:$0xff]  ;;  %382 = vst.msk [vmem:[#allocation2 + $0x60] sm:$0xff] %vm68_vm2, %v379_v12 }
 0x1dc   :  { %v2510_v31 = vmul.f32 %v3257_v59, %v1104_v44  ;;  %v726_v30 = vld [vmem:[#allocation2 + $0xd] sm:$0xff]  ;;  %v707_v14 = vmul.f32 %v3265_v17, %v704_v47  ;;  %v728_v44 = vmul.f32 %v3266_v6, %v725_v62  ;;  %v740_v59 = vld [vmem:[#allocation2 + $0x20] sm:$0xff]  ;;  %v3267_v8 = vstv %s3258_s13  ;;  %300 = vst.msk [vmem:[#allocation2 + $0x40] sm:$0xff] %vm68_vm2, %v297_v26 }
 0x1dd   :  { %3256 = vst [vmem:[#allocation110_spill] sm:$0xff] %v2506_v34  ;;  %v714_v11 = vmul.f32 %v3267_v8, %v711_v23  ;;  %v3268_v35 = vstv %s3261_s9  ;;  %v3269_v47 = vstv %s3262_s26  ;;  %v3271_v6 = vstv %s3263_s14  ;;  %v753_v34 = vld [vmem:[#allocation2 + $0x1a] sm:$0xff]  ;;  %v712_v23 = vld [vmem:[#allocation2 + $0xb] sm:$0xff] }
 0x1de   :  { %3259 = vst [vmem:[#allocation111_spill] sm:$0xff] %v2510_v31  ;;  %v735_v40 = vmul.f32 %v3268_v35, %v732_v19  ;;  %v742_v62 = vmul.f32 %v3269_v47, %v739_v3  ;;  %v749_v17 = vmul.f32 %v3271_v6, %v746_v29  ;;  %v754_v31 = vld [vmem:[#allocation2 + $0x22] sm:$0xff]  ;;  %v723_v12 = vadd.f32 %v721_v36, %v693_v54  ;;  %v2540_v3 = vpop.permute.xlu1 %374 }
 0x1df   :  { %v760_v57 = vld [vmem:[#allocation2 + $0x1b] sm:$0xff]  ;;  %v3272_v5 = vstv %s3249_s4  ;;  %v3274_v8 = vstv %s3236_s3  ;;  %v3275_v19 = vstv %s3254_s27  ;;  %v3276_v29 = vstv %s3252_s7  ;;  %v761_v36 = vld [vmem:[#allocation2 + $0x23] sm:$0xff]  ;;  %s3280_s4 = sld [smem:[#allocation37_spill]]  ;;  %s3285_s3 = sld [smem:[#allocation38_spill]] }
 0x1e0   :  { %v701_v28 = vmul.f32 %v3272_v5, %v698_v27  ;;  %v722_v46 = vmul.f32 %v3274_v8, %v719_v39  ;;  %v729_v35 = vmul.f32 %v3275_v19, %v726_v30  ;;  %v708_v47 = vmul.f32 %v3276_v29, %v705_v50  ;;  %v767_v54 = vld [vmem:[#allocation2 + $0x1c] sm:$0xff]  ;;  %v2550_v27 = vpop.permute.xlu0 %372  ;;  %s3289_s7 = sld [smem:[#allocation39_spill]]  ;;  %s3290_s27 = sld [smem:[#allocation41_spill]] }
 0x1e1   :  { %v3277_v6 = vstv %s3261_s9  ;;  %v3278_v20 = vstv %s3262_s26  ;;  %v3279_v26 = vstv %s3270_s12  ;;  %v730_v39 = vadd.f32 %v728_v44, %v700_v49  ;;  %v774_v50 = vld [vmem:[#allocation2 + $0x1d] sm:$0xff]  ;;  %s3294_s9 = sld [smem:[#allocation43_spill]]  ;;  %s3303_s26 = sld [smem:[#allocation45_spill]] }
 0x1e2   :  { %v736_v9 = vmul.f32 %v3277_v6, %v733_v55  ;;  %v743_v48 = vmul.f32 %v3278_v20, %v740_v59  ;;  %v756_v13 = vmul.f32 %v3279_v26, %v753_v34  ;;  %v3281_v5 = vstv %s3263_s14  ;;  %v788_v59 = vld [vmem:[#allocation2 + $0x30] sm:$0xff]  ;;  %v781_v44 = vld [vmem:[#allocation2 + $0x1e] sm:$0xff]  ;;  %s3288_s14 = sld [smem:[#allocation40_spill]]  ;;  %s3305_s12 = sld [smem:[#allocation46_spill]] }
 0x1e3   :  { %v750_v30 = vmul.f32 %v3281_v5, %v747_v53  ;;  %v3282_v8 = vmov %v3279_v26  ;;  %v3283_v4 = vstv %s3273_s2  ;;  %v737_v29 = vadd.f32 %v735_v40, %v707_v14  ;;  %v795_v53 = vld [vmem:[#allocation2 + $0x31] sm:$0xff]  ;;  %v2564_v5 = vpop.permute.xlu1 %456  ;;  %v768_v14 = vld [vmem:[#allocation2 + $0x24] sm:$0xff]  ;;  %s3306_s2 = sld [smem:[#allocation47_spill]] }
 0x1e4   :  { %v757_v19 = vmul.f32 %v3282_v8, %v754_v31  ;;  %v763_v15 = vmul.f32 %v3283_v4, %v760_v57  ;;  %v744_v55 = vadd.f32 %v742_v62, %v714_v11  ;;  %v3284_v6 = vstv %s3258_s13  ;;  %v802_v31 = vld [vmem:[#allocation2 + $0x32] sm:$0xff]  ;;  %v775_v40 = vld [vmem:[#allocation2 + $0x25] sm:$0xff]  ;;  %s3292_s13 = sld [smem:[#allocation42_spill]] }
 0x1e5   :  { %v715_v20 = vmul.f32 %v3284_v6, %v712_v23  ;;  %v751_v34 = vadd.f32 %v749_v17, %v723_v12  ;;  %v724_v26 = vadd.f32 %v722_v46, %v694_v2  ;;  %v731_v61 = vadd.f32 %v729_v35, %v701_v28  ;;  %v782_v17 = vld [vmem:[#allocation2 + $0x26] sm:$0xff]  ;;  %v796_v12 = vld [vmem:[#allocation2 + $0x39] sm:$0xff] }
 0x1e6   :  { %v3286_v18 = vmov %v3283_v4  ;;  %v3287_v56 = vstv %s3280_s4  ;;  %v738_v57 = vadd.f32 %v736_v9, %v708_v47  ;;  %v758_v11 = vadd.f32 %v756_v13, %v730_v39  ;;  %v809_v13 = vld [vmem:[#allocation2 + $0x33] sm:$0xff] }
 0x1e7   :  { %v764_v60 = vmul.f32 %v3286_v18, %v761_v36  ;;  %v770_v49 = vmul.f32 %v3287_v56, %v767_v54  ;;  %v745_v4 = vadd.f32 %v743_v48, %v715_v20  ;;  %v3291_v62 = vstv %s3285_s3  ;;  %v2569_v18 = vpop.permute.xlu0 %454  ;;  %v789_v36 = vld [vmem:[#allocation2 + $0x38] sm:$0xff]  ;;  %s3317_s3 = sld [smem:[#allocation24_spill]] }
 0x1e8   :  { %v777_v46 = vmul.f32 %v3291_v62, %v774_v50  ;;  %v752_v56 = vadd.f32 %v750_v30, %v724_v26  ;;  %v759_v28 = vadd.f32 %v757_v19, %v731_v61  ;;  %v765_v2 = vadd.f32 %v763_v15, %v737_v29  ;;  %v803_v20 = vld [vmem:[#allocation2 + $0x3a] sm:$0xff]  ;;  %v539_v26 = vpop.permute.xlu1 %538 }
 0x1e9   :  { %v3293_v9 = vstv %s3288_s14  ;;  %v3295_v35 = vstv %s3289_s7  ;;  %v3296_v54 = vstv %s3290_s27  ;;  %v766_v61 = vadd.f32 %v764_v60, %v738_v57  ;;  %v817_v60 = vld [vmem:[#allocation2 + $0x3c] sm:$0xff]  ;;  %s3319_s7 = sld [smem:[#allocation48_spill]]  ;;  %s3326_s27 = sld [smem:[#allocation50_spill]] }
 0x1ea   :  { %v791_v48 = vmul.f32 %v3293_v9, %v788_v59  ;;  %v779_v23 = vadd.f32 %v777_v46, %v751_v34  ;;  %v784_v47 = vmul.f32 %v3295_v35, %v781_v44  ;;  %v798_v39 = vmul.f32 %v3296_v54, %v795_v53  ;;  %v810_v59 = vld [vmem:[#allocation2 + $0x3b] sm:$0xff] }
 0x1eb   :  { %v3297_v30 = vstv %s3292_s13  ;;  %v3298_v15 = vstv %s3280_s4  ;;  %v772_v50 = vadd.f32 %v770_v49, %v744_v55  ;;  %v3299_v29 = vmov %v3291_v62  ;;  %v816_v53 = vld [vmem:[#allocation2 + $0x34] sm:$0xff]  ;;  %v459_v57 = vpop.permute.xlu0 %458  ;;  %s3307_s4 = sld [smem:[#allocation23_spill]] }
 0x1ec   :  { %v805_v8 = vmul.f32 %v3297_v30, %v802_v31  ;;  %v771_v19 = vmul.f32 %v3298_v15, %v768_v14  ;;  %v778_v6 = vmul.f32 %v3299_v29, %v775_v40  ;;  %v3300_v62 = vmov %v3295_v35  ;;  %v830_v30 = vld [vmem:[#allocation2 + $0x36] sm:$0xff] }
 0x1ed   :  { %v785_v34 = vmul.f32 %v3300_v62, %v782_v17  ;;  %v786_v46 = vadd.f32 %v784_v47, %v758_v11  ;;  %v3301_v44 = vstv %s3294_s9  ;;  %v3302_v35 = vmov %v3296_v54  ;;  %v823_v17 = vld [vmem:[#allocation2 + $0x35] sm:$0xff]  ;;  %v1110_v11 = vld [vmem:[#allocation2 + $0xc4] sm:$0xff]  ;;  %s3328_s9 = sld [smem:[#allocation53_spill]] }
 0x1ee   :  { %v812_v9 = vmul.f32 %v3301_v44, %v809_v13  ;;  %v799_v31 = vmul.f32 %v3302_v35, %v796_v12  ;;  %v773_v55 = vadd.f32 %v771_v19, %v745_v4  ;;  %v780_v49 = vadd.f32 %v778_v6, %v752_v56 }
 0x1ef   :  { %v3304_v14 = vstv %s3288_s14  ;;  %v793_v54 = vadd.f32 %v791_v48, %v765_v2  ;;  %v800_v47 = vadd.f32 %v798_v39, %v772_v50  ;;  %v807_v13 = vadd.f32 %v805_v8, %v779_v23  ;;  %v543_v2 = vpop.permute.xlu1 %542  ;;  %v541_v39 = vpop.permute.xlu0 %540  ;;  %s3318_s14 = sld [smem:[#allocation25_spill]] }
 0x1f0   :  { %v792_v40 = vmul.f32 %v3304_v14, %v789_v36  ;;  %v3308_v15 = vstv %s3292_s13  ;;  %v3309_v12 = vmov %v3301_v44  ;;  %v824_v44 = vld [vmem:[#allocation2 + $0x3d] sm:$0xff]  ;;  %v787_v35 = vadd.f32 %v785_v34, %v759_v28  ;;  %s3327_s13 = sld [smem:[#allocation52_spill]] }
 0x1f1   :  { %v806_v29 = vmul.f32 %v3308_v15, %v803_v20  ;;  %v813_v62 = vmul.f32 %v3309_v12, %v810_v59  ;;  %v3310_v4 = vstv %s3303_s26  ;;  %v801_v19 = vadd.f32 %v799_v31, %v773_v55  ;;  %v1125_v15 = vld [vmem:[#allocation2 + $0xce] sm:$0xff]  ;;  %v886_v12 = vld [vmem:[#allocation2 + $0x60] sm:$0xff]  ;;  %s3335_s26 = sld [smem:[#allocation54_spill]] }
 0x1f2   :  { %v819_v56 = vmul.f32 %v3310_v4, %v816_v53  ;;  %v3311_v36 = vmov %v3310_v4  ;;  %v814_v48 = vadd.f32 %v812_v9, %v786_v46  ;;  %v3312_v14 = vstv %s3305_s12  ;;  %v831_v53 = vld [vmem:[#allocation2 + $0x3e] sm:$0xff]  ;;  %s3336_s12 = sld [smem:[#allocation55_spill]] }
 0x1f3   :  { %v820_v6 = vmul.f32 %v3311_v36, %v817_v60  ;;  %v826_v10 = vmul.f32 %v3312_v14, %v823_v17  ;;  %v3313_v0 = vstv %s3306_s2  ;;  %v381_v23 = vsel %vm342_vm7, %v2540_v3, 0.0 }
 0x1f4   :  { %v833_v33 = vmul.f32 %v3313_v0, %v830_v30  ;;  %v3314_v8 = vstv %s3307_s4  ;;  %v794_v28 = vadd.f32 %v792_v40, %v766_v61  ;;  %v821_v20 = vadd.f32 %v819_v56, %v793_v54  ;;  %384 = vst.msk [vmem:[#allocation2 + $0x70] sm:$0xff] %vm68_vm2, %v381_v23  ;;  %v328_v40 = vpop.permute.xlu1 %327  ;;  %v1111_v54 = vld [vmem:[#allocation2 + $0xcc] sm:$0xff]  ;;  %s3339_s4 = sld [smem:[#allocation57_spill]] }
 0x1f5   :  { %v2609_v50 = vmul.f32 %v3314_v8, %v1110_v11  ;;  %v3315_v59 = vmov %v3312_v14  ;;  %v828_v46 = vadd.f32 %v826_v10, %v800_v47  ;;  %v808_v31 = vadd.f32 %v806_v29, %v780_v49  ;;  %v1117_v49 = vld [vmem:[#allocation2 + $0xc5] sm:$0xff] }
 0x1f6   :  { %v827_v34 = vmul.f32 %v3315_v59, %v824_v44  ;;  %v835_v9 = vadd.f32 %v833_v33, %v807_v13  ;;  %v815_v0 = vadd.f32 %v813_v62, %v787_v35  ;;  %v822_v60 = vadd.f32 %v820_v6, %v794_v28 }
 0x1f7   :  { %v380_v3 = vsel %vm342_vm7, %v2550_v27, 0.0  ;;  %v464_v61 = vsel %vm426_vm8, %v2564_v5, 0.0  ;;  %v842_v17 = vadd.f32 %v2213_v1, %v814_v48  ;;  %v3316_v30 = vstv %s3306_s2  ;;  %v326_v27 = vpop.permute.xlu0 %325  ;;  %v1118_v5 = vld [vmem:[#allocation2 + $0xcd] sm:$0xff]  ;;  %s3338_s2 = sld [smem:[#allocation56_spill]] }
 0x1f8   :  { %v829_v55 = vadd.f32 %v827_v34, %v801_v19  ;;  %v834_v11 = vmul.f32 %v3316_v30, %v831_v53  ;;  %383 = vst.msk [vmem:[#allocation2 + $0x68] sm:$0xff] %vm68_vm2, %v380_v3  ;;  %467 = vst.msk [vmem:[#allocation2 + $0x80] sm:$0xff] %vm68_vm2, %v464_v61  ;;  %v463_v10 = vsel %vm426_vm8, %v2569_v18, 0.0  ;;  %v547_v33 = vsel %vm510_vm9, %v539_v26, 0.0  ;;  %v1124_v26 = vld [vmem:[#allocation2 + $0xc6] sm:$0xff]  ;;  %v410_v56 = vpop.permute.xlu1 %409 }
 0x1f9   :  { %466 = vst.msk [vmem:[#allocation2 + $0x78] sm:$0xff] %vm68_vm2, %v463_v10  ;;  %550 = vst.msk [vmem:[#allocation2 + $0x90] sm:$0xff] %vm68_vm2, %v547_v33  ;;  %v465_v1 = vsel %vm426_vm8, %v459_v57, 0.0  ;;  %v549_v47 = vsel %vm510_vm9, %v543_v2, 0.0  ;;  %v548_v13 = vsel %vm510_vm9, %v541_v39, 0.0  ;;  %v335_v18 = vsel %vm257_vm6, %v328_v40, 0.0 }
 0x1fa   :  { %v849_v29 = vadd.f32 %v2221_v22, %v821_v20  ;;  %v836_v62 = vadd.f32 %v834_v11, %v808_v31  ;;  %v843_v57 = vadd.f32 %v2233_v52, %v815_v0  ;;  %468 = vst.msk [vmem:[#allocation2 + $0x88] sm:$0xff] %vm68_vm2, %v465_v1  ;;  %552 = vst.msk [vmem:[#allocation2 + $0xa0] sm:$0xff] %vm68_vm2, %v549_v47  ;;  %v334_v22 = vsel %vm257_vm6, %v326_v27, 0.0 }
 0x1fb   :  { %551 = vst.msk [vmem:[#allocation2 + $0x98] sm:$0xff] %vm68_vm2, %v548_v13  ;;  %338 = vst.msk [vmem:[#allocation2 + $0xe0] sm:$0xff] %vm68_vm2, %v335_v18  ;;  %v856_v44 = vadd.f32 %v2223_v24, %v828_v46  ;;  %v863_v35 = vadd.f32 %v2231_v32, %v835_v9  ;;  %v850_v52 = vadd.f32 %v2235_v7, %v822_v60  ;;  %v3320_v19 = vmov %v3314_v8  ;;  %v330_v32 = vpop.permute.xlu0 %329 }
 0x1fc   :  { %v857_v4 = vadd.f32 %v2237_v37, %v829_v55  ;;  %337 = vst.msk [vmem:[#allocation2 + $0xd8] sm:$0xff] %vm68_vm2, %v334_v22  ;;  %v2655_v36 = vmul.f32 %v3320_v19, %v1111_v54  ;;  %v3321_v6 = vstv %s3317_s3  ;;  %v418_v24 = vsel %vm342_vm7, %v410_v56, 0.0  ;;  %s3347_s3 = sld [smem:[#allocation58_spill]] }
 0x1fd   :  { %v2659_v2 = vmul.f32 %v3321_v6, %v1117_v49  ;;  %v3322_v48 = vmov %v3321_v6  ;;  %v3323_v23 = vstv %s3318_s14  ;;  %v3325_v8 = vstv %s3319_s7  ;;  %421 = vst.msk [vmem:[#allocation2 + $0x108] sm:$0xff] %vm68_vm2, %v418_v24  ;;  %s3348_s14 = sld [smem:[#allocation59_spill]]  ;;  %s3350_s7 = sld [smem:[#allocation60_spill]] }
 0x1fe   :  { %v2663_v14 = vmul.f32 %v3322_v48, %v1118_v5  ;;  %v2669_v7 = vmul.f32 %v3323_v23, %v1124_v26  ;;  %v3324_v37 = vmov %v3323_v23  ;;  %v889_v28 = vmul.f32 %v3325_v8, %v886_v12 }
 0x1ff   :  { %v2673_v39 = vmul.f32 %v3324_v37, %v1125_v15  ;;  %v336_v20 = vsel %vm257_vm6, %v330_v32, 0.0  ;;  %v864_v59 = vadd.f32 %v2243_v38, %v836_v62  ;;  %v870_v34 = vadd.f32 %v2245_v45, %v842_v17  ;;  %v887_v60 = vld [vmem:[#allocation2 + $0x68] sm:$0xff]  ;;  %v414_v45 = vpop.permute.xlu1 %413  ;;  %v412_v11 = vpop.permute.xlu0 %411  ;;  %v936_v6 = vld [vmem:[#allocation2 + $0x80] sm:$0xff] }
 0x200   :  { %v871_v53 = vadd.f32 %v2247_v63, %v843_v57  ;;  %v877_v46 = vadd.f32 %v2249_v25, %v849_v29  ;;  %339 = vst.msk [vmem:[#allocation2 + $0xe8] sm:$0xff] %vm68_vm2, %v336_v20  ;;  %v891_v9 = vadd.f32 %v889_v28, %v863_v35  ;;  %v878_v31 = vadd.f32 %v2255_v41, %v850_v52  ;;  %v893_v38 = vld [vmem:[#allocation2 + $0x61] sm:$0xff]  ;;  %v894_v55 = vld [vmem:[#allocation2 + $0x69] sm:$0xff]  ;;  %v935_v48 = vld [vmem:[#allocation2 + $0x78] sm:$0xff] }
 0x201   :  { %v884_v16 = vadd.f32 %v2257_v42, %v856_v44  ;;  %v885_v0 = vadd.f32 %v2259_v43, %v857_v4  ;;  %v3329_v3 = vmov %v3325_v8  ;;  %v3330_v61 = vstv %s3326_s27  ;;  %v900_v17 = vld [vmem:[#allocation2 + $0x62] sm:$0xff]  ;;  %v901_v30 = vld [vmem:[#allocation2 + $0x6a] sm:$0xff]  ;;  %s3351_s27 = sld [smem:[#allocation61_spill]] }
 0x202   :  { %v890_v63 = vmul.f32 %v3329_v3, %v887_v60  ;;  %v896_v25 = vmul.f32 %v3330_v61, %v893_v38  ;;  %v3331_v40 = vmov %v3330_v61  ;;  %v907_v41 = vld [vmem:[#allocation2 + $0x63] sm:$0xff]  ;;  %v420_v42 = vsel %vm342_vm7, %v414_v45, 0.0  ;;  %v908_v49 = vld [vmem:[#allocation2 + $0x6b] sm:$0xff]  ;;  %v956_v45 = vld [vmem:[#allocation2 + $0x7b] sm:$0xff] }
 0x203   :  { %v897_v54 = vmul.f32 %v3331_v40, %v894_v55  ;;  %v3332_v43 = vstv %s3327_s13  ;;  %v3334_v5 = vstv %s3328_s9  ;;  %v914_v47 = vld [vmem:[#allocation2 + $0x64] sm:$0xff]  ;;  %v915_v13 = vld [vmem:[#allocation2 + $0x6c] sm:$0xff]  ;;  %423 = vst.msk [vmem:[#allocation2 + $0x118] sm:$0xff] %vm68_vm2, %v420_v42  ;;  %v419_v18 = vsel %vm342_vm7, %v412_v11, 0.0  ;;  %v949_v55 = vld [vmem:[#allocation2 + $0x7a] sm:$0xff]  ;;  %s3363_s13 = sld [smem:[#allocation62_spill]] }
 0x204   :  { %v903_v10 = vmul.f32 %v3332_v43, %v900_v17  ;;  %v3333_v33 = vmov %v3332_v43  ;;  %v910_v1 = vmul.f32 %v3334_v5, %v907_v41  ;;  %v892_v26 = vadd.f32 %v890_v63, %v864_v59  ;;  %v921_v57 = vld [vmem:[#allocation2 + $0x65] sm:$0xff]  ;;  %v922_v22 = vld [vmem:[#allocation2 + $0x6d] sm:$0xff]  ;;  %422 = vst.msk [vmem:[#allocation2 + $0x110] sm:$0xff] %vm68_vm2, %v419_v18  ;;  %v942_v59 = vld [vmem:[#allocation2 + $0x79] sm:$0xff] }
 0x205   :  { %v904_v27 = vmul.f32 %v3333_v33, %v901_v30  ;;  %v898_v15 = vadd.f32 %v896_v25, %v870_v34  ;;  %v899_v29 = vadd.f32 %v897_v54, %v871_v53  ;;  %v3337_v12 = vmov %v3334_v5  ;;  %v928_v44 = vld [vmem:[#allocation2 + $0x66] sm:$0xff]  ;;  %v929_v19 = vld [vmem:[#allocation2 + $0x6e] sm:$0xff]  ;;  %v970_v54 = vld [vmem:[#allocation2 + $0x7d] sm:$0xff] }
 0x206   :  { %v911_v62 = vmul.f32 %v3337_v12, %v908_v49  ;;  %v905_v35 = vadd.f32 %v903_v10, %v877_v46  ;;  %v912_v21 = vadd.f32 %v910_v1, %v884_v16  ;;  %v3340_v4 = vstv %s3335_s26  ;;  %v984_v17 = vld [vmem:[#allocation2 + $0x90] sm:$0xff]  ;;  %v943_v10 = vld [vmem:[#allocation2 + $0x81] sm:$0xff] }
 0x207   :  { %v906_v52 = vadd.f32 %v904_v27, %v878_v31  ;;  %v917_v56 = vmul.f32 %v3340_v4, %v914_v47  ;;  %v3341_v32 = vmov %v3340_v4  ;;  %v3342_v37 = vstv %s3336_s12  ;;  %v950_v18 = vld [vmem:[#allocation2 + $0x82] sm:$0xff] }
 0x208   :  { %v913_v24 = vadd.f32 %v911_v62, %v885_v0  ;;  %v918_v23 = vmul.f32 %v3341_v32, %v915_v13  ;;  %v924_v8 = vmul.f32 %v3342_v37, %v921_v57  ;;  %v3343_v28 = vmov %v3342_v37  ;;  %v963_v0 = vld [vmem:[#allocation2 + $0x7c] sm:$0xff] }
 0x209   :  { %v925_v20 = vmul.f32 %v3343_v28, %v922_v22  ;;  %v919_v34 = vadd.f32 %v917_v56, %v891_v9  ;;  %v3344_v53 = vstv %s3338_s2  ;;  %v3346_v16 = vstv %s3339_s4  ;;  %v977_v9 = vld [vmem:[#allocation2 + $0x7e] sm:$0xff] }
 0x20a   :  { %v931_v60 = vmul.f32 %v3344_v53, %v928_v44  ;;  %v3345_v46 = vmov %v3344_v53  ;;  %v939_v38 = vmul.f32 %v3346_v16, %v936_v6  ;;  %v920_v3 = vadd.f32 %v918_v23, %v892_v26  ;;  %v957_v26 = vld [vmem:[#allocation2 + $0x83] sm:$0xff]  ;;  %v992_v53 = vld [vmem:[#allocation2 + $0x99] sm:$0xff] }
 0x20b   :  { %v932_v31 = vmul.f32 %v3345_v46, %v929_v19  ;;  %v926_v63 = vadd.f32 %v924_v8, %v898_v15  ;;  %v927_v61 = vadd.f32 %v925_v20, %v899_v29  ;;  %v3349_v25 = vmov %v3346_v16  ;;  %v964_v15 = vld [vmem:[#allocation2 + $0x84] sm:$0xff] }
 0x20c   :  { %v938_v40 = vmul.f32 %v3349_v25, %v935_v48  ;;  %v933_v30 = vadd.f32 %v931_v60, %v905_v35  ;;  %v941_v42 = vadd.f32 %v939_v38, %v913_v24  ;;  %v3352_v11 = vstv %s2131_s16  ;;  %v978_v48 = vld [vmem:[#allocation2 + $0x86] sm:$0xff]  ;;  %s3373_s16 = sld [smem:[#allocation49_spill]] }
 0x20d   :  { %v934_v41 = vadd.f32 %v932_v31, %v906_v52  ;;  %v945_v43 = vmul.f32 %v3352_v11, %v942_v59  ;;  %v3353_v27 = vstv %s2133_s15  ;;  %v3354_v5 = vstv %s3347_s3  ;;  %v971_v52 = vld [vmem:[#allocation2 + $0x85] sm:$0xff]  ;;  %v985_v59 = vld [vmem:[#allocation2 + $0x98] sm:$0xff]  ;;  %s3372_s15 = sld [smem:[#allocation44_spill]] }
 0x20e   :  { %v940_v33 = vadd.f32 %v938_v40, %v912_v21  ;;  %v952_v49 = vmul.f32 %v3353_v27, %v949_v55  ;;  %v959_v1 = vmul.f32 %v3354_v5, %v956_v45  ;;  %v3355_v47 = vstv %s3348_s14  ;;  %v998_v55 = vld [vmem:[#allocation2 + $0x92] sm:$0xff]  ;;  %v999_v45 = vld [vmem:[#allocation2 + $0x9a] sm:$0xff] }
 0x20f   :  { %v966_v13 = vmul.f32 %v3355_v47, %v963_v0  ;;  %v947_v29 = vadd.f32 %v945_v43, %v919_v34  ;;  %v3356_v12 = vstv %s2150_s20  ;;  %v3357_v57 = vstv %s3350_s7  ;;  %v991_v34 = vld [vmem:[#allocation2 + $0x91] sm:$0xff]  ;;  %s3396_s20 = sld [smem:[#allocation66_spill]] }
 0x210   :  { %v973_v62 = vmul.f32 %v3356_v12, %v970_v54  ;;  %v980_v22 = vmul.f32 %v3357_v57, %v977_v9  ;;  %v3358_v44 = vstv %s3351_s27  ;;  %v954_v21 = vadd.f32 %v952_v49, %v926_v63  ;;  %v1005_v0 = vld [vmem:[#allocation2 + $0x93] sm:$0xff] }
 0x211   :  { %v987_v35 = vmul.f32 %v3358_v44, %v984_v17  ;;  %v961_v4 = vadd.f32 %v959_v1, %v933_v30  ;;  %v968_v56 = vadd.f32 %v966_v13, %v940_v33  ;;  %v3359_v19 = vmov %v3352_v11  ;;  %v1006_v17 = vld [vmem:[#allocation2 + $0x9b] sm:$0xff] }
 0x212   :  { %v946_v6 = vmul.f32 %v3359_v19, %v943_v10  ;;  %v975_v24 = vadd.f32 %v973_v62, %v947_v29  ;;  %v3360_v32 = vmov %v3353_v27  ;;  %v3361_v37 = vmov %v3354_v5  ;;  %v1012_v49 = vld [vmem:[#allocation2 + $0x94] sm:$0xff] }
 0x213   :  { %v953_v23 = vmul.f32 %v3360_v32, %v950_v18  ;;  %v960_v8 = vmul.f32 %v3361_v37, %v957_v26  ;;  %v3362_v28 = vmov %v3355_v47  ;;  %v982_v60 = vadd.f32 %v980_v22, %v954_v21  ;;  %v1013_v18 = vld [vmem:[#allocation2 + $0x9c] sm:$0xff] }
 0x214   :  { %v967_v20 = vmul.f32 %v3362_v28, %v964_v15  ;;  %v989_v46 = vadd.f32 %v987_v35, %v961_v4  ;;  %v948_v31 = vadd.f32 %v946_v6, %v920_v3  ;;  %v3364_v16 = vmov %v3356_v12  ;;  %v1019_v26 = vld [vmem:[#allocation2 + $0x95] sm:$0xff]  ;;  %v1020_v15 = vld [vmem:[#allocation2 + $0x9d] sm:$0xff] }
 0x215   :  { %v974_v38 = vmul.f32 %v3364_v16, %v971_v52  ;;  %v955_v63 = vadd.f32 %v953_v23, %v927_v61  ;;  %v962_v25 = vadd.f32 %v960_v8, %v934_v41  ;;  %v3365_v54 = vmov %v3357_v57  ;;  %v1027_v35 = vld [vmem:[#allocation2 + $0x9e] sm:$0xff] }
 0x216   :  { %v969_v40 = vadd.f32 %v967_v20, %v941_v42  ;;  %v981_v9 = vmul.f32 %v3365_v54, %v978_v48  ;;  %v3366_v11 = vmov %v3358_v44  ;;  %v3367_v10 = vstv %s3363_s13  ;;  %v1026_v44 = vld [vmem:[#allocation2 + $0x96] sm:$0xff]  ;;  %v2766_v48 = vpop.permute.xlu1 %495 }
 0x217   :  { %v976_v30 = vadd.f32 %v974_v38, %v948_v31  ;;  %v988_v43 = vmul.f32 %v3366_v11, %v985_v59  ;;  %v994_v3 = vmul.f32 %v3367_v10, %v991_v34  ;;  %v3368_v33 = vmov %v3367_v10  ;;  %v2774_v59 = vpop.permute.xlu0 %493  ;;  %v3381_v38 = vld [vmem:[#allocation91_spill] sm:$0xff] }
 0x218   :  { %v995_v27 = vmul.f32 %v3368_v33, %v992_v53  ;;  %v983_v5 = vadd.f32 %v981_v9, %v955_v63  ;;  %v3369_v1 = vstv %s2171_s11  ;;  %v3371_v41 = vstv %s2173_s10  ;;  %v3382_v63 = vld [vmem:[#allocation90_spill] sm:$0xff]  ;;  %s3383_s10 = sld [smem:[#allocation63_spill]]  ;;  %v3385_v11 = vld [vmem:[#allocation95_spill] sm:$0xff]  ;;  %s3392_s11 = sld [smem:[#allocation64_spill]] }
 0x219   :  { %v1001_v47 = vmul.f32 %v3369_v1, %v998_v55  ;;  %v3370_v13 = vmov %v3369_v1  ;;  %v1008_v42 = vmul.f32 %v3371_v41, %v1005_v0  ;;  %v990_v29 = vadd.f32 %v988_v43, %v962_v25 }
 0x21a   :  { %v1002_v61 = vmul.f32 %v3370_v13, %v999_v45  ;;  %v996_v12 = vadd.f32 %v994_v3, %v968_v56  ;;  %v997_v62 = vadd.f32 %v995_v27, %v969_v40  ;;  %v3374_v57 = vmov %v3371_v41  ;;  %v1132_v40 = vld [vmem:[#allocation2 + $0xe0] sm:$0xff]  ;;  %v3387_v3 = vld [vmem:[#allocation93_spill] sm:$0xff]  ;;  %v3390_v41 = vld [vmem:[#allocation94_spill] sm:$0xff] }
 0x21b   :  { %v1009_v22 = vmul.f32 %v3374_v57, %v1006_v17  ;;  %v1003_v52 = vadd.f32 %v1001_v47, %v975_v24  ;;  %v1010_v4 = vadd.f32 %v1008_v42, %v982_v60  ;;  %v3375_v19 = vstv %s2180_s28  ;;  %v3384_v17 = vld [vmem:[#allocation92_spill] sm:$0xff]  ;;  %v1131_v47 = vld [vmem:[#allocation2 + $0xd8] sm:$0xff]  ;;  %s3461_s28 = sld [smem:[#allocation74_spill]] }
 0x21c   :  { %v1004_v21 = vadd.f32 %v1002_v61, %v976_v30  ;;  %v1015_v6 = vmul.f32 %v3375_v19, %v1012_v49  ;;  %v3376_v23 = vmov %v3375_v19  ;;  %v3377_v8 = vstv %s3372_s15  ;;  %v3388_v27 = vld [vmem:[#allocation100_spill] sm:$0xff] }
 0x21d   :  { %v1011_v32 = vadd.f32 %v1009_v22, %v983_v5  ;;  %v1016_v37 = vmul.f32 %v3376_v23, %v1013_v18  ;;  %v1022_v28 = vmul.f32 %v3377_v8, %v1019_v26  ;;  %v3378_v56 = vmov %v3377_v8  ;;  %v3389_v5 = vld [vmem:[#allocation102_spill] sm:$0xff]  ;;  %v1138_v13 = vld [vmem:[#allocation2 + $0xd9] sm:$0xff]  ;;  %v3391_v18 = vld [vmem:[#allocation101_spill] sm:$0xff]  ;;  %v578_v22 = vpop.permute.xlu1 %577 }
 0x21e   :  { %v1023_v20 = vmul.f32 %v3378_v56, %v1020_v15  ;;  %v1017_v34 = vadd.f32 %v1015_v6, %v989_v46  ;;  %v3379_v53 = vstv %s3373_s16  ;;  %v1038_v60 = vadd.f32 %v3381_v38, %v1010_v4  ;;  %v3386_v46 = vld [vmem:[#allocation99_spill] sm:$0xff]  ;;  %v3393_v15 = vld [vmem:[#allocation96_spill] sm:$0xff]  ;;  %v3398_v4 = vld [vmem:[#allocation97_spill] sm:$0xff] }
 0x21f   :  { %v1029_v31 = vmul.f32 %v3379_v53, %v1026_v44  ;;  %v3380_v16 = vmov %v3379_v53  ;;  %v1018_v55 = vadd.f32 %v1016_v37, %v990_v29  ;;  %v1024_v45 = vadd.f32 %v1022_v28, %v996_v12  ;;  %v1145_v61 = vld [vmem:[#allocation2 + $0xda] sm:$0xff]  ;;  %v3399_v6 = vld [vmem:[#allocation106_spill] sm:$0xff]  ;;  %v498_v28 = vpop.permute.xlu0 %497 }
 0x220   :  { %v1030_v24 = vmul.f32 %v3380_v16, %v1027_v35  ;;  %v1025_v0 = vadd.f32 %v1023_v20, %v997_v62  ;;  %v1039_v25 = vadd.f32 %v3382_v63, %v1011_v32  ;;  %v1045_v30 = vadd.f32 %v3384_v17, %v1017_v34  ;;  %v1152_v57 = vld [vmem:[#allocation2 + $0xdb] sm:$0xff]  ;;  %v3400_v56 = vld [vmem:[#allocation98_spill] sm:$0xff] }
 0x221   :  { %v1031_v54 = vadd.f32 %v1029_v31, %v1003_v52  ;;  %v1066_v43 = vadd.f32 %v3385_v11, %v1038_v60  ;;  %v1046_v10 = vadd.f32 %v3386_v46, %v1018_v55  ;;  %v1052_v33 = vadd.f32 %v3387_v3, %v1024_v45  ;;  %v3395_v44 = vld [vmem:[#allocation103_spill] sm:$0xff]  ;;  %v3397_v52 = vld [vmem:[#allocation104_spill] sm:$0xff]  ;;  %v3405_v45 = vld [vmem:[#allocation110_spill] sm:$0xff] }
 0x222   :  { %v1032_v9 = vadd.f32 %v1030_v24, %v1004_v21  ;;  %v1053_v49 = vadd.f32 %v3388_v27, %v1025_v0  ;;  %v1067_v1 = vadd.f32 %v3389_v5, %v1039_v25  ;;  %v1073_v29 = vadd.f32 %v3393_v15, %v1045_v30  ;;  %v1159_v23 = vld [vmem:[#allocation2 + $0xdc] sm:$0xff]  ;;  %v1160_v27 = vld [vmem:[#allocation2 + $0xe4] sm:$0xff] }
 0x223   :  { %v1059_v42 = vadd.f32 %v3390_v41, %v1031_v54  ;;  %v3394_v12 = vstv %s3383_s10  ;;  %v1074_v35 = vadd.f32 %v3395_v44, %v1046_v10  ;;  %v1080_v19 = vadd.f32 %v3398_v4, %v1052_v33  ;;  %v1166_v37 = vld [vmem:[#allocation2 + $0xdd] sm:$0xff]  ;;  %v1174_v41 = vld [vmem:[#allocation2 + $0xe6] sm:$0xff] }
 0x224   :  { %v1060_v26 = vadd.f32 %v3391_v18, %v1032_v9  ;;  %v1135_v62 = vmul.f32 %v3394_v12, %v1132_v40  ;;  %v1081_v21 = vadd.f32 %v3397_v52, %v1053_v49  ;;  %v1094_v32 = vadd.f32 %v3399_v6, %v1066_v43  ;;  %v1173_v8 = vld [vmem:[#allocation2 + $0xde] sm:$0xff]  ;;  %v582_v52 = vpop.permute.xlu1 %581 }
 0x225   :  { %v1087_v20 = vadd.f32 %v3400_v56, %v1059_v42  ;;  %v3401_v34 = vmov %v3394_v12  ;;  %v3402_v31 = vstv %s3392_s11  ;;  %v3403_v24 = vstv %s3177_s5  ;;  %v3404_v60 = vld [vmem:[#allocation111_spill] sm:$0xff]  ;;  %v1139_v54 = vld [vmem:[#allocation2 + $0xe1] sm:$0xff]  ;;  %s3471_s5 = sld [smem:[#allocation51_spill]] }
 0x226   :  { %v1134_v53 = vmul.f32 %v3401_v34, %v1131_v47  ;;  %v1141_v16 = vmul.f32 %v3402_v31, %v1138_v13  ;;  %v1148_v38 = vmul.f32 %v3403_v24, %v1145_v61  ;;  %v1109_v55 = vadd.f32 %v3404_v60, %v1081_v21  ;;  %v1146_v9 = vld [vmem:[#allocation2 + $0xe2] sm:$0xff]  ;;  %v3411_v42 = vld [vmem:[#allocation107_spill] sm:$0xff] }
 0x227   :  { %v1108_v0 = vadd.f32 %v3405_v45, %v1080_v19  ;;  %v1122_v63 = vadd.f32 %v2659_v2, %v1094_v32  ;;  %v3406_v25 = vstv %s3396_s20  ;;  %v1115_v17 = vadd.f32 %v2609_v50, %v1087_v20  ;;  %v1153_v33 = vld [vmem:[#allocation2 + $0xe3] sm:$0xff] }
 0x228   :  { %v1155_v40 = vmul.f32 %v3406_v25, %v1152_v57  ;;  %v3407_v30 = vstv %s2209_s19  ;;  %v3408_v43 = vstv %s2217_s30  ;;  %v3409_v10 = vstv %s3178_s29  ;;  %v1167_v2 = vld [vmem:[#allocation2 + $0xe5] sm:$0xff]  ;;  %s3424_s19 = sld [smem:[#allocation67_spill]]  ;;  %s3464_s30 = sld [smem:[#allocation70_spill]] }
 0x229   :  { %v1162_v11 = vmul.f32 %v3407_v30, %v1159_v23  ;;  %v1169_v46 = vmul.f32 %v3408_v43, %v1166_v37  ;;  %v1176_v3 = vmul.f32 %v3409_v10, %v1173_v8  ;;  %v1137_v49 = vadd.f32 %v1135_v62, %v1109_v55  ;;  %v3410_v13 = vld [vmem:[#allocation105_spill] sm:$0xff]  ;;  %v580_v37 = vpop.permute.xlu0 %579  ;;  %s3477_s29 = sld [smem:[#allocation68_spill]] }
 0x22a   :  { %v1136_v5 = vadd.f32 %v1134_v53, %v1108_v0  ;;  %v1150_v47 = vadd.f32 %v1148_v38, %v1122_v63  ;;  %v1088_v61 = vadd.f32 %v3410_v13, %v1060_v26  ;;  %v1143_v50 = vadd.f32 %v1141_v16, %v1115_v17  ;;  %v3421_v17 = vld [vmem:[#allocation79_spill] sm:$0xff] }
 0x22b   :  { %v1095_v18 = vadd.f32 %v3411_v42, %v1067_v1  ;;  %v3412_v15 = vmov %v3402_v31  ;;  %v3413_v57 = vmov %v3403_v24  ;;  %v3414_v4 = vmov %v3406_v25  ;;  %v3419_v24 = vld [vmem:[#allocation109_spill] sm:$0xff] }
 0x22c   :  { %v1142_v12 = vmul.f32 %v3412_v15, %v1139_v54  ;;  %v1149_v44 = vmul.f32 %v3413_v57, %v1146_v9  ;;  %v1116_v21 = vadd.f32 %v2655_v36, %v1088_v61  ;;  %v1156_v19 = vmul.f32 %v3414_v4, %v1153_v33  ;;  %v1229_v25 = vld [vmem:[#allocation2 + $0x108] sm:$0xff]  ;;  %v1230_v54 = vld [vmem:[#allocation2 + $0x110] sm:$0xff]  ;;  %v3428_v61 = vld [vmem:[#allocation87_spill] sm:$0xff] }
 0x22d   :  { %v3415_v6 = vmov %v3407_v30  ;;  %v3416_v32 = vmov %v3408_v43  ;;  %v1123_v26 = vadd.f32 %v2663_v14, %v1095_v18  ;;  %v3417_v8 = vmov %v3409_v10  ;;  %v3422_v30 = vld [vmem:[#allocation80_spill] sm:$0xff]  ;;  %v3423_v43 = vld [vmem:[#allocation81_spill] sm:$0xff] }
 0x22e   :  { %v1163_v62 = vmul.f32 %v3415_v6, %v1160_v27  ;;  %v1170_v23 = vmul.f32 %v3416_v32, %v1167_v2  ;;  %v1177_v56 = vmul.f32 %v3417_v8, %v1174_v41  ;;  %v503_v1 = vsel %vm426_vm8, %v2766_v48, 0.0  ;;  %v1237_v2 = vld [vmem:[#allocation2 + $0x111] sm:$0xff]  ;;  %v3430_v18 = vld [vmem:[#allocation89_spill] sm:$0xff]  ;;  %v3431_v15 = vld [vmem:[#allocation75_spill] sm:$0xff] }
 0x22f   :  { %v502_v20 = vsel %vm426_vm8, %v2774_v59, 0.0  ;;  %v1144_v36 = vadd.f32 %v1142_v12, %v1116_v21  ;;  %506 = vst.msk [vmem:[#allocation2 + $0x128] sm:$0xff] %vm68_vm2, %v503_v1  ;;  %v586_v34 = vsel %vm510_vm9, %v578_v22, 0.0  ;;  %v504_v14 = vsel %vm426_vm8, %v498_v28, 0.0  ;;  %v3418_v59 = vld [vmem:[#allocation108_spill] sm:$0xff]  ;;  %v3432_v57 = vld [vmem:[#allocation76_spill] sm:$0xff] }
 0x230   :  { %505 = vst.msk [vmem:[#allocation2 + $0x120] sm:$0xff] %vm68_vm2, %v502_v20  ;;  %v588_v53 = vsel %vm510_vm9, %v582_v52, 0.0  ;;  %v1151_v31 = vadd.f32 %v1149_v44, %v1123_v26  ;;  %589 = vst.msk [vmem:[#allocation2 + $0x138] sm:$0xff] %vm68_vm2, %v586_v34  ;;  %v587_v48 = vsel %vm510_vm9, %v580_v37, 0.0  ;;  %v1101_v16 = vadd.f32 %v3418_v59, %v1073_v29  ;;  %v1250_v6 = vld [vmem:[#allocation2 + $0x10b] sm:$0xff]  ;;  %v1258_v34 = vld [vmem:[#allocation2 + $0x114] sm:$0xff] }
 0x231   :  { %507 = vst.msk [vmem:[#allocation2 + $0x130] sm:$0xff] %vm68_vm2, %v504_v14  ;;  %591 = vst.msk [vmem:[#allocation2 + $0x148] sm:$0xff] %vm68_vm2, %v588_v53  ;;  %v1102_v22 = vadd.f32 %v3419_v24, %v1074_v35  ;;  %v1164_v51 = vadd.f32 %v1162_v11, %v1136_v5  ;;  %v1165_v28 = vadd.f32 %v1163_v62, %v1137_v49  ;;  %v1243_v49 = vld [vmem:[#allocation2 + $0x10a] sm:$0xff]  ;;  %v1244_v5 = vld [vmem:[#allocation2 + $0x112] sm:$0xff]  ;;  %v3433_v52 = vstv %s3424_s19 }
 0x232   :  { %590 = vst.msk [vmem:[#allocation2 + $0x140] sm:$0xff] %vm68_vm2, %v587_v48  ;;  %v1171_v38 = vadd.f32 %v1169_v46, %v1143_v50  ;;  %v1172_v60 = vadd.f32 %v1170_v23, %v1144_v36  ;;  %v1129_v55 = vadd.f32 %v2669_v7, %v1101_v16  ;;  %v1178_v0 = vadd.f32 %v1176_v3, %v1150_v47  ;;  %v1236_v46 = vld [vmem:[#allocation2 + $0x109] sm:$0xff]  ;;  %v3426_v3 = vld [vmem:[#allocation83_spill] sm:$0xff]  ;;  %v3429_v50 = vld [vmem:[#allocation88_spill] sm:$0xff] }
 0x233   :  { %v1130_v45 = vadd.f32 %v2673_v39, %v1102_v22  ;;  %v1179_v63 = vadd.f32 %v1177_v56, %v1151_v31  ;;  %v1192_v9 = vadd.f32 %v3420_v58, %v1164_v51  ;;  %v1193_v29 = vadd.f32 %v3421_v17, %v1165_v28  ;;  %v3425_v7 = vld [vmem:[#allocation82_spill] sm:$0xff]  ;;  %v3439_v14 = vld [vmem:[#allocation84_spill] sm:$0xff]  ;;  %v3440_v31 = vld [vmem:[#allocation85_spill] sm:$0xff] }
 0x234   :  { %v1199_v35 = vadd.f32 %v3422_v30, %v1171_v38  ;;  %v1200_v11 = vadd.f32 %v3423_v43, %v1172_v60  ;;  %v1157_v10 = vadd.f32 %v1155_v40, %v1129_v55  ;;  %v1206_v39 = vadd.f32 %v3425_v7, %v1178_v0  ;;  %v3427_v47 = vld [vmem:[#allocation86_spill] sm:$0xff] }
 0x235   :  { %v1158_v33 = vadd.f32 %v1156_v19, %v1130_v45  ;;  %v1207_v27 = vadd.f32 %v3426_v3, %v1179_v63  ;;  %v1220_v13 = vadd.f32 %v3427_v47, %v1192_v9  ;;  %v1221_v41 = vadd.f32 %v3428_v61, %v1193_v29  ;;  %v1251_v62 = vld [vmem:[#allocation2 + $0x113] sm:$0xff] }
 0x236   :  { %v1227_v42 = vadd.f32 %v3429_v50, %v1199_v35  ;;  %v1228_v40 = vadd.f32 %v3430_v18, %v1200_v11  ;;  %v1185_v12 = vadd.f32 %v3431_v15, %v1157_v10  ;;  %v1232_v21 = vmul.f32 %v3433_v52, %v1229_v25  ;;  %v1257_v36 = vld [vmem:[#allocation2 + $0x10c] sm:$0xff]  ;;  %v1265_v22 = vld [vmem:[#allocation2 + $0x115] sm:$0xff] }
 0x237   :  { %v1186_v44 = vadd.f32 %v3432_v57, %v1158_v33  ;;  %v3434_v4 = vmov %v3433_v52  ;;  %v3435_v32 = vstv %s3191_s25  ;;  %v3437_v8 = vstv %s3192_s1  ;;  %v1264_v24 = vld [vmem:[#allocation2 + $0x10d] sm:$0xff]  ;;  %v1272_v63 = vld [vmem:[#allocation2 + $0x116] sm:$0xff]  ;;  %v1278_v30 = vld [vmem:[#allocation2 + $0x120] sm:$0xff] }
 0x238   :  { %v1233_v19 = vmul.f32 %v3434_v4, %v1230_v54  ;;  %v1239_v23 = vmul.f32 %v3435_v32, %v1236_v46  ;;  %v3436_v37 = vmov %v3435_v32  ;;  %v1246_v56 = vmul.f32 %v3437_v8, %v1243_v49  ;;  %v1271_v0 = vld [vmem:[#allocation2 + $0x10e] sm:$0xff]  ;;  %v1292_v61 = vld [vmem:[#allocation2 + $0x122] sm:$0xff] }
 0x239   :  { %v1240_v26 = vmul.f32 %v3436_v37, %v1237_v2  ;;  %v3438_v1 = vmov %v3437_v8  ;;  %v1213_v53 = vadd.f32 %v3439_v14, %v1185_v12  ;;  %v1214_v48 = vadd.f32 %v3440_v31, %v1186_v44  ;;  %v1279_v35 = vld [vmem:[#allocation2 + $0x128] sm:$0xff] }
 0x23a   :  { %v1247_v20 = vmul.f32 %v3438_v1, %v1244_v5  ;;  %v1234_v59 = vadd.f32 %v1232_v21, %v1206_v39  ;;  %v1235_v16 = vadd.f32 %v1233_v19, %v1207_v27  ;;  %v1248_v51 = vadd.f32 %v1246_v56, %v1220_v13  ;;  %v1285_v39 = vld [vmem:[#allocation2 + $0x121] sm:$0xff]  ;;  %v1286_v3 = vld [vmem:[#allocation2 + $0x129] sm:$0xff] }
 0x23b   :  { %v3441_v38 = vstv %s2264_s8  ;;  %v1241_v25 = vadd.f32 %v1239_v23, %v1213_v53  ;;  %v1242_v54 = vadd.f32 %v1240_v26, %v1214_v48  ;;  %v3443_v58 = vstv %s2308_s18  ;;  %s3449_s18 = sld [smem:[#allocation71_spill]]  ;;  %v1299_v57 = vld [vmem:[#allocation2 + $0x123] sm:$0xff]  ;;  %v1300_v44 = vld [vmem:[#allocation2 + $0x12b] sm:$0xff] }
 0x23c   :  { %v1249_v28 = vadd.f32 %v1247_v20, %v1221_v41  ;;  %v1253_v60 = vmul.f32 %v3441_v38, %v1250_v6  ;;  %v3442_v55 = vmov %v3441_v38  ;;  %v1260_v9 = vmul.f32 %v3443_v58, %v1257_v36  ;;  %v1293_v41 = vld [vmem:[#allocation2 + $0x12a] sm:$0xff] }
 0x23d   :  { %v1254_v45 = vmul.f32 %v3442_v55, %v1251_v62  ;;  %v3444_v17 = vmov %v3443_v58  ;;  %v3445_v46 = vstv %s2315_s22  ;;  %v3447_v49 = vstv %s2320_s21  ;;  %s3452_s22 = sld [smem:[#allocation65_spill]]  ;;  %v1306_v32 = vld [vmem:[#allocation2 + $0x124] sm:$0xff]  ;;  %s3455_s21 = sld [smem:[#allocation72_spill]]  ;;  %v1307_v23 = vld [vmem:[#allocation2 + $0x12c] sm:$0xff] }
 0x23e   :  { %v1261_v29 = vmul.f32 %v3444_v17, %v1258_v34  ;;  %v1255_v43 = vadd.f32 %v1253_v60, %v1227_v42  ;;  %v1267_v10 = vmul.f32 %v3445_v46, %v1264_v24  ;;  %v3446_v33 = vmov %v3445_v46  ;;  %v1313_v36 = vld [vmem:[#allocation2 + $0x125] sm:$0xff]  ;;  %v1314_v34 = vld [vmem:[#allocation2 + $0x12d] sm:$0xff] }
 0x23f   :  { %v1256_v11 = vadd.f32 %v1254_v45, %v1228_v40  ;;  %v1268_v7 = vmul.f32 %v3446_v33, %v1265_v22  ;;  %v1262_v27 = vadd.f32 %v1260_v9, %v1234_v59  ;;  %v1274_v5 = vmul.f32 %v3447_v49, %v1271_v0  ;;  %v1320_v24 = vld [vmem:[#allocation2 + $0x126] sm:$0xff]  ;;  %v1321_v22 = vld [vmem:[#allocation2 + $0x12e] sm:$0xff]  ;;  %v1327_v0 = vld [vmem:[#allocation2 + $0x138] sm:$0xff] }
 0x240   :  { %v1263_v2 = vadd.f32 %v1261_v29, %v1235_v16  ;;  %v3448_v47 = vmov %v3447_v49  ;;  %v1269_v50 = vadd.f32 %v1267_v10, %v1241_v25  ;;  %v3450_v18 = vstv %s2272_s24  ;;  %s3458_s24 = sld [smem:[#allocation73_spill]] }
 0x241   :  { %v1275_v13 = vmul.f32 %v3448_v47, %v1272_v63  ;;  %v1270_v42 = vadd.f32 %v1268_v7, %v1242_v54  ;;  %v1281_v40 = vmul.f32 %v3450_v18, %v1278_v30  ;;  %v3451_v15 = vmov %v3450_v18  ;;  %v1328_v63 = vld [vmem:[#allocation2 + $0x140] sm:$0xff] }
 0x242   :  { %v1282_v12 = vmul.f32 %v3451_v15, %v1279_v35  ;;  %v1276_v52 = vadd.f32 %v1274_v5, %v1248_v51  ;;  %v3453_v4 = vstv %s2284_s6  ;;  %v3456_v8 = vstv %s3449_s18  ;;  %v1334_v30 = vld [vmem:[#allocation2 + $0x139] sm:$0xff]  ;;  %v1335_v35 = vld [vmem:[#allocation2 + $0x141] sm:$0xff]  ;;  %s3476_s6 = sld [smem:[#allocation77_spill]] }
 0x243   :  { %v1277_v21 = vadd.f32 %v1275_v13, %v1249_v28  ;;  %v1288_v19 = vmul.f32 %v3453_v4, %v1285_v39  ;;  %v3454_v6 = vmov %v3453_v4  ;;  %v1283_v37 = vadd.f32 %v1281_v40, %v1255_v43  ;;  %v1341_v39 = vld [vmem:[#allocation2 + $0x13a] sm:$0xff] }
 0x244   :  { %v1289_v62 = vmul.f32 %v3454_v6, %v1286_v3  ;;  %v1284_v26 = vadd.f32 %v1282_v12, %v1256_v11  ;;  %v1295_v56 = vmul.f32 %v3456_v8, %v1292_v61  ;;  %v3457_v1 = vmov %v3456_v8  ;;  %v1342_v3 = vld [vmem:[#allocation2 + $0x142] sm:$0xff] }
 0x245   :  { %v1296_v20 = vmul.f32 %v3457_v1, %v1293_v41  ;;  %v1290_v14 = vadd.f32 %v1288_v19, %v1262_v27  ;;  %v3459_v31 = vstv %s3452_s22  ;;  %v3462_v38 = vstv %s3455_s21  ;;  %v1348_v61 = vld [vmem:[#allocation2 + $0x13b] sm:$0xff]  ;;  %v1349_v41 = vld [vmem:[#allocation2 + $0x143] sm:$0xff] }
 0x246   :  { %v1291_v53 = vadd.f32 %v1289_v62, %v1263_v2  ;;  %v1302_v48 = vmul.f32 %v3459_v31, %v1299_v57  ;;  %v3460_v59 = vmov %v3459_v31  ;;  %v1297_v51 = vadd.f32 %v1295_v56, %v1269_v50  ;;  %v1355_v57 = vld [vmem:[#allocation2 + $0x13c] sm:$0xff] }
 0x247   :  { %v1303_v16 = vmul.f32 %v3460_v59, %v1300_v44  ;;  %v1298_v28 = vadd.f32 %v1296_v20, %v1270_v42  ;;  %v1309_v60 = vmul.f32 %v3462_v38, %v1306_v32  ;;  %v3463_v55 = vmov %v3462_v38  ;;  %v1356_v44 = vld [vmem:[#allocation2 + $0x144] sm:$0xff] }
 0x248   :  { %v1310_v45 = vmul.f32 %v3463_v55, %v1307_v23  ;;  %v1304_v25 = vadd.f32 %v1302_v48, %v1276_v52  ;;  %v3465_v58 = vstv %s3458_s24  ;;  %v3467_v46 = vstv %s3461_s28  ;;  %v1362_v32 = vld [vmem:[#allocation2 + $0x13d] sm:$0xff]  ;;  %v1363_v23 = vld [vmem:[#allocation2 + $0x145] sm:$0xff] }
 0x249   :  { %v1305_v54 = vadd.f32 %v1303_v16, %v1277_v21  ;;  %v1316_v9 = vmul.f32 %v3465_v58, %v1313_v36  ;;  %v3466_v17 = vmov %v3465_v58  ;;  %v1311_v43 = vadd.f32 %v1309_v60, %v1283_v37  ;;  %v1369_v36 = vld [vmem:[#allocation2 + $0x13e] sm:$0xff] }
 0x24a   :  { %v1317_v29 = vmul.f32 %v3466_v17, %v1314_v34  ;;  %v1312_v11 = vadd.f32 %v1310_v45, %v1284_v26  ;;  %v1323_v10 = vmul.f32 %v3467_v46, %v1320_v24  ;;  %v3468_v33 = vmov %v3467_v46  ;;  %v1370_v34 = vld [vmem:[#allocation2 + $0x146] sm:$0xff] }
 0x24b   :  { %v1324_v7 = vmul.f32 %v3468_v33, %v1321_v22  ;;  %v1318_v27 = vadd.f32 %v1316_v9, %v1290_v14  ;;  %v3469_v49 = vstv %s3464_s30  ;;  %v3472_v18 = vstv %s2290_s0  ;;  %s1606_s0 = smov [#allocation8]  }
 0x24c   :  { %v1319_v2 = vadd.f32 %v1317_v29, %v1291_v53  ;;  %v1330_v5 = vmul.f32 %v3469_v49, %v1327_v0  ;;  %v3470_v47 = vmov %v3469_v49  ;;  %v1325_v50 = vadd.f32 %v1323_v10, %v1297_v51 }
 0x24d   :  { %v1331_v13 = vmul.f32 %v3470_v47, %v1328_v63  ;;  %v1326_v42 = vadd.f32 %v1324_v7, %v1298_v28  ;;  %v1337_v40 = vmul.f32 %v3472_v18, %v1334_v30  ;;  %v3473_v15 = vmov %v3472_v18 }
 0x24e   :  { %v1338_v12 = vmul.f32 %v3473_v15, %v1335_v35  ;;  %v1332_v52 = vadd.f32 %v1330_v5, %v1304_v25  ;;  %v3474_v4 = vstv %s2306_s17  ;;  %v3478_v8 = vstv %s3471_s5  ;;  %s1401_s17 = sshll.u32 %s1606_s0, 4  ;;  %s1402_s17 = int_to_ptr.vmem [resolvable:$true] %s1401_s17 }
 0x24f   :  { %v1333_v21 = vadd.f32 %v1331_v13, %v1305_v54  ;;  %v1344_v19 = vmul.f32 %v3474_v4, %v1341_v39  ;;  %v3475_v6 = vmov %v3474_v4  ;;  %v1339_v37 = vadd.f32 %v1337_v40, %v1311_v43  ;;  %s1566_s8 = scalar_lea.vmem %s1402_s17, 256  ;;  %p1571_p12 = scmp.lt.s32.totalorder %s1402_s17, %s1402_s17 }
 0x250   :  { %v1345_v62 = vmul.f32 %v3475_v6, %v1342_v3  ;;  %v1340_v26 = vadd.f32 %v1338_v12, %v1312_v11  ;;  %v1351_v56 = vmul.f32 %v3478_v8, %v1348_v61  ;;  %v3479_v1 = vmov %v3478_v8  ;;  %p1567_p11 = scmp.ne.s32.totalorder %s1402_s17, %s1566_s8  ;;  %p1572_p13 = scmp.lt.s32.totalorder %s1566_s8, %s1566_s8 }
 0x251   :  { %v1352_v20 = vmul.f32 %v3479_v1, %v1349_v41  ;;  %v1346_v14 = vadd.f32 %v1344_v19, %v1318_v27  ;;  %v3480_v31 = vstv %s2344_s23  ;;  %v3482_v51 = vstv %s3476_s6 }
 0x252   :  { %v1347_v53 = vadd.f32 %v1345_v62, %v1319_v2  ;;  %v1358_v48 = vmul.f32 %v3480_v31, %v1355_v57  ;;  %v3481_v59 = vmov %v3480_v31  ;;  %v1353_v24 = vadd.f32 %v1351_v56, %v1325_v50  ;;  %p1573_p0 = por %p1572_p13, %p1571_p12 }
 0x253   :  { %v1359_v16 = vmul.f32 %v3481_v59, %v1356_v44  ;;  %v1354_v22 = vadd.f32 %v1352_v20, %v1326_v42  ;;  %v1365_v28 = vmul.f32 %v3482_v51, %v1362_v32  ;;  %v3483_v38 = vmov %v3482_v51 }
 0x254   :  { %v1366_v60 = vmul.f32 %v3483_v38, %v1363_v23  ;;  %v1360_v55 = vadd.f32 %v1358_v48, %v1332_v52  ;;  %v3484_v0 = vstv %s3477_s29  ;;  %p1574_p1 = pnand %p1573_p0, %p1567_p11 }
 0x255   :  { %v1361_v45 = vadd.f32 %v1359_v16, %v1333_v21  ;;  %v1372_v63 = vmul.f32 %v3484_v0, %v1369_v36  ;;  %v3485_v25 = vmov %v3484_v0  ;;  %v1367_v58 = vadd.f32 %v1365_v28, %v1339_v37 }
 0x256   :  { %v1373_v54 = vmul.f32 %v3485_v25, %v1370_v34  ;;  %v1368_v9 = vadd.f32 %v1366_v60, %v1340_v26  ;;  %v1378_v30 = vadd.f32 %v1360_v55, %v1353_v24 }
 0x257   :  { %v1374_v17 = vadd.f32 %v1372_v63, %v1346_v14  ;;  %v1379_v35 = vadd.f32 %v1361_v45, %v1354_v22 }
 0x258   :  { %v1375_v29 = vadd.f32 %v1373_v54, %v1347_v53 }
 0x259   :  { %v1376_v43 = vadd.f32 %v1374_v17, %v1367_v58 }
 0x25a   :  { %v1377_v11 = vadd.f32 %v1375_v29, %v1368_v9 }
 0x25b   :  { %v1380_v46 = vadd.f32 %v1378_v30, %v1376_v43 }
 0x25c   :  { %v1381_v10 = vadd.f32 %v1379_v35, %v1377_v11 }
 0x25d   :  { %v1511_v33 = vmul.f32 -1.442695, %v1380_v46 }
 0x25e   :  { %v1512_v7 = vmul.f32 -1.442695, %v1381_v10 }
 0x25f   :  { %1526 = vpow2.f32 %v1511_v33 }
 0x260   :  { %1528 = vpow2.f32 %v1512_v7 }
 0x269   :  { %v1527_v39 = vpop.eup %1526 }
 0x26a   :  { %v1529_v3 = vpop.eup %1528  ;;  %v1388_v27 = vadd.f32 1.0, %v1527_v39 }
 0x26b   :  { %v1389_v2 = vadd.f32 1.0, %v1529_v3 }
 0x26c   :  { %1530 = vrcp.f32 %v1388_v27 }
 0x26d   :  { %1532 = vrcp.f32 %v1389_v2 }
 0x276   :  { %v1531_v49 = vpop.eup %1530 }
 0x277   :  { %v1533_v5 = vpop.eup %1532  ;;  %1394 = vst.msk [vmem:[#allocation8] sm:$0xff] %vm68_vm2, %v1531_v49 }
 0x278   :  { %1395 = vst.msk [vmem:[#allocation8 + $0x8] sm:$0xff] %vm68_vm2, %v1533_v5 }
 0x279   :  { %1577 = shalt.err (!%p1574_p1)
}
 0x27a   :  { %s3486_s1 = sld [smem:[#allocation112_spill]] }
 0x280   :  { %s1578_s9 = scalar_lea.hbm %s3486_s1, 256 }
 0x281   :  { %p1579_p2 = scmp.ne.s32.totalorder %s3486_s1, %s1578_s9  ;;  %p1582_p3 = scmp.lt.u32.totalorder %s1578_s9, %s3486_s1 }
 0x283   :  { %p1584_p4 = pnand %p1582_p3, %p1579_p2 }
 0x285   :  { %1587 = shalt.err (!%p1584_p4)
}
 0x286   :  { %s3487_s3 = smov 8   ;;  %s3488_s14 = smov 128  }
 0x287   :  { %1407 = dma.vmem_to_hbm [thread:$0]  %s1402_s17, 256, %s3486_s1, [#allocation5], %s3488_s14, %s3488_s14, %s3487_s3  }
 0x288   :  { %1592 = dma.done.wait [#allocation5], 256  }
 0x289   :  { %1593 = vsyncadd [#allocation5], 4294967040 }
 0x28a   :  { %1411 = vsyncpa [#allocation4], 1 }
 0x28b   :  { %1412 = vsyncpa [#allocation5], 1 }
 0x28c   :  { %1413 = vsyncpa [#allocation6], 1 }

</bundles_post_ra>
